<compile_context>
chip_gen: v7x
topology: tpu7x:2x2x1
jax: 0.10.0
libtpu: 0.0.40
codegen_flags: <defaults>
</compile_context>

<pallas_src>
import jax
import jax.numpy as jnp
import numpy as np
from jax.experimental import pallas as pl
from jax.experimental.pallas import tpu as pltpu

EPS = 1e-5


def feature_down_kernel(x_ref, w1_ref, g1_ref, b1_ref, w2_ref, g2_ref, b2_ref,
                        out_ref, pad1_ref, col1_ref, pad2_ref, col2_ref):
    # x_ref:    (N, H, W, Cin)          NHWC input
    # w*_ref:   (9*Ci, Cout)            im2col-flattened HWIO conv weights
    # g*/b*:    (1, Cout)               BN affine params
    # out_ref:  (N, H//2, W//2, Cout)
    # pad*_ref: (N, Ho+2, Wo+2, Ci)     zero-halo staging buffers
    # col*_ref: (N, Ho, Wo, 9*Ci)       im2col patch buffers
    N, H, W, Cin = x_ref.shape
    Ho, Wo = H // 2, W // 2
    M = N * Ho * Wo

    # ---- MaxPool2d(kernel_size=2, stride=2) --------------------------------
    p00 = x_ref[:, pl.ds(0, Ho, stride=2), pl.ds(0, Wo, stride=2), :]
    p01 = x_ref[:, pl.ds(0, Ho, stride=2), pl.ds(1, Wo, stride=2), :]
    p10 = x_ref[:, pl.ds(1, Ho, stride=2), pl.ds(0, Wo, stride=2), :]
    p11 = x_ref[:, pl.ds(1, Ho, stride=2), pl.ds(1, Wo, stride=2), :]
    pooled = jnp.maximum(jnp.maximum(p00, p01), jnp.maximum(p10, p11))

    # ---- Conv3x3(pad=1, bias=False) + BatchNorm2d(train stats) + ReLU ------
    def conv_bn_relu(inp, pad_ref, col_ref, w_ref, g_ref, b_ref):
        Ci = inp.shape[-1]
        Co = w_ref.shape[-1]

        # Zero-halo staging: interior written once; only the 4 border strips
        # are zero-filled (corners covered by the row strips).
        pad_ref[:, 1:Ho + 1, 1:Wo + 1, :] = inp
        zrow = jnp.zeros((N, 1, Wo + 2, Ci), jnp.float32)
        zcol = jnp.zeros((N, Ho, 1, Ci), jnp.float32)
        pad_ref[:, 0:1, :, :] = zrow
        pad_ref[:, Ho + 1:Ho + 2, :, :] = zrow
        pad_ref[:, 1:Ho + 1, 0:1, :] = zcol
        pad_ref[:, 1:Ho + 1, Wo + 1:Wo + 2, :] = zcol

        # im2col: lay the 9 shifted taps side by side on the channel (lane)
        # dim so the whole 3x3 conv is a single matmul with K = 9*Ci.
        for di in range(3):
            for dj in range(3):
                t = di * 3 + dj
                col_ref[:, :, :, t * Ci:(t + 1) * Ci] = \
                    pad_ref[:, di:di + Ho, dj:dj + Wo, :]

        patches = col_ref[...].reshape(M, 9 * Ci)               # (M, 9*Ci)
        acc = jnp.dot(patches, w_ref[...],
                      preferred_element_type=jnp.float32)       # (M, Co)

        # BatchNorm2d (training-mode batch stats), single pass + fused epilogue.
        inv_m = 1.0 / M
        s = jnp.sum(acc, axis=0, keepdims=True)                 # (1, Co)
        ss = jnp.sum(acc * acc, axis=0, keepdims=True)          # (1, Co)
        mean = s * inv_m
        var = jnp.maximum(ss * inv_m - mean * mean, 0.0)        # biased variance
        scale = g_ref[...] * jax.lax.rsqrt(var + EPS)           # (1, Co)
        shift = b_ref[...] - mean * scale                       # (1, Co)
        y = jnp.maximum(acc * scale + shift, 0.0)               # BN + ReLU
        return y.reshape(N, Ho, Wo, Co)

    h1 = conv_bn_relu(pooled, pad1_ref, col1_ref, w1_ref, g1_ref, b1_ref)
    h2 = conv_bn_relu(h1, pad2_ref, col2_ref, w2_ref, g2_ref, b2_ref)
    out_ref[...] = h2.astype(out_ref.dtype)


@jax.jit
def feature_down(x_nchw, params):
    """x_nchw: (N, Cin, H, W) float32. Returns (N, Cout, H//2, W//2)."""
    N, Cin, H, W = x_nchw.shape
    Cout = params["w1"].shape[0]
    Ho, Wo = H // 2, W // 2

    x_nhwc = jnp.transpose(x_nchw, (0, 2, 3, 1))                      # NCHW -> NHWC
    # OIHW -> HWIO -> (9*Ci, Cout) im2col weight matrix (row-major kh, kw, ci).
    w1 = jnp.transpose(params["w1"], (2, 3, 1, 0)).reshape(9 * Cin, Cout)
    w2 = jnp.transpose(params["w2"], (2, 3, 1, 0)).reshape(9 * Cout, Cout)
    g1 = params["g1"].reshape(1, Cout).astype(jnp.float32)
    b1 = params["b1"].reshape(1, Cout).astype(jnp.float32)
    g2 = params["g2"].reshape(1, Cout).astype(jnp.float32)
    b2 = params["b2"].reshape(1, Cout).astype(jnp.float32)

    full = lambda shape: pl.BlockSpec(shape, lambda i: (0,) * len(shape))

    out_nhwc = pl.pallas_call(
        feature_down_kernel,
        out_shape=jax.ShapeDtypeStruct((N, Ho, Wo, Cout), jnp.float32),
        grid=(1,),
        in_specs=[
            full((N, H, W, Cin)),
            full((9 * Cin, Cout)),
            full((1, Cout)),
            full((1, Cout)),
            full((9 * Cout, Cout)),
            full((1, Cout)),
            full((1, Cout)),
        ],
        out_specs=full((N, Ho, Wo, Cout)),
        scratch_shapes=[
            pltpu.VMEM((N, Ho + 2, Wo + 2, Cin), jnp.float32),   # stage-1 halo
            pltpu.VMEM((N, Ho, Wo, 9 * Cin), jnp.float32),       # stage-1 im2col
            pltpu.VMEM((N, Ho + 2, Wo + 2, Cout), jnp.float32),  # stage-2 halo
            pltpu.VMEM((N, Ho, Wo, 9 * Cout), jnp.float32),      # stage-2 im2col
        ],
        compiler_params=pltpu.CompilerParams(
            dimension_semantics=("arbitrary",)),
    )(x_nhwc, w1, g1, b1, w2, g2, b2)

    return jnp.transpose(out_nhwc, (0, 3, 1, 2))                      # NHWC -> NCHW


# ---------------- pure-JAX reference (for verification only) ----------------
def feature_down_ref(x, params):
    xp = jax.lax.reduce_window(x, -jnp.inf, jax.lax.max,
                               (1, 1, 2, 2), (1, 1, 2, 2), "VALID")

    def cbr(h, w, g, b):
        y = jax.lax.conv_general_dilated(
            h, w, window_strides=(1, 1), padding=((1, 1), (1, 1)),
            dimension_numbers=("NCHW", "OIHW", "NCHW"))
        mean = y.mean(axis=(0, 2, 3), keepdims=True)
        var = ((y - mean) ** 2).mean(axis=(0, 2, 3), keepdims=True)
        y = (y - mean) / jnp.sqrt(var + EPS) * g.reshape(1, -1, 1, 1) \
            + b.reshape(1, -1, 1, 1)
        return jnp.maximum(y, 0.0)

    h = cbr(xp, params["w1"], params["g1"], params["b1"])
    h = cbr(h, params["w2"], params["g2"], params["b2"])
    return h


if __name__ == "__main__":
    key = jax.random.PRNGKey(0)
    k_x, k_w1, k_w2, k_g1, k_b1, k_g2, k_b2 = jax.random.split(key, 7)

    N, Cin, Cout, H, W = 2, 4, 8, 16, 16
    x = jax.random.normal(k_x, (N, Cin, H, W), dtype=jnp.float32)

    params = {
        "w1": 0.2 * jax.random.normal(k_w1, (Cout, Cin, 3, 3), jnp.float32),
        "w2": 0.2 * jax.random.normal(k_w2, (Cout, Cout, 3, 3), jnp.float32),
        "g1": 1.0 + 0.1 * jax.random.normal(k_g1, (Cout,), jnp.float32),
        "b1": 0.1 * jax.random.normal(k_b1, (Cout,), jnp.float32),
        "g2": 1.0 + 0.1 * jax.random.normal(k_g2, (Cout,), jnp.float32),
        "b2": 0.1 * jax.random.normal(k_b2, (Cout,), jnp.float32),
    }

    out = feature_down(x, params)
    jax.block_until_ready(out)

    ref = feature_down_ref(x, params)
    np.testing.assert_allclose(np.asarray(out), np.asarray(ref),
                               rtol=2e-4, atol=2e-4)
    assert out.shape == (N, Cout, H // 2, W // 2)

    print("KERNEL_OK")
</pallas_src>

<mosaic_0001>
module attributes {stable_mosaic.version = 11 : i64} {
  func.func @feature_down_kernel(%arg0: i32, %arg1: memref<2x16x16x4xf32, #tpu.memory_space<vmem>>, %arg2: memref<36x8xf32, #tpu.memory_space<vmem>>, %arg3: memref<1x8xf32, #tpu.memory_space<vmem>>, %arg4: memref<1x8xf32, #tpu.memory_space<vmem>>, %arg5: memref<72x8xf32, #tpu.memory_space<vmem>>, %arg6: memref<1x8xf32, #tpu.memory_space<vmem>>, %arg7: memref<1x8xf32, #tpu.memory_space<vmem>>, %arg8: memref<2x8x8x8xf32, #tpu.memory_space<vmem>>, %arg9: memref<2x10x10x4xf32, #tpu.memory_space<vmem>>, %arg10: memref<2x8x8x36xf32, #tpu.memory_space<vmem>>, %arg11: memref<2x10x10x8xf32, #tpu.memory_space<vmem>>, %arg12: memref<2x8x8x72xf32, #tpu.memory_space<vmem>>) attributes {dimension_semantics = [#tpu.dimension_semantics<arbitrary>], iteration_bounds = array<i64: 1>, scalar_prefetch = 0 : i64, scratch_operands = 4 : i64, tpu.core_type = #tpu.core_type<tc>, window_params = [{pipeline_mode = #tpu.pipeline_mode<synchronous>, transform_indices = @transform_0, window_bounds = array<i64: 2, 16, 16, 4>}, {pipeline_mode = #tpu.pipeline_mode<synchronous>, transform_indices = @transform_1, window_bounds = array<i64: 36, 8>}, {pipeline_mode = #tpu.pipeline_mode<synchronous>, transform_indices = @transform_2, window_bounds = array<i64: 1, 8>}, {pipeline_mode = #tpu.pipeline_mode<synchronous>, transform_indices = @transform_3, window_bounds = array<i64: 1, 8>}, {pipeline_mode = #tpu.pipeline_mode<synchronous>, transform_indices = @transform_4, window_bounds = array<i64: 72, 8>}, {pipeline_mode = #tpu.pipeline_mode<synchronous>, transform_indices = @transform_5, window_bounds = array<i64: 1, 8>}, {pipeline_mode = #tpu.pipeline_mode<synchronous>, transform_indices = @transform_6, window_bounds = array<i64: 1, 8>}, {pipeline_mode = #tpu.pipeline_mode<synchronous>, transform_indices = @transform_7, window_bounds = array<i64: 2, 8, 8, 8>}]} {
    %c0 = arith.constant 0 : index
    %c0_0 = arith.constant 0 : index
    %c0_1 = arith.constant 0 : index
    %c0_2 = arith.constant 0 : index
    %0 = tpu.strided_load %arg1[%c0, %c0_0, %c0_1, %c0_2] {strides = array<i32: 1, 2, 2, 1>} : memref<2x16x16x4xf32, #tpu.memory_space<vmem>>, vector<2x8x8x4xf32>
    %c0_3 = arith.constant 0 : index
    %c0_4 = arith.constant 0 : index
    %c1 = arith.constant 1 : index
    %c0_5 = arith.constant 0 : index
    %1 = tpu.strided_load %arg1[%c0_3, %c0_4, %c1, %c0_5] {strides = array<i32: 1, 2, 2, 1>} : memref<2x16x16x4xf32, #tpu.memory_space<vmem>>, vector<2x8x8x4xf32>
    %c0_6 = arith.constant 0 : index
    %c1_7 = arith.constant 1 : index
    %c0_8 = arith.constant 0 : index
    %c0_9 = arith.constant 0 : index
    %2 = tpu.strided_load %arg1[%c0_6, %c1_7, %c0_8, %c0_9] {strides = array<i32: 1, 2, 2, 1>} : memref<2x16x16x4xf32, #tpu.memory_space<vmem>>, vector<2x8x8x4xf32>
    %c0_10 = arith.constant 0 : index
    %c1_11 = arith.constant 1 : index
    %c1_12 = arith.constant 1 : index
    %c0_13 = arith.constant 0 : index
    %3 = tpu.strided_load %arg1[%c0_10, %c1_11, %c1_12, %c0_13] {strides = array<i32: 1, 2, 2, 1>} : memref<2x16x16x4xf32, #tpu.memory_space<vmem>>, vector<2x8x8x4xf32>
    %4 = arith.maximumf %0, %1 : vector<2x8x8x4xf32>
    %5 = arith.maximumf %2, %3 : vector<2x8x8x4xf32>
    %6 = arith.maximumf %4, %5 : vector<2x8x8x4xf32>
    %c0_14 = arith.constant 0 : index
    %c1_15 = arith.constant 1 : index
    %c1_16 = arith.constant 1 : index
    %c0_17 = arith.constant 0 : index
    %7 = vector.load %arg9[%c0_14, %c1_15, %c1_16, %c0_17] : memref<2x10x10x4xf32, #tpu.memory_space<vmem>>, vector<2x8x8x4xf32>
    tpu.vector_store %arg9[%c0_14, %c1_15, %c1_16, %c0_17], %6 {strides = array<i32>} : memref<2x10x10x4xf32, #tpu.memory_space<vmem>>, vector<2x8x8x4xf32>,
    %cst = arith.constant 0.000000e+00 : f32
    %8 = vector.broadcast %cst : f32 to vector<2x1x10x4xf32>
    %cst_18 = arith.constant 0.000000e+00 : f32
    %9 = vector.broadcast %cst_18 : f32 to vector<2x8x1x4xf32>
    %c0_19 = arith.constant 0 : index
    %c0_20 = arith.constant 0 : index
    %c0_21 = arith.constant 0 : index
    %c0_22 = arith.constant 0 : index
    %10 = vector.load %arg9[%c0_19, %c0_20, %c0_21, %c0_22] : memref<2x10x10x4xf32, #tpu.memory_space<vmem>>, vector<2x1x10x4xf32>
    tpu.vector_store %arg9[%c0_19, %c0_20, %c0_21, %c0_22], %8 {strides = array<i32>} : memref<2x10x10x4xf32, #tpu.memory_space<vmem>>, vector<2x1x10x4xf32>,
    %c0_23 = arith.constant 0 : index
    %c9 = arith.constant 9 : index
    %c0_24 = arith.constant 0 : index
    %c0_25 = arith.constant 0 : index
    %11 = vector.load %arg9[%c0_23, %c9, %c0_24, %c0_25] : memref<2x10x10x4xf32, #tpu.memory_space<vmem>>, vector<2x1x10x4xf32>
    tpu.vector_store %arg9[%c0_23, %c9, %c0_24, %c0_25], %8 {strides = array<i32>} : memref<2x10x10x4xf32, #tpu.memory_space<vmem>>, vector<2x1x10x4xf32>,
    %c0_26 = arith.constant 0 : index
    %c1_27 = arith.constant 1 : index
    %c0_28 = arith.constant 0 : index
    %c0_29 = arith.constant 0 : index
    %12 = vector.load %arg9[%c0_26, %c1_27, %c0_28, %c0_29] : memref<2x10x10x4xf32, #tpu.memory_space<vmem>>, vector<2x8x1x4xf32>
    tpu.vector_store %arg9[%c0_26, %c1_27, %c0_28, %c0_29], %9 {strides = array<i32>} : memref<2x10x10x4xf32, #tpu.memory_space<vmem>>, vector<2x8x1x4xf32>,
    %c0_30 = arith.constant 0 : index
    %c1_31 = arith.constant 1 : index
    %c9_32 = arith.constant 9 : index
    %c0_33 = arith.constant 0 : index
    %13 = vector.load %arg9[%c0_30, %c1_31, %c9_32, %c0_33] : memref<2x10x10x4xf32, #tpu.memory_space<vmem>>, vector<2x8x1x4xf32>
    tpu.vector_store %arg9[%c0_30, %c1_31, %c9_32, %c0_33], %9 {strides = array<i32>} : memref<2x10x10x4xf32, #tpu.memory_space<vmem>>, vector<2x8x1x4xf32>,
    %c0_34 = arith.constant 0 : index
    %c0_35 = arith.constant 0 : index
    %c0_36 = arith.constant 0 : index
    %c0_37 = arith.constant 0 : index
    %14 = vector.load %arg9[%c0_34, %c0_35, %c0_36, %c0_37] : memref<2x10x10x4xf32, #tpu.memory_space<vmem>>, vector<2x8x8x4xf32>
    %c0_38 = arith.constant 0 : index
    %c0_39 = arith.constant 0 : index
    %c0_40 = arith.constant 0 : index
    %c0_41 = arith.constant 0 : index
    %15 = vector.load %arg10[%c0_38, %c0_39, %c0_40, %c0_41] : memref<2x8x8x36xf32, #tpu.memory_space<vmem>>, vector<2x8x8x4xf32>
    tpu.vector_store %arg10[%c0_38, %c0_39, %c0_40, %c0_41], %14 {strides = array<i32>} : memref<2x8x8x36xf32, #tpu.memory_space<vmem>>, vector<2x8x8x4xf32>,
    %c0_42 = arith.constant 0 : index
    %c0_43 = arith.constant 0 : index
    %c1_44 = arith.constant 1 : index
    %c0_45 = arith.constant 0 : index
    %16 = vector.load %arg9[%c0_42, %c0_43, %c1_44, %c0_45] : memref<2x10x10x4xf32, #tpu.memory_space<vmem>>, vector<2x8x8x4xf32>
    %c0_46 = arith.constant 0 : index
    %c0_47 = arith.constant 0 : index
    %c0_48 = arith.constant 0 : index
    %c4 = arith.constant 4 : index
    %17 = vector.load %arg10[%c0_46, %c0_47, %c0_48, %c4] : memref<2x8x8x36xf32, #tpu.memory_space<vmem>>, vector<2x8x8x4xf32>
    tpu.vector_store %arg10[%c0_46, %c0_47, %c0_48, %c4], %16 {strides = array<i32>} : memref<2x8x8x36xf32, #tpu.memory_space<vmem>>, vector<2x8x8x4xf32>,
    %c0_49 = arith.constant 0 : index
    %c0_50 = arith.constant 0 : index
    %c2 = arith.constant 2 : index
    %c0_51 = arith.constant 0 : index
    %18 = vector.load %arg9[%c0_49, %c0_50, %c2, %c0_51] : memref<2x10x10x4xf32, #tpu.memory_space<vmem>>, vector<2x8x8x4xf32>
    %c0_52 = arith.constant 0 : index
    %c0_53 = arith.constant 0 : index
    %c0_54 = arith.constant 0 : index
    %c8 = arith.constant 8 : index
    %19 = vector.load %arg10[%c0_52, %c0_53, %c0_54, %c8] : memref<2x8x8x36xf32, #tpu.memory_space<vmem>>, vector<2x8x8x4xf32>
    tpu.vector_store %arg10[%c0_52, %c0_53, %c0_54, %c8], %18 {strides = array<i32>} : memref<2x8x8x36xf32, #tpu.memory_space<vmem>>, vector<2x8x8x4xf32>,
    %c0_55 = arith.constant 0 : index
    %c1_56 = arith.constant 1 : index
    %c0_57 = arith.constant 0 : index
    %c0_58 = arith.constant 0 : index
    %20 = vector.load %arg9[%c0_55, %c1_56, %c0_57, %c0_58] : memref<2x10x10x4xf32, #tpu.memory_space<vmem>>, vector<2x8x8x4xf32>
    %c0_59 = arith.constant 0 : index
    %c0_60 = arith.constant 0 : index
    %c0_61 = arith.constant 0 : index
    %c12 = arith.constant 12 : index
    %21 = vector.load %arg10[%c0_59, %c0_60, %c0_61, %c12] : memref<2x8x8x36xf32, #tpu.memory_space<vmem>>, vector<2x8x8x4xf32>
    tpu.vector_store %arg10[%c0_59, %c0_60, %c0_61, %c12], %20 {strides = array<i32>} : memref<2x8x8x36xf32, #tpu.memory_space<vmem>>, vector<2x8x8x4xf32>,
    %c0_62 = arith.constant 0 : index
    %c1_63 = arith.constant 1 : index
    %c1_64 = arith.constant 1 : index
    %c0_65 = arith.constant 0 : index
    %22 = vector.load %arg9[%c0_62, %c1_63, %c1_64, %c0_65] : memref<2x10x10x4xf32, #tpu.memory_space<vmem>>, vector<2x8x8x4xf32>
    %c0_66 = arith.constant 0 : index
    %c0_67 = arith.constant 0 : index
    %c0_68 = arith.constant 0 : index
    %c16 = arith.constant 16 : index
    %23 = vector.load %arg10[%c0_66, %c0_67, %c0_68, %c16] : memref<2x8x8x36xf32, #tpu.memory_space<vmem>>, vector<2x8x8x4xf32>
    tpu.vector_store %arg10[%c0_66, %c0_67, %c0_68, %c16], %22 {strides = array<i32>} : memref<2x8x8x36xf32, #tpu.memory_space<vmem>>, vector<2x8x8x4xf32>,
    %c0_69 = arith.constant 0 : index
    %c1_70 = arith.constant 1 : index
    %c2_71 = arith.constant 2 : index
    %c0_72 = arith.constant 0 : index
    %24 = vector.load %arg9[%c0_69, %c1_70, %c2_71, %c0_72] : memref<2x10x10x4xf32, #tpu.memory_space<vmem>>, vector<2x8x8x4xf32>
    %c0_73 = arith.constant 0 : index
    %c0_74 = arith.constant 0 : index
    %c0_75 = arith.constant 0 : index
    %c20 = arith.constant 20 : index
    %25 = vector.load %arg10[%c0_73, %c0_74, %c0_75, %c20] : memref<2x8x8x36xf32, #tpu.memory_space<vmem>>, vector<2x8x8x4xf32>
    tpu.vector_store %arg10[%c0_73, %c0_74, %c0_75, %c20], %24 {strides = array<i32>} : memref<2x8x8x36xf32, #tpu.memory_space<vmem>>, vector<2x8x8x4xf32>,
    %c0_76 = arith.constant 0 : index
    %c2_77 = arith.constant 2 : index
    %c0_78 = arith.constant 0 : index
    %c0_79 = arith.constant 0 : index
    %26 = vector.load %arg9[%c0_76, %c2_77, %c0_78, %c0_79] : memref<2x10x10x4xf32, #tpu.memory_space<vmem>>, vector<2x8x8x4xf32>
    %c0_80 = arith.constant 0 : index
    %c0_81 = arith.constant 0 : index
    %c0_82 = arith.constant 0 : index
    %c24 = arith.constant 24 : index
    %27 = vector.load %arg10[%c0_80, %c0_81, %c0_82, %c24] : memref<2x8x8x36xf32, #tpu.memory_space<vmem>>, vector<2x8x8x4xf32>
    tpu.vector_store %arg10[%c0_80, %c0_81, %c0_82, %c24], %26 {strides = array<i32>} : memref<2x8x8x36xf32, #tpu.memory_space<vmem>>, vector<2x8x8x4xf32>,
    %c0_83 = arith.constant 0 : index
    %c2_84 = arith.constant 2 : index
    %c1_85 = arith.constant 1 : index
    %c0_86 = arith.constant 0 : index
    %28 = vector.load %arg9[%c0_83, %c2_84, %c1_85, %c0_86] : memref<2x10x10x4xf32, #tpu.memory_space<vmem>>, vector<2x8x8x4xf32>
    %c0_87 = arith.constant 0 : index
    %c0_88 = arith.constant 0 : index
    %c0_89 = arith.constant 0 : index
    %c28 = arith.constant 28 : index
    %29 = vector.load %arg10[%c0_87, %c0_88, %c0_89, %c28] : memref<2x8x8x36xf32, #tpu.memory_space<vmem>>, vector<2x8x8x4xf32>
    tpu.vector_store %arg10[%c0_87, %c0_88, %c0_89, %c28], %28 {strides = array<i32>} : memref<2x8x8x36xf32, #tpu.memory_space<vmem>>, vector<2x8x8x4xf32>,
    %c0_90 = arith.constant 0 : index
    %c2_91 = arith.constant 2 : index
    %c2_92 = arith.constant 2 : index
    %c0_93 = arith.constant 0 : index
    %30 = vector.load %arg9[%c0_90, %c2_91, %c2_92, %c0_93] : memref<2x10x10x4xf32, #tpu.memory_space<vmem>>, vector<2x8x8x4xf32>
    %c0_94 = arith.constant 0 : index
    %c0_95 = arith.constant 0 : index
    %c0_96 = arith.constant 0 : index
    %c32 = arith.constant 32 : index
    %31 = vector.load %arg10[%c0_94, %c0_95, %c0_96, %c32] : memref<2x8x8x36xf32, #tpu.memory_space<vmem>>, vector<2x8x8x4xf32>
    tpu.vector_store %arg10[%c0_94, %c0_95, %c0_96, %c32], %30 {strides = array<i32>} : memref<2x8x8x36xf32, #tpu.memory_space<vmem>>, vector<2x8x8x4xf32>,
    %c0_97 = arith.constant 0 : index
    %c0_98 = arith.constant 0 : index
    %c0_99 = arith.constant 0 : index
    %c0_100 = arith.constant 0 : index
    %32 = vector.load %arg10[%c0_97, %c0_98, %c0_99, %c0_100] : memref<2x8x8x36xf32, #tpu.memory_space<vmem>>, vector<2x8x8x36xf32>
    %33 = vector.shape_cast %32 : vector<2x8x8x36xf32> to vector<128x36xf32>
    %c0_101 = arith.constant 0 : index
    %c0_102 = arith.constant 0 : index
    %34 = vector.load %arg2[%c0_101, %c0_102] : memref<36x8xf32, #tpu.memory_space<vmem>>, vector<36x8xf32>
    %cst_103 = arith.constant dense<0.000000e+00> : vector<128x8xf32>
    %35 = tpu.matmul %33, %34, %cst_103 {dimension_numbers = #tpu.dot_dimension_numbers<[1], [0], [0], [1], [0, 0, 1, 1], [], []>} : vector<128x36xf32>, vector<36x8xf32>, vector<128x8xf32> -> vector<128x8xf32>
    %cst_104 = arith.constant dense<0.000000e+00> : vector<8xf32>
    %36 = vector.multi_reduction <add>, %35, %cst_104 [0] : vector<128x8xf32> to vector<8xf32>
    %37 = vector.shape_cast %36 : vector<8xf32> to vector<1x8xf32>
    %38 = arith.mulf %35, %35 : vector<128x8xf32>
    %cst_105 = arith.constant dense<0.000000e+00> : vector<8xf32>
    %39 = vector.multi_reduction <add>, %38, %cst_105 [0] : vector<128x8xf32> to vector<8xf32>
    %40 = vector.shape_cast %39 : vector<8xf32> to vector<1x8xf32>
    %cst_106 = arith.constant 7.812500e-03 : f32
    %41 = vector.broadcast %cst_106 : f32 to vector<1x8xf32>
    %42 = arith.mulf %37, %41 : vector<1x8xf32>
    %cst_107 = arith.constant 7.812500e-03 : f32
    %43 = vector.broadcast %cst_107 : f32 to vector<1x8xf32>
    %44 = arith.mulf %40, %43 : vector<1x8xf32>
    %45 = arith.mulf %42, %42 : vector<1x8xf32>
    %46 = arith.subf %44, %45 : vector<1x8xf32>
    %cst_108 = arith.constant 0.000000e+00 : f32
    %47 = vector.broadcast %cst_108 : f32 to vector<1x8xf32>
    %48 = arith.maximumf %46, %47 : vector<1x8xf32>
    %c0_109 = arith.constant 0 : index
    %c0_110 = arith.constant 0 : index
    %49 = vector.load %arg3[%c0_109, %c0_110] : memref<1x8xf32, #tpu.memory_space<vmem>>, vector<1x8xf32>
    %cst_111 = arith.constant 9.99999974E-6 : f32
    %50 = vector.broadcast %cst_111 : f32 to vector<1x8xf32>
    %51 = arith.addf %48, %50 : vector<1x8xf32>
    %52 = math.rsqrt %51 : vector<1x8xf32>
    %53 = arith.mulf %49, %52 : vector<1x8xf32>
    %c0_112 = arith.constant 0 : index
    %c0_113 = arith.constant 0 : index
    %54 = vector.load %arg4[%c0_112, %c0_113] : memref<1x8xf32, #tpu.memory_space<vmem>>, vector<1x8xf32>
    %55 = arith.mulf %42, %53 : vector<1x8xf32>
    %56 = arith.subf %54, %55 : vector<1x8xf32>
    %57 = vector.broadcast %53 : vector<1x8xf32> to vector<128x8xf32>
    %58 = arith.mulf %35, %57 : vector<128x8xf32>
    %59 = vector.broadcast %56 : vector<1x8xf32> to vector<128x8xf32>
    %60 = arith.addf %58, %59 : vector<128x8xf32>
    %cst_114 = arith.constant 0.000000e+00 : f32
    %61 = vector.broadcast %cst_114 : f32 to vector<128x8xf32>
    %62 = arith.maximumf %60, %61 : vector<128x8xf32>
    %63 = vector.shape_cast %62 : vector<128x8xf32> to vector<2x8x8x8xf32>
    %c0_115 = arith.constant 0 : index
    %c1_116 = arith.constant 1 : index
    %c1_117 = arith.constant 1 : index
    %c0_118 = arith.constant 0 : index
    %64 = vector.load %arg11[%c0_115, %c1_116, %c1_117, %c0_118] : memref<2x10x10x8xf32, #tpu.memory_space<vmem>>, vector<2x8x8x8xf32>
    tpu.vector_store %arg11[%c0_115, %c1_116, %c1_117, %c0_118], %63 {strides = array<i32>} : memref<2x10x10x8xf32, #tpu.memory_space<vmem>>, vector<2x8x8x8xf32>,
    %cst_119 = arith.constant 0.000000e+00 : f32
    %65 = vector.broadcast %cst_119 : f32 to vector<2x1x10x8xf32>
    %cst_120 = arith.constant 0.000000e+00 : f32
    %66 = vector.broadcast %cst_120 : f32 to vector<2x8x1x8xf32>
    %c0_121 = arith.constant 0 : index
    %c0_122 = arith.constant 0 : index
    %c0_123 = arith.constant 0 : index
    %c0_124 = arith.constant 0 : index
    %67 = vector.load %arg11[%c0_121, %c0_122, %c0_123, %c0_124] : memref<2x10x10x8xf32, #tpu.memory_space<vmem>>, vector<2x1x10x8xf32>
    tpu.vector_store %arg11[%c0_121, %c0_122, %c0_123, %c0_124], %65 {strides = array<i32>} : memref<2x10x10x8xf32, #tpu.memory_space<vmem>>, vector<2x1x10x8xf32>,
    %c0_125 = arith.constant 0 : index
    %c9_126 = arith.constant 9 : index
    %c0_127 = arith.constant 0 : index
    %c0_128 = arith.constant 0 : index
    %68 = vector.load %arg11[%c0_125, %c9_126, %c0_127, %c0_128] : memref<2x10x10x8xf32, #tpu.memory_space<vmem>>, vector<2x1x10x8xf32>
    tpu.vector_store %arg11[%c0_125, %c9_126, %c0_127, %c0_128], %65 {strides = array<i32>} : memref<2x10x10x8xf32, #tpu.memory_space<vmem>>, vector<2x1x10x8xf32>,
    %c0_129 = arith.constant 0 : index
    %c1_130 = arith.constant 1 : index
    %c0_131 = arith.constant 0 : index
    %c0_132 = arith.constant 0 : index
    %69 = vector.load %arg11[%c0_129, %c1_130, %c0_131, %c0_132] : memref<2x10x10x8xf32, #tpu.memory_space<vmem>>, vector<2x8x1x8xf32>
    tpu.vector_store %arg11[%c0_129, %c1_130, %c0_131, %c0_132], %66 {strides = array<i32>} : memref<2x10x10x8xf32, #tpu.memory_space<vmem>>, vector<2x8x1x8xf32>,
    %c0_133 = arith.constant 0 : index
    %c1_134 = arith.constant 1 : index
    %c9_135 = arith.constant 9 : index
    %c0_136 = arith.constant 0 : index
    %70 = vector.load %arg11[%c0_133, %c1_134, %c9_135, %c0_136] : memref<2x10x10x8xf32, #tpu.memory_space<vmem>>, vector<2x8x1x8xf32>
    tpu.vector_store %arg11[%c0_133, %c1_134, %c9_135, %c0_136], %66 {strides = array<i32>} : memref<2x10x10x8xf32, #tpu.memory_space<vmem>>, vector<2x8x1x8xf32>,
    %c0_137 = arith.constant 0 : index
    %c0_138 = arith.constant 0 : index
    %c0_139 = arith.constant 0 : index
    %c0_140 = arith.constant 0 : index
    %71 = vector.load %arg11[%c0_137, %c0_138, %c0_139, %c0_140] : memref<2x10x10x8xf32, #tpu.memory_space<vmem>>, vector<2x8x8x8xf32>
    %c0_141 = arith.constant 0 : index
    %c0_142 = arith.constant 0 : index
    %c0_143 = arith.constant 0 : index
    %c0_144 = arith.constant 0 : index
    %72 = vector.load %arg12[%c0_141, %c0_142, %c0_143, %c0_144] : memref<2x8x8x72xf32, #tpu.memory_space<vmem>>, vector<2x8x8x8xf32>
    tpu.vector_store %arg12[%c0_141, %c0_142, %c0_143, %c0_144], %71 {strides = array<i32>} : memref<2x8x8x72xf32, #tpu.memory_space<vmem>>, vector<2x8x8x8xf32>,
    %c0_145 = arith.constant 0 : index
    %c0_146 = arith.constant 0 : index
    %c1_147 = arith.constant 1 : index
    %c0_148 = arith.constant 0 : index
    %73 = vector.load %arg11[%c0_145, %c0_146, %c1_147, %c0_148] : memref<2x10x10x8xf32, #tpu.memory_space<vmem>>, vector<2x8x8x8xf32>
    %c0_149 = arith.constant 0 : index
    %c0_150 = arith.constant 0 : index
    %c0_151 = arith.constant 0 : index
    %c8_152 = arith.constant 8 : index
    %74 = vector.load %arg12[%c0_149, %c0_150, %c0_151, %c8_152] : memref<2x8x8x72xf32, #tpu.memory_space<vmem>>, vector<2x8x8x8xf32>
    tpu.vector_store %arg12[%c0_149, %c0_150, %c0_151, %c8_152], %73 {strides = array<i32>} : memref<2x8x8x72xf32, #tpu.memory_space<vmem>>, vector<2x8x8x8xf32>,
    %c0_153 = arith.constant 0 : index
    %c0_154 = arith.constant 0 : index
    %c2_155 = arith.constant 2 : index
    %c0_156 = arith.constant 0 : index
    %75 = vector.load %arg11[%c0_153, %c0_154, %c2_155, %c0_156] : memref<2x10x10x8xf32, #tpu.memory_space<vmem>>, vector<2x8x8x8xf32>
    %c0_157 = arith.constant 0 : index
    %c0_158 = arith.constant 0 : index
    %c0_159 = arith.constant 0 : index
    %c16_160 = arith.constant 16 : index
    %76 = vector.load %arg12[%c0_157, %c0_158, %c0_159, %c16_160] : memref<2x8x8x72xf32, #tpu.memory_space<vmem>>, vector<2x8x8x8xf32>
    tpu.vector_store %arg12[%c0_157, %c0_158, %c0_159, %c16_160], %75 {strides = array<i32>} : memref<2x8x8x72xf32, #tpu.memory_space<vmem>>, vector<2x8x8x8xf32>,
    %c0_161 = arith.constant 0 : index
    %c1_162 = arith.constant 1 : index
    %c0_163 = arith.constant 0 : index
    %c0_164 = arith.constant 0 : index
    %77 = vector.load %arg11[%c0_161, %c1_162, %c0_163, %c0_164] : memref<2x10x10x8xf32, #tpu.memory_space<vmem>>, vector<2x8x8x8xf32>
    %c0_165 = arith.constant 0 : index
    %c0_166 = arith.constant 0 : index
    %c0_167 = arith.constant 0 : index
    %c24_168 = arith.constant 24 : index
    %78 = vector.load %arg12[%c0_165, %c0_166, %c0_167, %c24_168] : memref<2x8x8x72xf32, #tpu.memory_space<vmem>>, vector<2x8x8x8xf32>
    tpu.vector_store %arg12[%c0_165, %c0_166, %c0_167, %c24_168], %77 {strides = array<i32>} : memref<2x8x8x72xf32, #tpu.memory_space<vmem>>, vector<2x8x8x8xf32>,
    %c0_169 = arith.constant 0 : index
    %c1_170 = arith.constant 1 : index
    %c1_171 = arith.constant 1 : index
    %c0_172 = arith.constant 0 : index
    %79 = vector.load %arg11[%c0_169, %c1_170, %c1_171, %c0_172] : memref<2x10x10x8xf32, #tpu.memory_space<vmem>>, vector<2x8x8x8xf32>
    %c0_173 = arith.constant 0 : index
    %c0_174 = arith.constant 0 : index
    %c0_175 = arith.constant 0 : index
    %c32_176 = arith.constant 32 : index
    %80 = vector.load %arg12[%c0_173, %c0_174, %c0_175, %c32_176] : memref<2x8x8x72xf32, #tpu.memory_space<vmem>>, vector<2x8x8x8xf32>
    tpu.vector_store %arg12[%c0_173, %c0_174, %c0_175, %c32_176], %79 {strides = array<i32>} : memref<2x8x8x72xf32, #tpu.memory_space<vmem>>, vector<2x8x8x8xf32>,
    %c0_177 = arith.constant 0 : index
    %c1_178 = arith.constant 1 : index
    %c2_179 = arith.constant 2 : index
    %c0_180 = arith.constant 0 : index
    %81 = vector.load %arg11[%c0_177, %c1_178, %c2_179, %c0_180] : memref<2x10x10x8xf32, #tpu.memory_space<vmem>>, vector<2x8x8x8xf32>
    %c0_181 = arith.constant 0 : index
    %c0_182 = arith.constant 0 : index
    %c0_183 = arith.constant 0 : index
    %c40 = arith.constant 40 : index
    %82 = vector.load %arg12[%c0_181, %c0_182, %c0_183, %c40] : memref<2x8x8x72xf32, #tpu.memory_space<vmem>>, vector<2x8x8x8xf32>
    tpu.vector_store %arg12[%c0_181, %c0_182, %c0_183, %c40], %81 {strides = array<i32>} : memref<2x8x8x72xf32, #tpu.memory_space<vmem>>, vector<2x8x8x8xf32>,
    %c0_184 = arith.constant 0 : index
    %c2_185 = arith.constant 2 : index
    %c0_186 = arith.constant 0 : index
    %c0_187 = arith.constant 0 : index
    %83 = vector.load %arg11[%c0_184, %c2_185, %c0_186, %c0_187] : memref<2x10x10x8xf32, #tpu.memory_space<vmem>>, vector<2x8x8x8xf32>
    %c0_188 = arith.constant 0 : index
    %c0_189 = arith.constant 0 : index
    %c0_190 = arith.constant 0 : index
    %c48 = arith.constant 48 : index
    %84 = vector.load %arg12[%c0_188, %c0_189, %c0_190, %c48] : memref<2x8x8x72xf32, #tpu.memory_space<vmem>>, vector<2x8x8x8xf32>
    tpu.vector_store %arg12[%c0_188, %c0_189, %c0_190, %c48], %83 {strides = array<i32>} : memref<2x8x8x72xf32, #tpu.memory_space<vmem>>, vector<2x8x8x8xf32>,
    %c0_191 = arith.constant 0 : index
    %c2_192 = arith.constant 2 : index
    %c1_193 = arith.constant 1 : index
    %c0_194 = arith.constant 0 : index
    %85 = vector.load %arg11[%c0_191, %c2_192, %c1_193, %c0_194] : memref<2x10x10x8xf32, #tpu.memory_space<vmem>>, vector<2x8x8x8xf32>
    %c0_195 = arith.constant 0 : index
    %c0_196 = arith.constant 0 : index
    %c0_197 = arith.constant 0 : index
    %c56 = arith.constant 56 : index
    %86 = vector.load %arg12[%c0_195, %c0_196, %c0_197, %c56] : memref<2x8x8x72xf32, #tpu.memory_space<vmem>>, vector<2x8x8x8xf32>
    tpu.vector_store %arg12[%c0_195, %c0_196, %c0_197, %c56], %85 {strides = array<i32>} : memref<2x8x8x72xf32, #tpu.memory_space<vmem>>, vector<2x8x8x8xf32>,
    %c0_198 = arith.constant 0 : index
    %c2_199 = arith.constant 2 : index
    %c2_200 = arith.constant 2 : index
    %c0_201 = arith.constant 0 : index
    %87 = vector.load %arg11[%c0_198, %c2_199, %c2_200, %c0_201] : memref<2x10x10x8xf32, #tpu.memory_space<vmem>>, vector<2x8x8x8xf32>
    %c0_202 = arith.constant 0 : index
    %c0_203 = arith.constant 0 : index
    %c0_204 = arith.constant 0 : index
    %c64 = arith.constant 64 : index
    %88 = vector.load %arg12[%c0_202, %c0_203, %c0_204, %c64] : memref<2x8x8x72xf32, #tpu.memory_space<vmem>>, vector<2x8x8x8xf32>
    tpu.vector_store %arg12[%c0_202, %c0_203, %c0_204, %c64], %87 {strides = array<i32>} : memref<2x8x8x72xf32, #tpu.memory_space<vmem>>, vector<2x8x8x8xf32>,
    %c0_205 = arith.constant 0 : index
    %c0_206 = arith.constant 0 : index
    %c0_207 = arith.constant 0 : index
    %c0_208 = arith.constant 0 : index
    %89 = vector.load %arg12[%c0_205, %c0_206, %c0_207, %c0_208] : memref<2x8x8x72xf32, #tpu.memory_space<vmem>>, vector<2x8x8x72xf32>
    %90 = vector.shape_cast %89 : vector<2x8x8x72xf32> to vector<128x72xf32>
    %c0_209 = arith.constant 0 : index
    %c0_210 = arith.constant 0 : index
    %91 = vector.load %arg5[%c0_209, %c0_210] : memref<72x8xf32, #tpu.memory_space<vmem>>, vector<72x8xf32>
    %cst_211 = arith.constant dense<0.000000e+00> : vector<128x8xf32>
    %92 = tpu.matmul %90, %91, %cst_211 {dimension_numbers = #tpu.dot_dimension_numbers<[1], [0], [0], [1], [0, 0, 1, 1], [], []>} : vector<128x72xf32>, vector<72x8xf32>, vector<128x8xf32> -> vector<128x8xf32>
    %cst_212 = arith.constant dense<0.000000e+00> : vector<8xf32>
    %93 = vector.multi_reduction <add>, %92, %cst_212 [0] : vector<128x8xf32> to vector<8xf32>
    %94 = vector.shape_cast %93 : vector<8xf32> to vector<1x8xf32>
    %95 = arith.mulf %92, %92 : vector<128x8xf32>
    %cst_213 = arith.constant dense<0.000000e+00> : vector<8xf32>
    %96 = vector.multi_reduction <add>, %95, %cst_213 [0] : vector<128x8xf32> to vector<8xf32>
    %97 = vector.shape_cast %96 : vector<8xf32> to vector<1x8xf32>
    %cst_214 = arith.constant 7.812500e-03 : f32
    %98 = vector.broadcast %cst_214 : f32 to vector<1x8xf32>
    %99 = arith.mulf %94, %98 : vector<1x8xf32>
    %cst_215 = arith.constant 7.812500e-03 : f32
    %100 = vector.broadcast %cst_215 : f32 to vector<1x8xf32>
    %101 = arith.mulf %97, %100 : vector<1x8xf32>
    %102 = arith.mulf %99, %99 : vector<1x8xf32>
    %103 = arith.subf %101, %102 : vector<1x8xf32>
    %cst_216 = arith.constant 0.000000e+00 : f32
    %104 = vector.broadcast %cst_216 : f32 to vector<1x8xf32>
    %105 = arith.maximumf %103, %104 : vector<1x8xf32>
    %c0_217 = arith.constant 0 : index
    %c0_218 = arith.constant 0 : index
    %106 = vector.load %arg6[%c0_217, %c0_218] : memref<1x8xf32, #tpu.memory_space<vmem>>, vector<1x8xf32>
    %cst_219 = arith.constant 9.99999974E-6 : f32
    %107 = vector.broadcast %cst_219 : f32 to vector<1x8xf32>
    %108 = arith.addf %105, %107 : vector<1x8xf32>
    %109 = math.rsqrt %108 : vector<1x8xf32>
    %110 = arith.mulf %106, %109 : vector<1x8xf32>
    %c0_220 = arith.constant 0 : index
    %c0_221 = arith.constant 0 : index
    %111 = vector.load %arg7[%c0_220, %c0_221] : memref<1x8xf32, #tpu.memory_space<vmem>>, vector<1x8xf32>
    %112 = arith.mulf %99, %110 : vector<1x8xf32>
    %113 = arith.subf %111, %112 : vector<1x8xf32>
    %114 = vector.broadcast %110 : vector<1x8xf32> to vector<128x8xf32>
    %115 = arith.mulf %92, %114 : vector<128x8xf32>
    %116 = vector.broadcast %113 : vector<1x8xf32> to vector<128x8xf32>
    %117 = arith.addf %115, %116 : vector<128x8xf32>
    %cst_222 = arith.constant 0.000000e+00 : f32
    %118 = vector.broadcast %cst_222 : f32 to vector<128x8xf32>
    %119 = arith.maximumf %117, %118 : vector<128x8xf32>
    %120 = vector.shape_cast %119 : vector<128x8xf32> to vector<2x8x8x8xf32>
    %c0_223 = arith.constant 0 : index
    %c0_224 = arith.constant 0 : index
    %c0_225 = arith.constant 0 : index
    %c0_226 = arith.constant 0 : index
    %121 = vector.load %arg8[%c0_223, %c0_224, %c0_225, %c0_226] : memref<2x8x8x8xf32, #tpu.memory_space<vmem>>, vector<2x8x8x8xf32>
    tpu.vector_store %arg8[%c0_223, %c0_224, %c0_225, %c0_226], %120 {strides = array<i32>} : memref<2x8x8x8xf32, #tpu.memory_space<vmem>>, vector<2x8x8x8xf32>,
    return
  }
  func.func @transform_0(%arg0: i32) -> (i32, i32, i32, i32) {
    %c0_i32 = arith.constant 0 : i32
    %c0_i32_0 = arith.constant 0 : i32
    %c0_i32_1 = arith.constant 0 : i32
    %c0_i32_2 = arith.constant 0 : i32
    %c0_i32_3 = arith.constant 0 : i32
    return %c0_i32, %c0_i32_0, %c0_i32_1, %c0_i32_2 : i32, i32, i32, i32
  }
  func.func @transform_1(%arg0: i32) -> (i32, i32) {
    %c0_i32 = arith.constant 0 : i32
    %c0_i32_0 = arith.constant 0 : i32
    %c0_i32_1 = arith.constant 0 : i32
    return %c0_i32, %c0_i32_0 : i32, i32
  }
  func.func @transform_2(%arg0: i32) -> (i32, i32) {
    %c0_i32 = arith.constant 0 : i32
    %c0_i32_0 = arith.constant 0 : i32
    %c0_i32_1 = arith.constant 0 : i32
    return %c0_i32, %c0_i32_0 : i32, i32
  }
  func.func @transform_3(%arg0: i32) -> (i32, i32) {
    %c0_i32 = arith.constant 0 : i32
    %c0_i32_0 = arith.constant 0 : i32
    %c0_i32_1 = arith.constant 0 : i32
    return %c0_i32, %c0_i32_0 : i32, i32
  }
  func.func @transform_4(%arg0: i32) -> (i32, i32) {
    %c0_i32 = arith.constant 0 : i32
    %c0_i32_0 = arith.constant 0 : i32
    %c0_i32_1 = arith.constant 0 : i32
    return %c0_i32, %c0_i32_0 : i32, i32
  }
  func.func @transform_5(%arg0: i32) -> (i32, i32) {
    %c0_i32 = arith.constant 0 : i32
    %c0_i32_0 = arith.constant 0 : i32
    %c0_i32_1 = arith.constant 0 : i32
    return %c0_i32, %c0_i32_0 : i32, i32
  }
  func.func @transform_6(%arg0: i32) -> (i32, i32) {
    %c0_i32 = arith.constant 0 : i32
    %c0_i32_0 = arith.constant 0 : i32
    %c0_i32_1 = arith.constant 0 : i32
    return %c0_i32, %c0_i32_0 : i32, i32
  }
  func.func @transform_7(%arg0: i32) -> (i32, i32, i32, i32) {
    %c0_i32 = arith.constant 0 : i32
    %c0_i32_0 = arith.constant 0 : i32
    %c0_i32_1 = arith.constant 0 : i32
    %c0_i32_2 = arith.constant 0 : i32
    %c0_i32_3 = arith.constant 0 : i32
    return %c0_i32, %c0_i32_0, %c0_i32_1, %c0_i32_2 : i32, i32, i32, i32
  }
}

</mosaic_0001>

<bundles_post_ra>
// kernel: feature_down.1
= control target key start
LH: loop header
LB: loop body
LE: loop exit
PB: predicated region body
PF: predicated region fallthrough
CT: control target
= control target key end

     0   :  { %vm202_vm0 = vcmask 31744   ;;  %vm220_vm1 = vcmask 25600   ;;  %vm229_vm2 = vcmask 24576   ;;  %v3023_v0 = vmov 0.0   ;;  %s3024_s16 = smov 8   ;;  %s3025_s17 = smov 4   ;;  %s4517_s0 = inlined_call_operand.vmem [shape: f32[2,16,16,4], index: 0, kind: input, shape index: {}]   ;;  %s4518_s1 = inlined_call_operand.vmem [shape: f32[36,8], index: 1, kind: input, shape index: {}]   ;;  %s4519_s2 = inlined_call_operand.vmem [shape: f32[1,8], index: 2, kind: input, shape index: {}]   ;;  %s4520_s3 = inlined_call_operand.vmem [shape: f32[1,8], index: 3, kind: input, shape index: {}]   ;;  %s4521_s4 = inlined_call_operand.vmem [shape: f32[72,8], index: 4, kind: input, shape index: {}]   ;;  %s4522_s5 = inlined_call_operand.vmem [shape: f32[1,8], index: 5, kind: input, shape index: {}]   ;;  %s4523_s6 = inlined_call_operand.vmem [shape: f32[1,8], index: 6, kind: input, shape index: {}]   ;;  %s4524_s7 = inlined_call_operand.vmem [shape: f32[2,8,8,8], index: 7, kind: output, shape index: {}]  }
   0x1   :  { %219 = vst.msk [vmem:[#allocation2] sm:$0xff] %vm202_vm0, %v3023_v0  ;;  %222 = vst.msk [vmem:[#allocation2 + $0xa0] sm:$0xff] %vm202_vm0, %v3023_v0  ;;  %v26_v1 = vld [vmem:[%s4517_s0] ss:$2 sm:$0xff]  ;;  %v2769_v2 = vld [vmem:[%s4517_s0 + $0x1] ss:$2 sm:$0xff] }
   0x2   :  { %221 = vst.msk [vmem:[#allocation2 + $0x8] sm:$0x3] %vm220_vm1, %v3023_v0  ;;  %223 = vst.msk [vmem:[#allocation2 + $0xa8] sm:$0x3] %vm220_vm1, %v3023_v0  ;;  %v2785_v3 = vld [vmem:[%s4517_s0 + $0x10] ss:$2 sm:$0xff]  ;;  %v153_v5 = vmax.f32 %v26_v1, %v2769_v2 }
   0x3   :  { %225 = vst.msk [vmem:[#allocation2 + $0x90] sm:$0xff] %vm202_vm0, %v3023_v0  ;;  %227 = vst.msk [vmem:[#allocation2 + $0x130] sm:$0xff] %vm202_vm0, %v3023_v0  ;;  %v2801_v4 = vld [vmem:[%s4517_s0 + $0x11] ss:$2 sm:$0xff]  ;;  %v2754_v6 = vld [vmem:[%s4517_s0 + $0x20] ss:$2 sm:$0xff] }
   0x4   :  { %226 = vst.msk [vmem:[#allocation2 + $0x98] sm:$0x3] %vm220_vm1, %v3023_v0  ;;  %228 = vst.msk [vmem:[#allocation2 + $0x138] sm:$0x3] %vm220_vm1, %v3023_v0  ;;  %v2770_v7 = vld [vmem:[%s4517_s0 + $0x21] ss:$2 sm:$0xff]  ;;  %v169_v8 = vmax.f32 %v2785_v3, %v2801_v4 }
   0x5   :  { %246 = vst.msk [vmem:[#allocation2 + $0x19] sm:$0x1] %vm229_vm2, %v3023_v0  ;;  %230 = vst.msk [vmem:[#allocation2 + $0x10] sm:$0x1] %vm229_vm2, %v3023_v0  ;;  %v2786_v9 = vld [vmem:[%s4517_s0 + $0x30] ss:$2 sm:$0xff]  ;;  %v154_v11 = vmax.f32 %v2754_v6, %v2770_v7 }
   0x6   :  { %231 = vst.msk [vmem:[#allocation2 + $0x20] sm:$0x1] %vm229_vm2, %v3023_v0  ;;  %232 = vst.msk [vmem:[#allocation2 + $0x30] sm:$0x1] %vm229_vm2, %v3023_v0  ;;  %v2802_v10 = vld [vmem:[%s4517_s0 + $0x31] ss:$2 sm:$0xff]  ;;  %v185_v15 = vmax.f32 %v153_v5, %v169_v8 }
   0x7   :  { %233 = vst.msk [vmem:[#allocation2 + $0x40] sm:$0x1] %vm229_vm2, %v3023_v0  ;;  %234 = vst.msk [vmem:[#allocation2 + $0x50] sm:$0x1] %vm229_vm2, %v3023_v0  ;;  %v170_v12 = vmax.f32 %v2786_v9, %v2802_v10  ;;  %v2755_v13 = vld [vmem:[%s4517_s0 + $0x40] ss:$2 sm:$0xff] }
   0x8   :  { %235 = vst.msk [vmem:[#allocation2 + $0x60] sm:$0x1] %vm229_vm2, %v3023_v0  ;;  %236 = vst.msk [vmem:[#allocation2 + $0x70] sm:$0x1] %vm229_vm2, %v3023_v0  ;;  %v2771_v14 = vld [vmem:[%s4517_s0 + $0x41] ss:$2 sm:$0xff] }
   0x9   :  { %237 = vst.msk [vmem:[#allocation2 + $0x80] sm:$0x1] %vm229_vm2, %v3023_v0  ;;  %238 = vst.msk [vmem:[#allocation2 + $0xb0] sm:$0x1] %vm229_vm2, %v3023_v0  ;;  %v2787_v16 = vld [vmem:[%s4517_s0 + $0x50] ss:$2 sm:$0xff]  ;;  %v155_v18 = vmax.f32 %v2755_v13, %v2771_v14  ;;  %v186_v19 = vmax.f32 %v154_v11, %v170_v12 }
   0xa   :  { %239 = vst.msk [vmem:[#allocation2 + $0xc0] sm:$0x1] %vm229_vm2, %v3023_v0  ;;  %240 = vst.msk [vmem:[#allocation2 + $0xd0] sm:$0x1] %vm229_vm2, %v3023_v0  ;;  %v2803_v17 = vld [vmem:[%s4517_s0 + $0x51] ss:$2 sm:$0xff] }
   0xb   :  { %241 = vst.msk [vmem:[#allocation2 + $0xe0] sm:$0x1] %vm229_vm2, %v3023_v0  ;;  %242 = vst.msk [vmem:[#allocation2 + $0xf0] sm:$0x1] %vm229_vm2, %v3023_v0  ;;  %v171_v20 = vmax.f32 %v2787_v16, %v2803_v17  ;;  %v2756_v21 = vld [vmem:[%s4517_s0 + $0x60] ss:$2 sm:$0xff] }
   0xc   :  { %243 = vst.msk [vmem:[#allocation2 + $0x100] sm:$0x1] %vm229_vm2, %v3023_v0  ;;  %244 = vst.msk [vmem:[#allocation2 + $0x110] sm:$0x1] %vm229_vm2, %v3023_v0  ;;  %v2772_v22 = vld [vmem:[%s4517_s0 + $0x61] ss:$2 sm:$0xff] }
   0xd   :  { %245 = vst.msk [vmem:[#allocation2 + $0x120] sm:$0x1] %vm229_vm2, %v3023_v0  ;;  %247 = vst.msk [vmem:[#allocation2 + $0x29] sm:$0x1] %vm229_vm2, %v3023_v0  ;;  %v2788_v23 = vld [vmem:[%s4517_s0 + $0x70] ss:$2 sm:$0xff]  ;;  %v156_v25 = vmax.f32 %v2756_v21, %v2772_v22  ;;  %v187_v30 = vmax.f32 %v155_v18, %v171_v20 }
   0xe   :  { %248 = vst.msk [vmem:[#allocation2 + $0x39] sm:$0x1] %vm229_vm2, %v3023_v0  ;;  %249 = vst.msk [vmem:[#allocation2 + $0x49] sm:$0x1] %vm229_vm2, %v3023_v0  ;;  %v2804_v24 = vld [vmem:[%s4517_s0 + $0x71] ss:$2 sm:$0xff] }
   0xf   :  { %250 = vst.msk [vmem:[#allocation2 + $0x59] sm:$0x1] %vm229_vm2, %v3023_v0  ;;  %251 = vst.msk [vmem:[#allocation2 + $0x69] sm:$0x1] %vm229_vm2, %v3023_v0  ;;  %v2757_v26 = vld [vmem:[%s4517_s0 + $0x80] ss:$2 sm:$0xff]  ;;  %v172_v31 = vmax.f32 %v2788_v23, %v2804_v24 }
  0x10   :  { %252 = vst.msk [vmem:[#allocation2 + $0x79] sm:$0x1] %vm229_vm2, %v3023_v0  ;;  %253 = vst.msk [vmem:[#allocation2 + $0x89] sm:$0x1] %vm229_vm2, %v3023_v0  ;;  %v2773_v27 = vld [vmem:[%s4517_s0 + $0x81] ss:$2 sm:$0xff] }
  0x11   :  { %254 = vst.msk [vmem:[#allocation2 + $0xb9] sm:$0x1] %vm229_vm2, %v3023_v0  ;;  %255 = vst.msk [vmem:[#allocation2 + $0xc9] sm:$0x1] %vm229_vm2, %v3023_v0  ;;  %v391_v28 = vld [vmem:[#allocation2 + $0x2] sm:$0xff]  ;;  %v157_v33 = vmax.f32 %v2757_v26, %v2773_v27  ;;  %v188_v36 = vmax.f32 %v156_v25, %v172_v31  ;;  %s3026_s8 = smov 12  }
  0x12   :  { %256 = vst.msk [vmem:[#allocation2 + $0xd9] sm:$0x1] %vm229_vm2, %v3023_v0  ;;  %257 = vst.msk [vmem:[#allocation2 + $0xe9] sm:$0x1] %vm229_vm2, %v3023_v0  ;;  %v294_v29 = vld [vmem:[#allocation2 + $0x1] sm:$0xff]  ;;  %423 = vrot.lane.b32.xlu1 %v391_v28, %s3024_s16  ;;  %s3027_s15 = smov 16  }
  0x13   :  { %258 = vst.msk [vmem:[#allocation2 + $0xf9] sm:$0x1] %vm229_vm2, %v3023_v0  ;;  %259 = vst.msk [vmem:[#allocation2 + $0x109] sm:$0x1] %vm229_vm2, %v3023_v0  ;;  %v2789_v32 = vld [vmem:[%s4517_s0 + $0x90] ss:$2 sm:$0xff]  ;;  %326 = vrot.lane.b32.xlu0 %v294_v29, %s3025_s17 }
  0x14   :  { %260 = vst.msk [vmem:[#allocation2 + $0x119] sm:$0x1] %vm229_vm2, %v3023_v0  ;;  %261 = vst.msk [vmem:[#allocation2 + $0x129] sm:$0x1] %vm229_vm2, %v3023_v0  ;;  %v2805_v34 = vld [vmem:[%s4517_s0 + $0x91] ss:$2 sm:$0xff] }
  0x15   :  { %203 = vst.msk [vmem:[#allocation2 + $0x11] sm:$0xff] %vm202_vm0, %v185_v15  ;;  %204 = vst.msk [vmem:[#allocation2 + $0x21] sm:$0xff] %vm202_vm0, %v186_v19  ;;  %v2758_v35 = vld [vmem:[%s4517_s0 + $0xa0] ss:$2 sm:$0xff]  ;;  %v173_v37 = vmax.f32 %v2789_v32, %v2805_v34  ;;  %v2774_v38 = vld [vmem:[%s4517_s0 + $0xa1] ss:$2 sm:$0xff] }
  0x16   :  { %205 = vst.msk [vmem:[#allocation2 + $0x31] sm:$0xff] %vm202_vm0, %v187_v30  ;;  %v2790_v39 = vld [vmem:[%s4517_s0 + $0xb0] ss:$2 sm:$0xff]  ;;  %v2806_v40 = vld [vmem:[%s4517_s0 + $0xb1] ss:$2 sm:$0xff]  ;;  %v158_v41 = vmax.f32 %v2758_v35, %v2774_v38  ;;  %206 = vst.msk [vmem:[#allocation2 + $0x41] sm:$0xff] %vm202_vm0, %v188_v36 }
  0x17   :  { %v174_v42 = vmax.f32 %v2790_v39, %v2806_v40  ;;  %v2759_v43 = vld [vmem:[%s4517_s0 + $0xc0] ss:$2 sm:$0xff]  ;;  %v2775_v44 = vld [vmem:[%s4517_s0 + $0xc1] ss:$2 sm:$0xff]  ;;  %v2791_v45 = vld [vmem:[%s4517_s0 + $0xd0] ss:$2 sm:$0xff]  ;;  %v189_v46 = vmax.f32 %v157_v33, %v173_v37 }
  0x18   :  { %v2807_v47 = vld [vmem:[%s4517_s0 + $0xd1] ss:$2 sm:$0xff]  ;;  %v159_v48 = vmax.f32 %v2759_v43, %v2775_v44  ;;  %v2760_v49 = vld [vmem:[%s4517_s0 + $0xe0] ss:$2 sm:$0xff]  ;;  %v2776_v50 = vld [vmem:[%s4517_s0 + $0xe1] ss:$2 sm:$0xff] }
  0x19   :  { %v190_v51 = vmax.f32 %v158_v41, %v174_v42  ;;  %v175_v52 = vmax.f32 %v2791_v45, %v2807_v47  ;;  %v2792_v53 = vld [vmem:[%s4517_s0 + $0xf0] ss:$2 sm:$0xff]  ;;  %v2808_v54 = vld [vmem:[%s4517_s0 + $0xf1] ss:$2 sm:$0xff]  ;;  %v160_v55 = vmax.f32 %v2760_v49, %v2776_v50  ;;  %v262_v56 = vld [vmem:[#allocation2] sm:$0xff]  ;;  %207 = vst.msk [vmem:[#allocation2 + $0x51] sm:$0xff] %vm202_vm0, %v189_v46 }
  0x1a   :  { %v176_v60 = vmax.f32 %v2792_v53, %v2808_v54  ;;  %278 = vst.msk [vmem:[#allocation3] sm:$0xff] %vm202_vm0, %v262_v56  ;;  %v2761_v1 = vld [vmem:[%s4517_s0 + $0x100] ss:$2 sm:$0xff]  ;;  %v2777_v2 = vld [vmem:[%s4517_s0 + $0x101] ss:$2 sm:$0xff]  ;;  %s3028_s26 = smov 20  }
  0x1b   :  { %208 = vst.msk [vmem:[#allocation2 + $0x61] sm:$0xff] %vm202_vm0, %v190_v51  ;;  %v191_v62 = vmax.f32 %v159_v48, %v175_v52  ;;  %v161_v4 = vmax.f32 %v2761_v1, %v2777_v2  ;;  %v2793_v5 = vld [vmem:[%s4517_s0 + $0x110] ss:$2 sm:$0xff]  ;;  %v2809_v6 = vld [vmem:[%s4517_s0 + $0x111] ss:$2 sm:$0xff]  ;;  %s3029_s13 = smov 24  }
  0x1c   :  { %v392_v57 = vld [vmem:[#allocation2 + $0x12] sm:$0xff]  ;;  %v489_v61 = vld [vmem:[#allocation2 + $0x20] sm:$0xff]  ;;  %v192_v63 = vmax.f32 %v160_v55, %v176_v60  ;;  %v177_v8 = vmax.f32 %v2793_v5, %v2809_v6  ;;  %v1088_v42 = vld [vmem:[%s4518_s1 + $0x8] sm:$0xff]  ;;  %s3030_s23 = smov 28   ;;  %s3031_s14 = smov 32   ;;  %vm1141_vm3 = vcmask 1043456  }
  0x1d   :  { %v295_v58 = vld [vmem:[#allocation2 + $0x11] sm:$0xff]  ;;  %425 = vrot.lane.b32.xlu1 %v392_v57, %s3024_s16  ;;  %280 = vst.msk [vmem:[#allocation3 + $0x10] sm:$0xff] %vm202_vm0, %v489_v61  ;;  %209 = vst.msk [vmem:[#allocation2 + $0x71] sm:$0xff] %vm202_vm0, %v191_v62  ;;  %v3281_v7 = vld [vmem:[#allocation2 + $0x40] sm:$0xff]  ;;  %vm374_vm4 = vcmask 64544   ;;  %vm471_vm5 = vcmask 97344  }
  0x1e   :  { %v488_v59 = vld [vmem:[#allocation2 + $0x10] sm:$0xff]  ;;  %328 = vrot.lane.b32.xlu0 %v295_v58, %s3025_s17  ;;  %210 = vst.msk [vmem:[#allocation2 + $0x81] sm:$0xff] %vm202_vm0, %v192_v63  ;;  %v296_v9 = vld [vmem:[#allocation2 + $0x21] sm:$0xff]  ;;  %282 = vst.msk [vmem:[#allocation3 + $0x20] sm:$0xff] %vm202_vm0, %v3281_v7  ;;  %v193_v13 = vmax.f32 %v161_v4, %v177_v8  ;;  %vm568_vm6 = vcmask 130144   ;;  %vm665_vm7 = vcmask 162944  }
  0x1f   :  { %279 = vst.msk [vmem:[#allocation3 + $0x8] sm:$0xff] %vm202_vm0, %v488_v59  ;;  %v3267_v3 = vld [vmem:[#allocation2 + $0x30] sm:$0xff]  ;;  %v2762_v10 = vld [vmem:[%s4517_s0 + $0x120] ss:$2 sm:$0xff]  ;;  %v2778_v11 = vld [vmem:[%s4517_s0 + $0x121] ss:$2 sm:$0xff] }
  0x20   :  { %281 = vst.msk [vmem:[#allocation3 + $0x18] sm:$0xff] %vm202_vm0, %v3267_v3  ;;  %v3291_v12 = vld [vmem:[#allocation2 + $0x50] sm:$0xff]  ;;  %v162_v16 = vmax.f32 %v2762_v10, %v2778_v11  ;;  %211 = vst.msk [vmem:[#allocation2 + $0xb1] sm:$0xff] %vm202_vm0, %v193_v13  ;;  %v2763_v20 = vld [vmem:[%s4517_s0 + $0x140] ss:$2 sm:$0xff]  ;;  %vm762_vm8 = vcmask 195744  }
  0x21   :  { %522 = vrot.lane.b32.xlu1 %v489_v61, %s3026_s8  ;;  %v2794_v14 = vld [vmem:[%s4517_s0 + $0x130] ss:$2 sm:$0xff]  ;;  %283 = vst.msk [vmem:[#allocation3 + $0x28] sm:$0xff] %vm202_vm0, %v3291_v12  ;;  %v2810_v17 = vld [vmem:[%s4517_s0 + $0x131] ss:$2 sm:$0xff]  ;;  %v393_v26 = vld [vmem:[#allocation2 + $0x22] sm:$0xff] }
  0x22   :  { %520 = vrot.lane.b32.xlu0 %v488_v59, %s3026_s8  ;;  %v3296_v15 = vld [vmem:[#allocation2 + $0x60] sm:$0xff]  ;;  %v178_v19 = vmax.f32 %v2794_v14, %v2810_v17  ;;  %v2795_v23 = vld [vmem:[%s4517_s0 + $0x150] ss:$2 sm:$0xff]  ;;  %v2811_v24 = vld [vmem:[%s4517_s0 + $0x151] ss:$2 sm:$0xff]  ;;  %vm860_vm9 = vcmask 228544  }
  0x23   :  { %284 = vst.msk [vmem:[#allocation3 + $0x30] sm:$0xff] %vm202_vm0, %v3296_v15  ;;  %v2779_v22 = vld [vmem:[%s4517_s0 + $0x141] ss:$2 sm:$0xff]  ;;  %v297_v27 = vld [vmem:[#allocation2 + $0x31] sm:$0xff]  ;;  %v179_v28 = vmax.f32 %v2795_v23, %v2811_v24  ;;  %v2764_v31 = vld [vmem:[%s4517_s0 + $0x160] ss:$2 sm:$0xff] }
  0x24   :  { %v3308_v18 = vld [vmem:[#allocation2 + $0x70] sm:$0xff]  ;;  %v194_v21 = vmax.f32 %v162_v16, %v178_v19  ;;  %v163_v25 = vmax.f32 %v2763_v20, %v2779_v22  ;;  %v2780_v32 = vld [vmem:[%s4517_s0 + $0x161] ss:$2 sm:$0xff]  ;;  %v1090_v45 = vld [vmem:[%s4518_s1 + $0x18] sm:$0xff]  ;;  %vm957_vm10 = vcmask 261344   ;;  %vm1054_vm11 = vcmask 294144  }
  0x25   :  { %330 = vrot.lane.b32.xlu1 %v296_v9, %s3025_s17  ;;  %285 = vst.msk [vmem:[#allocation3 + $0x38] sm:$0xff] %vm202_vm0, %v3308_v18  ;;  %v2796_v33 = vld [vmem:[%s4517_s0 + $0x170] ss:$2 sm:$0xff]  ;;  %v164_v35 = vmax.f32 %v2764_v31, %v2780_v32  ;;  %v2812_v37 = vld [vmem:[%s4517_s0 + $0x171] ss:$2 sm:$0xff]  ;;  %v1087_v41 = vld [vmem:[%s4518_s1] sm:$0xff] }
  0x26   :  { %617 = vrot.lane.b32.xlu0 %v295_v58, %s3027_s15  ;;  %212 = vst.msk [vmem:[#allocation2 + $0xc1] sm:$0xff] %vm202_vm0, %v194_v21  ;;  %v195_v30 = vmax.f32 %v163_v25, %v179_v28  ;;  %v394_v36 = vld [vmem:[#allocation2 + $0x32] sm:$0xff]  ;;  %v180_v38 = vmax.f32 %v2796_v33, %v2812_v37  ;;  %v2972_v43 = vpack.c.bf16 %v1088_v42, %v1087_v41  ;;  %v2765_v48 = vld [vmem:[%s4517_s0 + $0x180] ss:$2 sm:$0xff]  ;;  %v2781_v49 = vld [vmem:[%s4517_s0 + $0x181] ss:$2 sm:$0xff] }
  0x27   :  { %v3327_v29 = vld [vmem:[#allocation2 + $0xb0] sm:$0xff]  ;;  %v1091_v51 = vld [vmem:[%s4518_s1 + $0x20] sm:$0xf]  ;;  %v165_v53 = vmax.f32 %v2765_v48, %v2781_v49  ;;  %vm1092_vm12 = vcmask 293888   ;;  %vm1290_vm13 = vcmask 64512   ;;  %vm1471_vm14 = vcmask 58368  }
  0x28   :  { %287 = vst.msk [vmem:[#allocation3 + $0x48] sm:$0xff] %vm202_vm0, %v3327_v29  ;;  %213 = vst.msk [vmem:[#allocation2 + $0xd1] sm:$0xff] %vm202_vm0, %v195_v30  ;;  %v196_v40 = vmax.f32 %v164_v35, %v180_v38  ;;  %2973 = vmatprep.subr.bf16.mxu0 %v2972_v43  ;;  %v1089_v44 = vld [vmem:[%s4518_s1 + $0x10] sm:$0xff]  ;;  %v588_v54 = vld [vmem:[#allocation2 + $0x41] sm:$0xff]  ;;  %vm1480_vm15 = vcmask 57344   ;;  %vm1722_vm1 = vcmask 195712  }
  0x29   :  { %714 = vrot.lane.b32.xlu1 %v392_v57, %s3028_s26  ;;  %2975 = vmatpush3.bf16.msra.mxu0 %v2972_v43  ;;  %v2976_v46 = vpack.c.bf16 %v1090_v45, %v1089_v44  ;;  %v2797_v50 = vld [vmem:[%s4517_s0 + $0x190] ss:$2 sm:$0xff]  ;;  %v2813_v52 = vld [vmem:[%s4517_s0 + $0x191] ss:$2 sm:$0xff]  ;;  %v395_v57 = vld [vmem:[#allocation2 + $0x42] sm:$0xff]  ;;  %1470 = vst.msk [vmem:[#allocation4] sm:$0xff] %vm1290_vm13, %v3023_v0 }
  0x2a   :  { %619 = vrot.lane.b32.xlu0 %v296_v9, %s3027_s15  ;;  %214 = vst.msk [vmem:[#allocation2 + $0xe1] sm:$0xff] %vm202_vm0, %v196_v40  ;;  %v181_v55 = vmax.f32 %v2797_v50, %v2813_v52  ;;  %v299_v58 = vld [vmem:[#allocation2 + $0x51] sm:$0xff]  ;;  %v2766_v59 = vld [vmem:[%s4517_s0 + $0x1a0] ss:$2 sm:$0xff]  ;;  %v2782_v60 = vld [vmem:[%s4517_s0 + $0x1a1] ss:$2 sm:$0xff] }
  0x2b   :  { %2977 = vmatprep.subr.bf16.mxu0 %v2976_v46  ;;  %v2814_v62 = vld [vmem:[%s4517_s0 + $0x1b1] ss:$2 sm:$0xff]  ;;  %v166_v63 = vmax.f32 %v2766_v59, %v2782_v60  ;;  %v2767_v6 = vld [vmem:[%s4517_s0 + $0x1c0] ss:$2 sm:$0xff]  ;;  %v2799_v8 = vld [vmem:[%s4517_s0 + $0x1d0] ss:$2 sm:$0xff] }
  0x2c   :  { %v197_v56 = vmax.f32 %v165_v53, %v181_v55  ;;  %v396_v1 = vld [vmem:[#allocation2 + $0x52] sm:$0xff]  ;;  %v590_v11 = vld [vmem:[#allocation2 + $0x61] sm:$0xff]  ;;  %1473 = vst.msk [vmem:[#allocation4 + $0xa0] sm:$0xff] %vm1290_vm13, %v3023_v0  ;;  %1476 = vst.msk [vmem:[#allocation4 + $0x90] sm:$0xff] %vm1290_vm13, %v3023_v0  ;;  %vm1819_vm2 = vcmask 261312  }
  0x2d   :  { %427 = vrot.lane.b32.xlu1 %v393_v26, %s3024_s16  ;;  %v3345_v34 = vld [vmem:[#allocation2 + $0xc0] sm:$0xff]  ;;  %2979 = vmatpush3.bf16.msra.mxu0 %v2976_v46  ;;  %v301_v16 = vld [vmem:[#allocation2 + $0x71] sm:$0xff]  ;;  %1478 = vst.msk [vmem:[#allocation4 + $0x130] sm:$0xff] %vm1290_vm13, %v3023_v0 }
  0x2e   :  { %332 = vrot.lane.b32.xlu0 %v297_v27, %s3025_s17  ;;  %288 = vst.msk [vmem:[#allocation3 + $0x50] sm:$0xff] %vm202_vm0, %v3345_v34  ;;  %2904 = vmatprep.subr.msk.mxu0 %vm1141_vm3, %v1091_v51  ;;  %215 = vst.msk [vmem:[#allocation2 + $0xf1] sm:$0xff] %vm202_vm0, %v197_v56  ;;  %v397_v14 = vld [vmem:[#allocation2 + $0x62] sm:$0xff]  ;;  %v2800_v20 = vld [vmem:[%s4517_s0 + $0x1f0] ss:$2 sm:$0xff] }
  0x2f   :  { %v3355_v39 = vld [vmem:[#allocation2 + $0xd0] sm:$0xff]  ;;  %v2768_v17 = vld [vmem:[%s4517_s0 + $0x1e0] ss:$2 sm:$0xff]  ;;  %v2784_v19 = vld [vmem:[%s4517_s0 + $0x1e1] ss:$2 sm:$0xff] }
  0x30   :  { %289 = vst.msk [vmem:[#allocation3 + $0x58] sm:$0xff] %vm202_vm0, %v3355_v39  ;;  %v2816_v21 = vld [vmem:[%s4517_s0 + $0x1f1] ss:$2 sm:$0xff]  ;;  %v168_v22 = vmax.f32 %v2768_v17, %v2784_v19  ;;  %v592_v28 = vld [vmem:[#allocation2 + $0x81] sm:$0xff] }
  0x31   :  { %812 = vrot.lane.b32.xlu1 %v489_v61, %s3029_s13  ;;  %v3378_v47 = vld [vmem:[#allocation2 + $0xe0] sm:$0xff]  ;;  %2905 = vmatpush3.msk.msra.mxu0 %vm1141_vm3, %v1091_v51  ;;  %v2798_v61 = vld [vmem:[%s4517_s0 + $0x1b0] ss:$2 sm:$0xff]  ;;  %v184_v24 = vmax.f32 %v2800_v20, %v2816_v21  ;;  %1472 = vst.msk [vmem:[#allocation4 + $0x8] sm:$0x3] %vm1471_vm14, %v3023_v0  ;;  %vm1916_vm3 = vcmask 326912  }
  0x32   :  { %716 = vrot.lane.b32.xlu0 %v393_v26, %s3028_s26  ;;  %290 = vst.msk [vmem:[#allocation3 + $0x60] sm:$0xff] %vm202_vm0, %v3378_v47  ;;  %v182_v2 = vmax.f32 %v2798_v61, %v2814_v62  ;;  %v398_v23 = vld [vmem:[#allocation2 + $0x72] sm:$0xff]  ;;  %v302_v30 = vld [vmem:[#allocation2 + $0xa1] sm:$0xff] }
  0x33   :  { %v200_v25 = vmax.f32 %v168_v22, %v184_v24  ;;  %v399_v32 = vld [vmem:[#allocation2 + $0xa2] sm:$0xff]  ;;  %v303_v33 = vld [vmem:[#allocation2 + $0xb1] sm:$0xff]  ;;  %1474 = vst.msk [vmem:[#allocation4 + $0xa8] sm:$0x3] %vm1471_vm14, %v3023_v0  ;;  %1477 = vst.msk [vmem:[#allocation4 + $0x98] sm:$0x3] %vm1471_vm14, %v3023_v0 }
  0x34   :  { %v198_v4 = vmax.f32 %v166_v63, %v182_v2  ;;  %v689_v35 = vld [vmem:[#allocation2 + $0x82] sm:$0xff]  ;;  %v400_v38 = vld [vmem:[#allocation2 + $0xb2] sm:$0xff]  ;;  %1479 = vst.msk [vmem:[#allocation4 + $0x138] sm:$0x3] %vm1471_vm14, %v3023_v0 }
  0x35   :  { %524 = vrot.lane.b32.xlu1 %v3267_v3, %s3026_s8  ;;  %218 = vst.msk [vmem:[#allocation2 + $0x121] sm:$0xff] %vm202_vm0, %v200_v25  ;;  %v787_v42 = vld [vmem:[#allocation2 + $0x90] sm:$0xff]  ;;  %v594_v50 = vld [vmem:[#allocation2 + $0xc1] sm:$0xff] }
  0x36   :  { %429 = vrot.lane.b32.xlu0 %v394_v36, %s3024_s16  ;;  %216 = vst.msk [vmem:[#allocation2 + $0x101] sm:$0xff] %vm202_vm0, %v198_v4  ;;  %v981_v53 = vld [vmem:[#allocation2 + $0x92] sm:$0xff]  ;;  %v401_v56 = vld [vmem:[#allocation2 + $0xc2] sm:$0xff] }
  0x37   :  { %v402_v62 = vld [vmem:[#allocation2 + $0xd2] sm:$0xff]  ;;  %1497 = vst.msk [vmem:[#allocation4 + $0x19] sm:$0x1] %vm1480_vm15, %v3023_v0  ;;  %1481 = vst.msk [vmem:[#allocation4 + $0x10] sm:$0x1] %vm1480_vm15, %v3023_v0 }
  0x38   :  { %v307_v17 = vld [vmem:[#allocation2 + $0xf1] sm:$0xff]  ;;  %1482 = vst.msk [vmem:[#allocation4 + $0x20] sm:$0x1] %vm1480_vm15, %v3023_v0  ;;  %1483 = vst.msk [vmem:[#allocation4 + $0x30] sm:$0x1] %vm1480_vm15, %v3023_v0 }
  0x39   :  { %909 = vrot.lane.b32.xlu1 %v296_v9, %s3030_s23  ;;  %v2815_v9 = vld [vmem:[%s4517_s0 + $0x1d1] ss:$2 sm:$0xff]  ;;  %1484 = vst.msk [vmem:[#allocation4 + $0x40] sm:$0x1] %vm1480_vm15, %v3023_v0  ;;  %1485 = vst.msk [vmem:[#allocation4 + $0x50] sm:$0x1] %vm1480_vm15, %v3023_v0 }
  0x3a   :  { %814 = vrot.lane.b32.xlu0 %v3267_v3, %s3029_s13  ;;  %v3421_v3 = vld [vmem:[#allocation2 + $0xf0] sm:$0xff]  ;;  %1486 = vst.msk [vmem:[#allocation4 + $0x60] sm:$0x1] %vm1480_vm15, %v3023_v0  ;;  %1487 = vst.msk [vmem:[#allocation4 + $0x70] sm:$0x1] %vm1480_vm15, %v3023_v0 }
  0x3b   :  { %291 = vst.msk [vmem:[#allocation3 + $0x68] sm:$0xff] %vm202_vm0, %v3421_v3 }
  0x3c   :  { %1488 = vst.msk [vmem:[#allocation4 + $0x80] sm:$0x1] %vm1480_vm15, %v3023_v0  ;;  %1489 = vst.msk [vmem:[#allocation4 + $0xb0] sm:$0x1] %vm1480_vm15, %v3023_v0 }
  0x3d   :  { %621 = vrot.lane.b32.xlu1 %v297_v27, %s3027_s15  ;;  %v3435_v5 = vld [vmem:[#allocation2 + $0x100] sm:$0xff]  ;;  %1490 = vst.msk [vmem:[#allocation4 + $0xc0] sm:$0x1] %vm1480_vm15, %v3023_v0  ;;  %1491 = vst.msk [vmem:[#allocation4 + $0xd0] sm:$0x1] %vm1480_vm15, %v3023_v0 }
  0x3e   :  { %526 = vrot.lane.b32.xlu0 %v3281_v7, %s3026_s8  ;;  %292 = vst.msk [vmem:[#allocation3 + $0x70] sm:$0xff] %vm202_vm0, %v3435_v5 }
  0x3f   :  { %1492 = vst.msk [vmem:[#allocation4 + $0xe0] sm:$0x1] %vm1480_vm15, %v3023_v0  ;;  %1493 = vst.msk [vmem:[#allocation4 + $0xf0] sm:$0x1] %vm1480_vm15, %v3023_v0 }
  0x40   :  { %1494 = vst.msk [vmem:[#allocation4 + $0x100] sm:$0x1] %vm1480_vm15, %v3023_v0  ;;  %1495 = vst.msk [vmem:[#allocation4 + $0x110] sm:$0x1] %vm1480_vm15, %v3023_v0 }
  0x41   :  { %1006 = vrot.lane.b32.xlu1 %v393_v26, %s3031_s14  ;;  %1496 = vst.msk [vmem:[#allocation4 + $0x120] sm:$0x1] %vm1480_vm15, %v3023_v0  ;;  %1498 = vst.msk [vmem:[#allocation4 + $0x29] sm:$0x1] %vm1480_vm15, %v3023_v0 }
  0x42   :  { %911 = vrot.lane.b32.xlu0 %v297_v27, %s3030_s23  ;;  %v270_v27 = vld [vmem:[#allocation2 + $0xa0] sm:$0xff]  ;;  %1499 = vst.msk [vmem:[#allocation4 + $0x39] sm:$0x1] %vm1480_vm15, %v3023_v0  ;;  %1500 = vst.msk [vmem:[#allocation4 + $0x49] sm:$0x1] %vm1480_vm15, %v3023_v0 }
  0x43   :  { %286 = vst.msk [vmem:[#allocation3 + $0x40] sm:$0xff] %vm202_vm0, %v270_v27 }
  0x44   :  { %1501 = vst.msk [vmem:[#allocation4 + $0x59] sm:$0x1] %vm1480_vm15, %v3023_v0  ;;  %1502 = vst.msk [vmem:[#allocation4 + $0x69] sm:$0x1] %vm1480_vm15, %v3023_v0 }
  0x45   :  { %623 = vrot.lane.b32.xlu1 %v588_v54, %s3027_s15  ;;  %1503 = vst.msk [vmem:[#allocation4 + $0x79] sm:$0x1] %vm1480_vm15, %v3023_v0  ;;  %1504 = vst.msk [vmem:[#allocation4 + $0x89] sm:$0x1] %vm1480_vm15, %v3023_v0 }
  0x46   :  { %334 = vrot.lane.b32.xlu0 %v588_v54, %s3025_s17  ;;  %1505 = vst.msk [vmem:[#allocation4 + $0xb9] sm:$0x1] %vm1480_vm15, %v3023_v0  ;;  %1506 = vst.msk [vmem:[#allocation4 + $0xc9] sm:$0x1] %vm1480_vm15, %v3023_v0 }
  0x47   :  { %1507 = vst.msk [vmem:[#allocation4 + $0xd9] sm:$0x1] %vm1480_vm15, %v3023_v0  ;;  %1508 = vst.msk [vmem:[#allocation4 + $0xe9] sm:$0x1] %vm1480_vm15, %v3023_v0 }
  0x48   :  { %1509 = vst.msk [vmem:[#allocation4 + $0xf9] sm:$0x1] %vm1480_vm15, %v3023_v0  ;;  %1510 = vst.msk [vmem:[#allocation4 + $0x109] sm:$0x1] %vm1480_vm15, %v3023_v0 }
  0x49   :  { %1008 = vrot.lane.b32.xlu1 %v394_v36, %s3031_s14  ;;  %1511 = vst.msk [vmem:[#allocation4 + $0x119] sm:$0x1] %vm1480_vm15, %v3023_v0  ;;  %1512 = vst.msk [vmem:[#allocation4 + $0x129] sm:$0x1] %vm1480_vm15, %v3023_v0 }
  0x4a   :  { %718 = vrot.lane.b32.xlu0 %v394_v36, %s3028_s26 }
  0x4d   :  { %431 = vrot.lane.b32.xlu1 %v395_v57, %s3024_s16 }
  0x4e   :  { %336 = vrot.lane.b32.xlu0 %v299_v58, %s3025_s17 }
  0x51   :  { %816 = vrot.lane.b32.xlu1 %v3281_v7, %s3029_s13  ;;  %v2783_v7 = vld [vmem:[%s4517_s0 + $0x1c1] ss:$2 sm:$0xff]  ;;  %s3032_s0 = smov 48  }
  0x52   :  { %720 = vrot.lane.b32.xlu0 %v395_v57, %s3028_s26  ;;  %v167_v10 = vmax.f32 %v2767_v6, %v2783_v7 }
  0x55   :  { %528 = vrot.lane.b32.xlu1 %v3291_v12, %s3026_s8 }
  0x56   :  { %433 = vrot.lane.b32.xlu0 %v396_v1, %s3024_s16 }
  0x59   :  { %913 = vrot.lane.b32.xlu1 %v588_v54, %s3030_s23 }
  0x5a   :  { %818 = vrot.lane.b32.xlu0 %v3291_v12, %s3029_s13  ;;  %v183_v12 = vmax.f32 %v2799_v8, %v2815_v9 }
  0x5c   :  { %v199_v13 = vmax.f32 %v167_v10, %v183_v12 }
  0x5d   :  { %625 = vrot.lane.b32.xlu1 %v299_v58, %s3027_s15 }
  0x5e   :  { %530 = vrot.lane.b32.xlu0 %v3296_v15, %s3026_s8  ;;  %217 = vst.msk [vmem:[#allocation2 + $0x111] sm:$0xff] %vm202_vm0, %v199_v13 }
  0x61   :  { %1010 = vrot.lane.b32.xlu1 %v395_v57, %s3031_s14  ;;  %v305_v57 = vld [vmem:[#allocation2 + $0xd1] sm:$0xff] }
  0x62   :  { %915 = vrot.lane.b32.xlu0 %v299_v58, %s3030_s23 }
  0x65   :  { %627 = vrot.lane.b32.xlu1 %v590_v11, %s3027_s15  ;;  %v3478_v26 = vld [vmem:[#allocation2 + $0x110] sm:$0xff] }
  0x66   :  { %338 = vrot.lane.b32.xlu0 %v590_v11, %s3025_s17  ;;  %293 = vst.msk [vmem:[#allocation3 + $0x78] sm:$0xff] %vm202_vm0, %v3478_v26  ;;  %vm1625_vm0 = vcmask 130112  }
  0x69   :  { %1012 = vrot.lane.b32.xlu1 %v396_v1, %s3031_s14 }
  0x6a   :  { %722 = vrot.lane.b32.xlu0 %v396_v1, %s3028_s26 }
  0x6d   :  { %435 = vrot.lane.b32.xlu1 %v397_v14, %s3024_s16 }
  0x6e   :  { %340 = vrot.lane.b32.xlu0 %v301_v16, %s3025_s17 }
  0x71   :  { %820 = vrot.lane.b32.xlu1 %v3296_v15, %s3029_s13  ;;  %v495_v15 = vld [vmem:[#allocation2 + $0x80] sm:$0xff] }
  0x72   :  { %724 = vrot.lane.b32.xlu0 %v397_v14, %s3028_s26 }
  0x75   :  { %532 = vrot.lane.b32.xlu1 %v3308_v18, %s3026_s8 }
  0x76   :  { %437 = vrot.lane.b32.xlu0 %v398_v23, %s3024_s16 }
  0x79   :  { %917 = vrot.lane.b32.xlu1 %v590_v11, %s3030_s23 }
  0x7a   :  { %822 = vrot.lane.b32.xlu0 %v3308_v18, %s3029_s13 }
  0x7d   :  { %629 = vrot.lane.b32.xlu1 %v301_v16, %s3027_s15 }
  0x7e   :  { %534 = vrot.lane.b32.xlu0 %v495_v15, %s3026_s8 }
  0x81   :  { %1014 = vrot.lane.b32.xlu1 %v397_v14, %s3031_s14 }
  0x82   :  { %919 = vrot.lane.b32.xlu0 %v301_v16, %s3030_s23  ;;  %v403_v16 = vld [vmem:[#allocation2 + $0xe2] sm:$0xff] }
  0x84   :  { %v424_v18 = vpop.permute.xlu1 %423 }
  0x85   :  { %631 = vrot.lane.b32.xlu1 %v592_v28, %s3027_s15  ;;  %v327_v31 = vpop.permute.xlu0 %326 }
  0x86   :  { %342 = vrot.lane.b32.xlu0 %v302_v30, %s3025_s17  ;;  %375 = vst.msk [vmem:[#allocation3] sm:$0xff] %vm374_vm4, %v327_v31 }
  0x87   :  { %472 = vst.msk [vmem:[#allocation3] sm:$0xff] %vm471_vm5, %v424_v18 }
  0x89   :  { %1016 = vrot.lane.b32.xlu1 %v398_v23, %s3031_s14 }
  0x8a   :  { %726 = vrot.lane.b32.xlu0 %v398_v23, %s3028_s26  ;;  %v404_v23 = vld [vmem:[#allocation2 + $0xf2] sm:$0xff] }
  0x8d   :  { %439 = vrot.lane.b32.xlu1 %v399_v32, %s3024_s16 }
  0x8e   :  { %344 = vrot.lane.b32.xlu0 %v303_v33, %s3025_s17 }
  0x8f   :  { %v426_v36 = vpop.permute.xlu1 %425 }
  0x90   :  { %v329_v37 = vpop.permute.xlu0 %328 }
  0x91   :  { %376 = vst.msk [vmem:[#allocation3 + $0x8] sm:$0xff] %vm374_vm4, %v329_v37  ;;  %824 = vrot.lane.b32.xlu1 %v495_v15, %s3029_s13 }
  0x92   :  { %728 = vrot.lane.b32.xlu0 %v689_v35, %s3028_s26  ;;  %473 = vst.msk [vmem:[#allocation3 + $0x8] sm:$0xff] %vm471_vm5, %v426_v36 }
  0x93   :  { %v523_v40 = vpop.permute.xlu1 %522 }
  0x94   :  { %v521_v41 = vpop.permute.xlu0 %520  ;;  %570 = vst.msk [vmem:[#allocation3 + $0x8] sm:$0xff] %vm568_vm6, %v523_v40  ;;  %v405_v40 = vld [vmem:[#allocation2 + $0x102] sm:$0xff] }
  0x95   :  { %569 = vst.msk [vmem:[#allocation3] sm:$0xff] %vm568_vm6, %v521_v41  ;;  %536 = vrot.lane.b32.xlu1 %v3327_v29, %s3026_s8  ;;  %v884_v29 = vld [vmem:[#allocation2 + $0x91] sm:$0xff] }
  0x96   :  { %441 = vrot.lane.b32.xlu0 %v400_v38, %s3024_s16 }
  0x97   :  { %v331_v43 = vpop.permute.xlu1 %330 }
  0x98   :  { %v618_v44 = vpop.permute.xlu0 %617  ;;  %377 = vst.msk [vmem:[#allocation3 + $0x10] sm:$0xff] %vm374_vm4, %v331_v43 }
  0x99   :  { %666 = vst.msk [vmem:[#allocation3] sm:$0xff] %vm665_vm7, %v618_v44  ;;  %921 = vrot.lane.b32.xlu1 %v592_v28, %s3030_s23 }
  0x9a   :  { %826 = vrot.lane.b32.xlu0 %v787_v42, %s3029_s13 }
  0x9b   :  { %v715_v45 = vpop.permute.xlu1 %714 }
  0x9c   :  { %v620_v46 = vpop.permute.xlu0 %619  ;;  %763 = vst.msk [vmem:[#allocation3] sm:$0xff] %vm762_vm8, %v715_v45  ;;  %v406_v45 = vld [vmem:[#allocation2 + $0x112] sm:$0xff] }
  0x9d   :  { %667 = vst.msk [vmem:[#allocation3 + $0x8] sm:$0xff] %vm665_vm7, %v620_v46  ;;  %633 = vrot.lane.b32.xlu1 %v303_v33, %s3027_s15 }
  0x9e   :  { %538 = vrot.lane.b32.xlu0 %v3345_v34, %s3026_s8 }
  0x9f   :  { %v428_v48 = vpop.permute.xlu1 %427 }
  0xa0   :  { %v333_v49 = vpop.permute.xlu0 %332  ;;  %474 = vst.msk [vmem:[#allocation3 + $0x10] sm:$0xff] %vm471_vm5, %v428_v48 }
  0xa1   :  { %378 = vst.msk [vmem:[#allocation3 + $0x18] sm:$0xff] %vm374_vm4, %v333_v49  ;;  %1018 = vrot.lane.b32.xlu1 %v689_v35, %s3031_s14 }
  0xa2   :  { %923 = vrot.lane.b32.xlu0 %v884_v29, %s3030_s23 }
  0xa3   :  { %v813_v51 = vpop.permute.xlu1 %812 }
  0xa4   :  { %v717_v52 = vpop.permute.xlu0 %716  ;;  %861 = vst.msk [vmem:[#allocation3] sm:$0xff] %vm860_vm9, %v813_v51 }
  0xa5   :  { %764 = vst.msk [vmem:[#allocation3 + $0x8] sm:$0xff] %vm762_vm8, %v717_v52  ;;  %635 = vrot.lane.b32.xlu1 %v594_v50, %s3027_s15 }
  0xa6   :  { %346 = vrot.lane.b32.xlu0 %v594_v50, %s3025_s17 }
  0xa7   :  { %v525_v54 = vpop.permute.xlu1 %524 }
  0xa8   :  { %v430_v55 = vpop.permute.xlu0 %429  ;;  %571 = vst.msk [vmem:[#allocation3 + $0x10] sm:$0xff] %vm568_vm6, %v525_v54 }
  0xa9   :  { %475 = vst.msk [vmem:[#allocation3 + $0x18] sm:$0xff] %vm471_vm5, %v430_v55  ;;  %1020 = vrot.lane.b32.xlu1 %v981_v53, %s3031_s14 }
  0xaa   :  { %730 = vrot.lane.b32.xlu0 %v400_v38, %s3028_s26  ;;  %v309_v38 = vld [vmem:[#allocation2 + $0x111] sm:$0xff] }
  0xab   :  { %v910_v58 = vpop.permute.xlu1 %909 }
  0xac   :  { %v815_v59 = vpop.permute.xlu0 %814  ;;  %958 = vst.msk [vmem:[#allocation3] sm:$0xff] %vm957_vm10, %v910_v58  ;;  %v697_v58 = vld [vmem:[#allocation2 + $0x122] sm:$0xff] }
  0xad   :  { %862 = vst.msk [vmem:[#allocation3 + $0x8] sm:$0xff] %vm860_vm9, %v815_v59  ;;  %443 = vrot.lane.b32.xlu1 %v401_v56, %s3024_s16 }
  0xae   :  { %348 = vrot.lane.b32.xlu0 %v305_v57, %s3025_s17 }
  0xaf   :  { %v622_v60 = vpop.permute.xlu1 %621 }
  0xb0   :  { %v527_v61 = vpop.permute.xlu0 %526  ;;  %668 = vst.msk [vmem:[#allocation3 + $0x10] sm:$0xff] %vm665_vm7, %v622_v60 }
  0xb1   :  { %572 = vst.msk [vmem:[#allocation3 + $0x18] sm:$0xff] %vm568_vm6, %v527_v61  ;;  %828 = vrot.lane.b32.xlu1 %v3345_v34, %s3029_s13  ;;  %v795_v61 = vld [vmem:[#allocation2 + $0x130] sm:$0xff] }
  0xb2   :  { %732 = vrot.lane.b32.xlu0 %v401_v56, %s3028_s26 }
  0xb3   :  { %v1007_v63 = vpop.permute.xlu1 %1006 }
  0xb4   :  { %v912_v1 = vpop.permute.xlu0 %911  ;;  %1055 = vst.msk [vmem:[#allocation3] sm:$0xff] %vm1054_vm11, %v1007_v63 }
  0xb5   :  { %959 = vst.msk [vmem:[#allocation3 + $0x8] sm:$0xff] %vm957_vm10, %v912_v1  ;;  %540 = vrot.lane.b32.xlu1 %v3355_v39, %s3026_s8  ;;  %v892_v1 = vld [vmem:[#allocation2 + $0x131] sm:$0xff] }
  0xb6   :  { %445 = vrot.lane.b32.xlu0 %v402_v62, %s3024_s16 }
  0xb7   :  { %v624_v2 = vpop.permute.xlu1 %623 }
  0xb8   :  { %v335_v4 = vpop.permute.xlu0 %334  ;;  %669 = vst.msk [vmem:[#allocation3 + $0x18] sm:$0xff] %vm665_vm7, %v624_v2 }
  0xb9   :  { %379 = vst.msk [vmem:[#allocation3 + $0x20] sm:$0xff] %vm374_vm4, %v335_v4  ;;  %925 = vrot.lane.b32.xlu1 %v594_v50, %s3030_s23 }
  0xba   :  { %830 = vrot.lane.b32.xlu0 %v3355_v39, %s3029_s13  ;;  %v596_v39 = vld [vmem:[#allocation2 + $0xe1] sm:$0xff] }
  0xbb   :  { %v1009_v34 = vpop.permute.xlu1 %1008  ;;  %v1071_v7 = vld [vmem:[#allocation3] sm:$0xff] }
  0xbc   :  { %v719_v6 = vpop.permute.xlu0 %718  ;;  %1056 = vst.msk [vmem:[#allocation3 + $0x8] sm:$0xff] %vm1054_vm11, %v1009_v34  ;;  %2906 = vmatprep.mubr.msk.f32.mxu0 %vm1092_vm12, %v1071_v7  ;;  %v989_v34 = vld [vmem:[#allocation2 + $0x132] sm:$0xff] }
  0xbd   :  { %765 = vst.msk [vmem:[#allocation3 + $0x10] sm:$0xff] %vm762_vm8, %v719_v6  ;;  %637 = vrot.lane.b32.xlu1 %v305_v57, %s3027_s15 }
  0xbe   :  { %542 = vrot.lane.b32.xlu0 %v3378_v47, %s3026_s8 }
  0xbf   :  { %v432_v8 = vpop.permute.xlu1 %431 }
  0xc0   :  { %v337_v9 = vpop.permute.xlu0 %336  ;;  %476 = vst.msk [vmem:[#allocation3 + $0x20] sm:$0xff] %vm471_vm5, %v432_v8 }
  0xc1   :  { %380 = vst.msk [vmem:[#allocation3 + $0x28] sm:$0xff] %vm374_vm4, %v337_v9  ;;  %1022 = vrot.lane.b32.xlu1 %v401_v56, %s3031_s14 }
  0xc2   :  { %927 = vrot.lane.b32.xlu0 %v305_v57, %s3030_s23 }
  0xc3   :  { %v817_v10 = vpop.permute.xlu1 %816  ;;  %v1072_v12 = vld [vmem:[#allocation3 + $0x8] sm:$0xff] }
  0xc4   :  { %v721_v11 = vpop.permute.xlu0 %720  ;;  %863 = vst.msk [vmem:[#allocation3 + $0x10] sm:$0xff] %vm860_vm9, %v817_v10  ;;  %2907 = vmatmul.mubr.msk.f32.vlgmr.msra.gmra.mrb[0].mxu0 %vm1092_vm12, %v1072_v12 }
  0xc5   :  { %766 = vst.msk [vmem:[#allocation3 + $0x18] sm:$0xff] %vm762_vm8, %v721_v11  ;;  %639 = vrot.lane.b32.xlu1 %v596_v39, %s3027_s15 }
  0xc6   :  { %350 = vrot.lane.b32.xlu0 %v596_v39, %s3025_s17 }
  0xc7   :  { %v529_v13 = vpop.permute.xlu1 %528 }
  0xc8   :  { %v434_v14 = vpop.permute.xlu0 %433  ;;  %573 = vst.msk [vmem:[#allocation3 + $0x20] sm:$0xff] %vm568_vm6, %v529_v13 }
  0xc9   :  { %477 = vst.msk [vmem:[#allocation3 + $0x28] sm:$0xff] %vm471_vm5, %v434_v14  ;;  %1024 = vrot.lane.b32.xlu1 %v402_v62, %s3031_s14 }
  0xca   :  { %734 = vrot.lane.b32.xlu0 %v402_v62, %s3028_s26 }
  0xcb   :  { %v914_v19 = vpop.permute.xlu1 %913 }
  0xcc   :  { %v819_v20 = vpop.permute.xlu0 %818  ;;  %960 = vst.msk [vmem:[#allocation3 + $0x10] sm:$0xff] %vm957_vm10, %v914_v19 }
  0xcd   :  { %864 = vst.msk [vmem:[#allocation3 + $0x18] sm:$0xff] %vm860_vm9, %v819_v20  ;;  %447 = vrot.lane.b32.xlu1 %v403_v16, %s3024_s16 }
  0xce   :  { %352 = vrot.lane.b32.xlu0 %v307_v17, %s3025_s17 }
  0xcf   :  { %v626_v21 = vpop.permute.xlu1 %625 }
  0xd0   :  { %v531_v22 = vpop.permute.xlu0 %530  ;;  %670 = vst.msk [vmem:[#allocation3 + $0x20] sm:$0xff] %vm665_vm7, %v626_v21 }
  0xd1   :  { %574 = vst.msk [vmem:[#allocation3 + $0x28] sm:$0xff] %vm568_vm6, %v531_v22  ;;  %832 = vrot.lane.b32.xlu1 %v3378_v47, %s3029_s13 }
  0xd2   :  { %736 = vrot.lane.b32.xlu0 %v403_v16, %s3028_s26 }
  0xd3   :  { %v1011_v24 = vpop.permute.xlu1 %1010 }
  0xd4   :  { %v916_v25 = vpop.permute.xlu0 %915  ;;  %1057 = vst.msk [vmem:[#allocation3 + $0x10] sm:$0xff] %vm1054_vm11, %v1011_v24 }
  0xd5   :  { %961 = vst.msk [vmem:[#allocation3 + $0x18] sm:$0xff] %vm957_vm10, %v916_v25  ;;  %544 = vrot.lane.b32.xlu1 %v3421_v3, %s3026_s8 }
  0xd6   :  { %449 = vrot.lane.b32.xlu0 %v404_v23, %s3024_s16 }
  0xd7   :  { %v628_v27 = vpop.permute.xlu1 %627 }
  0xd8   :  { %v339_v15 = vpop.permute.xlu0 %338  ;;  %671 = vst.msk [vmem:[#allocation3 + $0x28] sm:$0xff] %vm665_vm7, %v628_v27 }
  0xd9   :  { %381 = vst.msk [vmem:[#allocation3 + $0x30] sm:$0xff] %vm374_vm4, %v339_v15  ;;  %929 = vrot.lane.b32.xlu1 %v596_v39, %s3030_s23 }
  0xda   :  { %834 = vrot.lane.b32.xlu0 %v3421_v3, %s3029_s13  ;;  %v598_v3 = vld [vmem:[#allocation2 + $0x101] sm:$0xff] }
  0xdb   :  { %v1013_v47 = vpop.permute.xlu1 %1012  ;;  %v1073_v30 = vld [vmem:[#allocation3 + $0x10] sm:$0xff] }
  0xdc   :  { %v723_v28 = vpop.permute.xlu0 %722  ;;  %1058 = vst.msk [vmem:[#allocation3 + $0x18] sm:$0xff] %vm1054_vm11, %v1013_v47  ;;  %2909 = vmatprep.mubr.msk.f32.mxu0 %vm1092_vm12, %v1073_v30 }
  0xdd   :  { %767 = vst.msk [vmem:[#allocation3 + $0x20] sm:$0xff] %vm762_vm8, %v723_v28  ;;  %641 = vrot.lane.b32.xlu1 %v307_v17, %s3027_s15 }
  0xde   :  { %546 = vrot.lane.b32.xlu0 %v3435_v5, %s3026_s8 }
  0xdf   :  { %v436_v18 = vpop.permute.xlu1 %435 }
  0xe0   :  { %v341_v31 = vpop.permute.xlu0 %340  ;;  %478 = vst.msk [vmem:[#allocation3 + $0x30] sm:$0xff] %vm471_vm5, %v436_v18 }
  0xe1   :  { %382 = vst.msk [vmem:[#allocation3 + $0x38] sm:$0xff] %vm374_vm4, %v341_v31  ;;  %1026 = vrot.lane.b32.xlu1 %v403_v16, %s3031_s14 }
  0xe2   :  { %931 = vrot.lane.b32.xlu0 %v307_v17, %s3030_s23 }
  0xe3   :  { %v821_v32 = vpop.permute.xlu1 %820  ;;  %v1074_v35 = vld [vmem:[#allocation3 + $0x18] sm:$0xff] }
  0xe4   :  { %v725_v33 = vpop.permute.xlu0 %724  ;;  %865 = vst.msk [vmem:[#allocation3 + $0x20] sm:$0xff] %vm860_vm9, %v821_v32  ;;  %2910 = vmatmul.mubr.msk.f32.gmra.mrb[2].mxu0 %vm1092_vm12, %v1074_v35 }
  0xe5   :  { %768 = vst.msk [vmem:[#allocation3 + $0x28] sm:$0xff] %vm762_vm8, %v725_v33  ;;  %643 = vrot.lane.b32.xlu1 %v598_v3, %s3027_s15 }
  0xe6   :  { %354 = vrot.lane.b32.xlu0 %v598_v3, %s3025_s17 }
  0xe7   :  { %v533_v36 = vpop.permute.xlu1 %532 }
  0xe8   :  { %v438_v37 = vpop.permute.xlu0 %437  ;;  %575 = vst.msk [vmem:[#allocation3 + $0x30] sm:$0xff] %vm568_vm6, %v533_v36 }
  0xe9   :  { %479 = vst.msk [vmem:[#allocation3 + $0x38] sm:$0xff] %vm471_vm5, %v438_v37  ;;  %1028 = vrot.lane.b32.xlu1 %v404_v23, %s3031_s14 }
  0xea   :  { %738 = vrot.lane.b32.xlu0 %v404_v23, %s3028_s26 }
  0xeb   :  { %v918_v41 = vpop.permute.xlu1 %917 }
  0xec   :  { %v823_v42 = vpop.permute.xlu0 %822  ;;  %962 = vst.msk [vmem:[#allocation3 + $0x20] sm:$0xff] %vm957_vm10, %v918_v41 }
  0xed   :  { %866 = vst.msk [vmem:[#allocation3 + $0x28] sm:$0xff] %vm860_vm9, %v823_v42  ;;  %451 = vrot.lane.b32.xlu1 %v405_v40, %s3024_s16 }
  0xee   :  { %356 = vrot.lane.b32.xlu0 %v309_v38, %s3025_s17  ;;  %s3033_s17 = smov 64  }
  0xef   :  { %v630_v43 = vpop.permute.xlu1 %629 }
  0xf0   :  { %v535_v44 = vpop.permute.xlu0 %534  ;;  %672 = vst.msk [vmem:[#allocation3 + $0x30] sm:$0xff] %vm665_vm7, %v630_v43 }
  0xf1   :  { %576 = vst.msk [vmem:[#allocation3 + $0x38] sm:$0xff] %vm568_vm6, %v535_v44  ;;  %836 = vrot.lane.b32.xlu1 %v3435_v5, %s3029_s13  ;;  %v503_v5 = vld [vmem:[#allocation2 + $0x120] sm:$0xff] }
  0xf2   :  { %740 = vrot.lane.b32.xlu0 %v405_v40, %s3028_s26 }
  0xf3   :  { %v1015_v46 = vpop.permute.xlu1 %1014 }
  0xf4   :  { %v920_v29 = vpop.permute.xlu0 %919  ;;  %1059 = vst.msk [vmem:[#allocation3 + $0x20] sm:$0xff] %vm1054_vm11, %v1015_v46 }
  0xf5   :  { %963 = vst.msk [vmem:[#allocation3 + $0x28] sm:$0xff] %vm957_vm10, %v920_v29  ;;  %548 = vrot.lane.b32.xlu1 %v3478_v26, %s3026_s8 }
  0xf6   :  { %453 = vrot.lane.b32.xlu0 %v406_v45, %s3024_s16 }
  0xf7   :  { %v632_v48 = vpop.permute.xlu1 %631 }
  0xf8   :  { %v343_v49 = vpop.permute.xlu0 %342  ;;  %673 = vst.msk [vmem:[#allocation3 + $0x38] sm:$0xff] %vm665_vm7, %v632_v48 }
  0xf9   :  { %383 = vst.msk [vmem:[#allocation3 + $0x40] sm:$0xff] %vm374_vm4, %v343_v49  ;;  %933 = vrot.lane.b32.xlu1 %v598_v3, %s3030_s23 }
  0xfa   :  { %838 = vrot.lane.b32.xlu0 %v3478_v26, %s3029_s13  ;;  %v600_v26 = vld [vmem:[#allocation2 + $0x121] sm:$0xff] }
  0xfb   :  { %v1017_v50 = vpop.permute.xlu1 %1016  ;;  %v1075_v52 = vld [vmem:[#allocation3 + $0x20] sm:$0xff] }
  0xfc   :  { %v727_v51 = vpop.permute.xlu0 %726  ;;  %1060 = vst.msk [vmem:[#allocation3 + $0x28] sm:$0xff] %vm1054_vm11, %v1017_v50  ;;  %2912 = vmatprep.mubr.msk.f32.mxu0 %vm1092_vm12, %v1075_v52 }
  0xfd   :  { %769 = vst.msk [vmem:[#allocation3 + $0x30] sm:$0xff] %vm762_vm8, %v727_v51  ;;  %645 = vrot.lane.b32.xlu1 %v309_v38, %s3027_s15 }
  0xfe   :  { %550 = vrot.lane.b32.xlu0 %v503_v5, %s3026_s8  ;;  %s3034_s8 = smov 56  }
  0xff   :  { %v440_v53 = vpop.permute.xlu1 %439 }
 0x100   :  { %v345_v54 = vpop.permute.xlu0 %344  ;;  %480 = vst.msk [vmem:[#allocation3 + $0x40] sm:$0xff] %vm471_vm5, %v440_v53 }
 0x101   :  { %384 = vst.msk [vmem:[#allocation3 + $0x48] sm:$0xff] %vm374_vm4, %v345_v54  ;;  %1030 = vrot.lane.b32.xlu1 %v405_v40, %s3031_s14 }
 0x102   :  { %935 = vrot.lane.b32.xlu0 %v309_v38, %s3030_s23 }
 0x103   :  { %v825_v55 = vpop.permute.xlu1 %824  ;;  %v1076_v57 = vld [vmem:[#allocation3 + $0x28] sm:$0xff] }
 0x104   :  { %v729_v56 = vpop.permute.xlu0 %728  ;;  %867 = vst.msk [vmem:[#allocation3 + $0x30] sm:$0xff] %vm860_vm9, %v825_v55  ;;  %2913 = vmatmul.mubr.msk.f32.gmra.mrb[4].mxu0 %vm1092_vm12, %v1076_v57 }
 0x105   :  { %770 = vst.msk [vmem:[#allocation3 + $0x38] sm:$0xff] %vm762_vm8, %v729_v56  ;;  %742 = vrot.lane.b32.xlu1 %v406_v45, %s3028_s26 }
 0x106   :  { %647 = vrot.lane.b32.xlu0 %v600_v26, %s3027_s15 }
 0x107   :  { %v537_v59 = vpop.permute.xlu1 %536 }
 0x108   :  { %v442_v60 = vpop.permute.xlu0 %441  ;;  %577 = vst.msk [vmem:[#allocation3 + $0x40] sm:$0xff] %vm568_vm6, %v537_v59 }
 0x109   :  { %481 = vst.msk [vmem:[#allocation3 + $0x48] sm:$0xff] %vm471_vm5, %v442_v60  ;;  %744 = vrot.lane.b32.xlu1 %v697_v58, %s3028_s26 }
 0x10a   :  { %1032 = vrot.lane.b32.xlu0 %v406_v45, %s3031_s14 }
 0x10b   :  { %v922_v62 = vpop.permute.xlu1 %921 }
 0x10c   :  { %v827_v63 = vpop.permute.xlu0 %826  ;;  %964 = vst.msk [vmem:[#allocation3 + $0x30] sm:$0xff] %vm957_vm10, %v922_v62 }
 0x10d   :  { %868 = vst.msk [vmem:[#allocation3 + $0x38] sm:$0xff] %vm860_vm9, %v827_v63  ;;  %842 = vrot.lane.b32.xlu1 %v795_v61, %s3029_s13 }
 0x10e   :  { %840 = vrot.lane.b32.xlu0 %v503_v5, %s3029_s13 }
 0x10f   :  { %v634_v2 = vpop.permute.xlu1 %633 }
 0x110   :  { %v539_v4 = vpop.permute.xlu0 %538  ;;  %674 = vst.msk [vmem:[#allocation3 + $0x40] sm:$0xff] %vm665_vm7, %v634_v2 }
 0x111   :  { %578 = vst.msk [vmem:[#allocation3 + $0x48] sm:$0xff] %vm568_vm6, %v539_v4  ;;  %939 = vrot.lane.b32.xlu1 %v892_v1, %s3030_s23 }
 0x112   :  { %937 = vrot.lane.b32.xlu0 %v600_v26, %s3030_s23 }
 0x113   :  { %v1019_v6 = vpop.permute.xlu1 %1018 }
 0x114   :  { %v924_v7 = vpop.permute.xlu0 %923  ;;  %1061 = vst.msk [vmem:[#allocation3 + $0x30] sm:$0xff] %vm1054_vm11, %v1019_v6 }
 0x115   :  { %965 = vst.msk [vmem:[#allocation3 + $0x38] sm:$0xff] %vm957_vm10, %v924_v7  ;;  %1036 = vrot.lane.b32.xlu1 %v989_v34, %s3031_s14 }
 0x116   :  { %1034 = vrot.lane.b32.xlu0 %v697_v58, %s3031_s14 }
 0x117   :  { %v636_v8 = vpop.permute.xlu1 %635 }
 0x118   :  { %v347_v9 = vpop.permute.xlu0 %346  ;;  %675 = vst.msk [vmem:[#allocation3 + $0x48] sm:$0xff] %vm665_vm7, %v636_v8 }
 0x119   :  { %385 = vst.msk [vmem:[#allocation3 + $0x50] sm:$0xff] %vm374_vm4, %v347_v9 }
 0x11b   :  { %v1021_v39 = vpop.permute.xlu1 %1020  ;;  %v1077_v11 = vld [vmem:[#allocation3 + $0x30] sm:$0xff] }
 0x11c   :  { %v731_v10 = vpop.permute.xlu0 %730  ;;  %1062 = vst.msk [vmem:[#allocation3 + $0x38] sm:$0xff] %vm1054_vm11, %v1021_v39  ;;  %2915 = vmatprep.mubr.msk.f32.mxu0 %vm1092_vm12, %v1077_v11 }
 0x11d   :  { %771 = vst.msk [vmem:[#allocation3 + $0x40] sm:$0xff] %vm762_vm8, %v731_v10 }
 0x11f   :  { %v444_v12 = vpop.permute.xlu1 %443 }
 0x120   :  { %v349_v13 = vpop.permute.xlu0 %348  ;;  %482 = vst.msk [vmem:[#allocation3 + $0x50] sm:$0xff] %vm471_vm5, %v444_v12 }
 0x121   :  { %386 = vst.msk [vmem:[#allocation3 + $0x58] sm:$0xff] %vm374_vm4, %v349_v13 }
 0x123   :  { %v829_v14 = vpop.permute.xlu1 %828  ;;  %v1078_v17 = vld [vmem:[#allocation3 + $0x38] sm:$0xff] }
 0x124   :  { %v733_v16 = vpop.permute.xlu0 %732  ;;  %869 = vst.msk [vmem:[#allocation3 + $0x40] sm:$0xff] %vm860_vm9, %v829_v14  ;;  %2916 = vmatmul.mubr.msk.f32.gmra.mrb[6].mxu0 %vm1092_vm12, %v1078_v17 }
 0x125   :  { %772 = vst.msk [vmem:[#allocation3 + $0x48] sm:$0xff] %vm762_vm8, %v733_v16 }
 0x127   :  { %v541_v19 = vpop.permute.xlu1 %540 }
 0x128   :  { %v446_v20 = vpop.permute.xlu0 %445  ;;  %579 = vst.msk [vmem:[#allocation3 + $0x50] sm:$0xff] %vm568_vm6, %v541_v19 }
 0x129   :  { %483 = vst.msk [vmem:[#allocation3 + $0x58] sm:$0xff] %vm471_vm5, %v446_v20 }
 0x12b   :  { %v926_v21 = vpop.permute.xlu1 %925 }
 0x12c   :  { %v831_v22 = vpop.permute.xlu0 %830  ;;  %966 = vst.msk [vmem:[#allocation3 + $0x40] sm:$0xff] %vm957_vm10, %v926_v21 }
 0x12d   :  { %870 = vst.msk [vmem:[#allocation3 + $0x48] sm:$0xff] %vm860_vm9, %v831_v22 }
 0x12f   :  { %v638_v23 = vpop.permute.xlu1 %637 }
 0x130   :  { %v543_v24 = vpop.permute.xlu0 %542  ;;  %676 = vst.msk [vmem:[#allocation3 + $0x50] sm:$0xff] %vm665_vm7, %v638_v23 }
 0x131   :  { %580 = vst.msk [vmem:[#allocation3 + $0x58] sm:$0xff] %vm568_vm6, %v543_v24 }
 0x133   :  { %v1023_v25 = vpop.permute.xlu1 %1022 }
 0x134   :  { %v928_v27 = vpop.permute.xlu0 %927  ;;  %1063 = vst.msk [vmem:[#allocation3 + $0x40] sm:$0xff] %vm1054_vm11, %v1023_v25 }
 0x135   :  { %967 = vst.msk [vmem:[#allocation3 + $0x48] sm:$0xff] %vm957_vm10, %v928_v27 }
 0x137   :  { %v640_v15 = vpop.permute.xlu1 %639 }
 0x138   :  { %v351_v47 = vpop.permute.xlu0 %350  ;;  %677 = vst.msk [vmem:[#allocation3 + $0x58] sm:$0xff] %vm665_vm7, %v640_v15 }
 0x139   :  { %387 = vst.msk [vmem:[#allocation3 + $0x60] sm:$0xff] %vm374_vm4, %v351_v47 }
 0x13b   :  { %v1025_v28 = vpop.permute.xlu1 %1024  ;;  %v1079_v18 = vld [vmem:[#allocation3 + $0x40] sm:$0xff] }
 0x13c   :  { %v735_v30 = vpop.permute.xlu0 %734  ;;  %1064 = vst.msk [vmem:[#allocation3 + $0x48] sm:$0xff] %vm1054_vm11, %v1025_v28  ;;  %2918 = vmatprep.mubr.msk.f32.mxu0 %vm1092_vm12, %v1079_v18 }
 0x13d   :  { %773 = vst.msk [vmem:[#allocation3 + $0x50] sm:$0xff] %vm762_vm8, %v735_v30 }
 0x13f   :  { %v448_v31 = vpop.permute.xlu1 %447 }
 0x140   :  { %v353_v3 = vpop.permute.xlu0 %352  ;;  %484 = vst.msk [vmem:[#allocation3 + $0x60] sm:$0xff] %vm471_vm5, %v448_v31 }
 0x141   :  { %388 = vst.msk [vmem:[#allocation3 + $0x68] sm:$0xff] %vm374_vm4, %v353_v3 }
 0x143   :  { %v833_v32 = vpop.permute.xlu1 %832  ;;  %v1080_v35 = vld [vmem:[#allocation3 + $0x48] sm:$0xff] }
 0x144   :  { %v737_v33 = vpop.permute.xlu0 %736  ;;  %871 = vst.msk [vmem:[#allocation3 + $0x50] sm:$0xff] %vm860_vm9, %v833_v32  ;;  %2919 = vmatmul.mubr.msk.f32.gmra.mrb[8].mxu0 %vm1092_vm12, %v1080_v35 }
 0x145   :  { %774 = vst.msk [vmem:[#allocation3 + $0x58] sm:$0xff] %vm762_vm8, %v737_v33 }
 0x147   :  { %v545_v36 = vpop.permute.xlu1 %544 }
 0x148   :  { %v450_v37 = vpop.permute.xlu0 %449  ;;  %581 = vst.msk [vmem:[#allocation3 + $0x60] sm:$0xff] %vm568_vm6, %v545_v36 }
 0x149   :  { %485 = vst.msk [vmem:[#allocation3 + $0x68] sm:$0xff] %vm471_vm5, %v450_v37 }
 0x14b   :  { %v930_v38 = vpop.permute.xlu1 %929 }
 0x14c   :  { %v835_v40 = vpop.permute.xlu0 %834  ;;  %968 = vst.msk [vmem:[#allocation3 + $0x50] sm:$0xff] %vm957_vm10, %v930_v38 }
 0x14d   :  { %872 = vst.msk [vmem:[#allocation3 + $0x58] sm:$0xff] %vm860_vm9, %v835_v40 }
 0x14f   :  { %v642_v41 = vpop.permute.xlu1 %641 }
 0x150   :  { %v547_v42 = vpop.permute.xlu0 %546  ;;  %678 = vst.msk [vmem:[#allocation3 + $0x60] sm:$0xff] %vm665_vm7, %v642_v41 }
 0x151   :  { %582 = vst.msk [vmem:[#allocation3 + $0x68] sm:$0xff] %vm568_vm6, %v547_v42 }
 0x153   :  { %v1027_v43 = vpop.permute.xlu1 %1026 }
 0x154   :  { %v932_v44 = vpop.permute.xlu0 %931  ;;  %1065 = vst.msk [vmem:[#allocation3 + $0x50] sm:$0xff] %vm1054_vm11, %v1027_v43 }
 0x155   :  { %969 = vst.msk [vmem:[#allocation3 + $0x58] sm:$0xff] %vm957_vm10, %v932_v44 }
 0x157   :  { %v644_v45 = vpop.permute.xlu1 %643 }
 0x158   :  { %v355_v46 = vpop.permute.xlu0 %354  ;;  %679 = vst.msk [vmem:[#allocation3 + $0x68] sm:$0xff] %vm665_vm7, %v644_v45 }
 0x159   :  { %389 = vst.msk [vmem:[#allocation3 + $0x70] sm:$0xff] %vm374_vm4, %v355_v46 }
 0x15b   :  { %v1029_v29 = vpop.permute.xlu1 %1028  ;;  %v1081_v49 = vld [vmem:[#allocation3 + $0x50] sm:$0xff] }
 0x15c   :  { %v739_v48 = vpop.permute.xlu0 %738  ;;  %1066 = vst.msk [vmem:[#allocation3 + $0x58] sm:$0xff] %vm1054_vm11, %v1029_v29  ;;  %2921 = vmatprep.mubr.msk.f32.mxu0 %vm1092_vm12, %v1081_v49 }
 0x15d   :  { %775 = vst.msk [vmem:[#allocation3 + $0x60] sm:$0xff] %vm762_vm8, %v739_v48 }
 0x15f   :  { %v452_v50 = vpop.permute.xlu1 %451 }
 0x160   :  { %v357_v5 = vpop.permute.xlu0 %356  ;;  %486 = vst.msk [vmem:[#allocation3 + $0x70] sm:$0xff] %vm471_vm5, %v452_v50 }
 0x161   :  { %390 = vst.msk [vmem:[#allocation3 + $0x78] sm:$0xff] %vm374_vm4, %v357_v5  ;;  %vm2013_vm4 = vcmask 392512  }
 0x163   :  { %v837_v52 = vpop.permute.xlu1 %836  ;;  %v1082_v53 = vld [vmem:[#allocation3 + $0x58] sm:$0xff] }
 0x164   :  { %v741_v51 = vpop.permute.xlu0 %740  ;;  %873 = vst.msk [vmem:[#allocation3 + $0x60] sm:$0xff] %vm860_vm9, %v837_v52  ;;  %2922 = vmatmul.mubr.msk.f32.gmra.mrb[10].mxu0 %vm1092_vm12, %v1082_v53 }
 0x165   :  { %776 = vst.msk [vmem:[#allocation3 + $0x68] sm:$0xff] %vm762_vm8, %v741_v51 }
 0x167   :  { %v549_v26 = vpop.permute.xlu1 %548 }
 0x168   :  { %v454_v54 = vpop.permute.xlu0 %453  ;;  %583 = vst.msk [vmem:[#allocation3 + $0x70] sm:$0xff] %vm568_vm6, %v549_v26 }
 0x169   :  { %487 = vst.msk [vmem:[#allocation3 + $0x78] sm:$0xff] %vm471_vm5, %v454_v54  ;;  %vm2111_vm5 = vcmask 458112  }
 0x16b   :  { %v934_v56 = vpop.permute.xlu1 %933 }
 0x16c   :  { %v839_v55 = vpop.permute.xlu0 %838  ;;  %970 = vst.msk [vmem:[#allocation3 + $0x60] sm:$0xff] %vm957_vm10, %v934_v56 }
 0x16d   :  { %874 = vst.msk [vmem:[#allocation3 + $0x68] sm:$0xff] %vm860_vm9, %v839_v55 }
 0x16f   :  { %v646_v58 = vpop.permute.xlu1 %645 }
 0x170   :  { %v551_v57 = vpop.permute.xlu0 %550  ;;  %680 = vst.msk [vmem:[#allocation3 + $0x70] sm:$0xff] %vm665_vm7, %v646_v58  ;;  %v1545_v58 = vld [vmem:[#allocation4 + $0x1] sm:$0xff] }
 0x171   :  { %584 = vst.msk [vmem:[#allocation3 + $0x78] sm:$0xff] %vm568_vm6, %v551_v57  ;;  %1577 = vrot.lane.b32.xlu0 %v1545_v58, %s3024_s16  ;;  %vm2208_vm6 = vcmask 523712  }
 0x173   :  { %v1031_v60 = vpop.permute.xlu1 %1030 }
 0x174   :  { %v936_v59 = vpop.permute.xlu0 %935  ;;  %1067 = vst.msk [vmem:[#allocation3 + $0x60] sm:$0xff] %vm1054_vm11, %v1031_v60  ;;  %v1553_v60 = vld [vmem:[#allocation4 + $0xa1] sm:$0xff] }
 0x175   :  { %971 = vst.msk [vmem:[#allocation3 + $0x68] sm:$0xff] %vm957_vm10, %v936_v59  ;;  %v1642_v59 = vld [vmem:[#allocation4 + $0x2] sm:$0xff] }
 0x176   :  { %1674 = vrot.lane.b32.xlu0 %v1642_v59, %s3027_s15 }
 0x177   :  { %v743_v62 = vpop.permute.xlu1 %742 }
 0x178   :  { %v648_v61 = vpop.permute.xlu0 %647  ;;  %777 = vst.msk [vmem:[#allocation3 + $0x70] sm:$0xff] %vm762_vm8, %v743_v62  ;;  %v1650_v62 = vld [vmem:[#allocation4 + $0xa2] sm:$0xff] }
 0x179   :  { %681 = vst.msk [vmem:[#allocation3 + $0x78] sm:$0xff] %vm665_vm7, %v648_v61  ;;  %1690 = vrot.lane.b32.xlu1 %v1650_v62, %s3027_s15  ;;  %vm2305_vm7 = vcmask 589312  }
 0x17a   :  { %1593 = vrot.lane.b32.xlu0 %v1553_v60, %s3024_s16 }
 0x17b   :  { %v745_v1 = vpop.permute.xlu1 %744  ;;  %v1083_v2 = vld [vmem:[#allocation3 + $0x60] sm:$0xff] }
 0x17c   :  { %v1033_v63 = vpop.permute.xlu0 %1032  ;;  %778 = vst.msk [vmem:[#allocation3 + $0x78] sm:$0xff] %vm762_vm8, %v745_v1  ;;  %2924 = vmatprep.mubr.msk.f32.mxu0 %vm1092_vm12, %v1083_v2  ;;  %vm2347_vm8 = vcmask 588800  }
 0x17d   :  { %1068 = vst.msk [vmem:[#allocation3 + $0x68] sm:$0xff] %vm1054_vm11, %v1033_v63  ;;  %v2038_v63 = vld [vmem:[#allocation4 + $0x90] sm:$0xff] }
 0x17e   :  { %2077 = vrot.lane.b32.xlu0 %v2038_v63, %s3032_s0 }
 0x17f   :  { %v843_v34 = vpop.permute.xlu1 %842 }
 0x180   :  { %v841_v4 = vpop.permute.xlu0 %840  ;;  %876 = vst.msk [vmem:[#allocation3 + $0x78] sm:$0xff] %vm860_vm9, %v843_v34 }
 0x181   :  { %875 = vst.msk [vmem:[#allocation3 + $0x70] sm:$0xff] %vm860_vm9, %v841_v4 }
 0x183   :  { %v940_v7 = vpop.permute.xlu1 %939 }
 0x184   :  { %v938_v6 = vpop.permute.xlu0 %937  ;;  %v1084_v8 = vld [vmem:[#allocation3 + $0x68] sm:$0xff]  ;;  %973 = vst.msk [vmem:[#allocation3 + $0x78] sm:$0xff] %vm957_vm10, %v940_v7  ;;  %v2135_v7 = vld [vmem:[#allocation4 + $0x91] sm:$0xff] }
 0x185   :  { %972 = vst.msk [vmem:[#allocation3 + $0x70] sm:$0xff] %vm957_vm10, %v938_v6  ;;  %2925 = vmatmul.mubr.msk.f32.gmra.mrb[12].mxu0 %vm1092_vm12, %v1084_v8  ;;  %v2232_v6 = vld [vmem:[#allocation4 + $0x92] sm:$0xff]  ;;  %2174 = vrot.lane.b32.xlu0 %v2135_v7, %s3034_s8 }
 0x186   :  { %2271 = vrot.lane.b32.xlu1 %v2232_v6, %s3033_s17 }
 0x187   :  { %v1037_v39 = vpop.permute.xlu1 %1036 }
 0x188   :  { %v1035_v9 = vpop.permute.xlu0 %1034  ;;  %1070 = vst.msk [vmem:[#allocation3 + $0x78] sm:$0xff] %vm1054_vm11, %v1037_v39 }
 0x189   :  { %1069 = vst.msk [vmem:[#allocation3 + $0x70] sm:$0xff] %vm1054_vm11, %v1035_v9 }
 0x18f   :  { %v1086_v11 = vld [vmem:[#allocation3 + $0x78] sm:$0xff] }
 0x190   :  { %v1085_v10 = vld [vmem:[#allocation3 + $0x70] sm:$0xff] }
 0x191   :  { %2927 = vmatprep.mubr.msk.f32.mxu0 %vm1092_vm12, %v1085_v10 }
 0x192   :  { %2928 = vmatmul.mubr.msk.f32.gmra.mrb[14].mxu0 %vm1092_vm12, %v1086_v11 }
 0x197   :  { %v3730_v12 = vpop.f32.mrb[0].mxu0 }
 0x198   :  { %v1292_v13 = vsel %vm1290_vm13, %v3730_v12, 0.0  ;;  %v1329_v14 = vmul.f32 %v3730_v12, %v3730_v12  ;;  %v3736_v16 = vpop.f32.mrb[1].mxu0 }
 0x199   :  { %v1291_v17 = vsel %vm1290_vm13, %v3736_v16, 0.0  ;;  %v1328_v19 = vmul.f32 %v3736_v16, %v3736_v16 }
 0x19a   :  { %v1345_v20 = vsel %vm1290_vm13, %v1329_v14, 0.0  ;;  %v1293_v21 = vadd.f32 %v1292_v13, %v1291_v17 }
 0x19b   :  { %v1344_v22 = vsel %vm1290_vm13, %v1328_v19, 0.0 }
 0x19c   :  { %v1346_v23 = vadd.f32 %v1345_v20, %v1344_v22 }
 0x1b7   :  { %v3744_v24 = vpop.f32.mrb[2].mxu0 }
 0x1b8   :  { %v3746_v25 = vpop.f32.mrb[3].mxu0  ;;  %v1331_v27 = vmul.f32 %v3744_v24, %v3744_v24  ;;  %v1296_v30 = vsel %vm1290_vm13, %v3744_v24, 0.0 }
 0x1b9   :  { %v1294_v15 = vsel %vm1290_vm13, %v3746_v25, 0.0  ;;  %v1330_v47 = vmul.f32 %v3746_v25, %v3746_v25 }
 0x1ba   :  { %v1295_v28 = vadd.f32 %v1294_v15, %v1293_v21  ;;  %v1349_v32 = vsel %vm1290_vm13, %v1331_v27, 0.0 }
 0x1bb   :  { %v1347_v18 = vsel %vm1290_vm13, %v1330_v47, 0.0 }
 0x1bc   :  { %v1348_v31 = vadd.f32 %v1347_v18, %v1346_v23  ;;  %v1297_v3 = vadd.f32 %v1296_v30, %v1295_v28 }
 0x1be   :  { %v1350_v33 = vadd.f32 %v1349_v32, %v1348_v31 }
 0x1d7   :  { %v3758_v35 = vpop.f32.mrb[4].mxu0 }
 0x1d8   :  { %v3760_v36 = vpop.f32.mrb[5].mxu0  ;;  %v1333_v37 = vmul.f32 %v3758_v35, %v3758_v35  ;;  %v1300_v42 = vsel %vm1290_vm13, %v3758_v35, 0.0 }
 0x1d9   :  { %v1298_v38 = vsel %vm1290_vm13, %v3760_v36, 0.0  ;;  %v1332_v40 = vmul.f32 %v3760_v36, %v3760_v36 }
 0x1da   :  { %v1299_v41 = vadd.f32 %v1298_v38, %v1297_v3  ;;  %v1353_v46 = vsel %vm1290_vm13, %v1333_v37, 0.0 }
 0x1db   :  { %v1351_v43 = vsel %vm1290_vm13, %v1332_v40, 0.0 }
 0x1dc   :  { %v1352_v44 = vadd.f32 %v1351_v43, %v1350_v33  ;;  %v1301_v45 = vadd.f32 %v1300_v42, %v1299_v41 }
 0x1de   :  { %v1354_v29 = vadd.f32 %v1353_v46, %v1352_v44 }
 0x1f7   :  { %v3772_v48 = vpop.f32.mrb[6].mxu0 }
 0x1f8   :  { %v3774_v49 = vpop.f32.mrb[7].mxu0  ;;  %v1335_v5 = vmul.f32 %v3772_v48, %v3772_v48  ;;  %v1304_v53 = vsel %vm1290_vm13, %v3772_v48, 0.0 }
 0x1f9   :  { %v1302_v50 = vsel %vm1290_vm13, %v3774_v49, 0.0  ;;  %v1334_v51 = vmul.f32 %v3774_v49, %v3774_v49 }
 0x1fa   :  { %v1303_v52 = vadd.f32 %v1302_v50, %v1301_v45  ;;  %v1357_v56 = vsel %vm1290_vm13, %v1335_v5, 0.0 }
 0x1fb   :  { %v1355_v54 = vsel %vm1290_vm13, %v1334_v51, 0.0 }
 0x1fc   :  { %v1356_v26 = vadd.f32 %v1355_v54, %v1354_v29  ;;  %v1305_v55 = vadd.f32 %v1304_v53, %v1303_v52 }
 0x1fe   :  { %v1358_v57 = vadd.f32 %v1357_v56, %v1356_v26 }
 0x217   :  { %v3793_v61 = vpop.f32.mrb[8].mxu0 }
 0x218   :  { %v3795_v1 = vpop.f32.mrb[9].mxu0  ;;  %v1337_v2 = vmul.f32 %v3793_v61, %v3793_v61  ;;  %v1308_v9 = vsel %vm1290_vm13, %v3793_v61, 0.0 }
 0x219   :  { %v1306_v4 = vsel %vm1290_vm13, %v3795_v1, 0.0  ;;  %v1336_v34 = vmul.f32 %v3795_v1, %v3795_v1 }
 0x21a   :  { %v1307_v8 = vadd.f32 %v1306_v4, %v1305_v55  ;;  %v1361_v0 = vsel %vm1290_vm13, %v1337_v2, 0.0 }
 0x21b   :  { %v1359_v39 = vsel %vm1290_vm13, %v1336_v34, 0.0 }
 0x21c   :  { %v1360_v10 = vadd.f32 %v1359_v39, %v1358_v57  ;;  %v1309_v11 = vadd.f32 %v1308_v9, %v1307_v8 }
 0x21e   :  { %v1362_v13 = vadd.f32 %v1361_v0, %v1360_v10  ;;  %v1513_v0 = vld [vmem:[#allocation4] sm:$0xff] }
 0x21f   :  { %1529 = vst.msk [vmem:[#allocation5] sm:$0xff] %vm1290_vm13, %v1513_v0 }
 0x237   :  { %v3875_v14 = vpop.f32.mrb[10].mxu0 }
 0x238   :  { %v3877_v17 = vpop.f32.mrb[11].mxu0  ;;  %v1339_v19 = vmul.f32 %v3875_v14, %v3875_v14  ;;  %v1312_v23 = vsel %vm1290_vm13, %v3875_v14, 0.0 }
 0x239   :  { %v1310_v20 = vsel %vm1290_vm13, %v3877_v17, 0.0  ;;  %v1338_v21 = vmul.f32 %v3877_v17, %v3877_v17 }
 0x23a   :  { %v1311_v22 = vadd.f32 %v1310_v20, %v1309_v11  ;;  %v1365_v28 = vsel %vm1290_vm13, %v1339_v19, 0.0  ;;  %v1578_v19 = vpop.permute.xlu0 %1577 }
 0x23b   :  { %v1363_v27 = vsel %vm1290_vm13, %v1338_v21, 0.0  ;;  %1626 = vst.msk [vmem:[#allocation5] sm:$0xff] %vm1625_vm0, %v1578_v19  ;;  %v1394_v21 = vlaneseq }
 0x23c   :  { %v1364_v15 = vadd.f32 %v1363_v27, %v1362_v13  ;;  %v1313_v47 = vadd.f32 %v1312_v23, %v1311_v22  ;;  %v1521_v23 = vld [vmem:[#allocation4 + $0xa0] sm:$0xff] }
 0x23d   :  { %1537 = vst.msk [vmem:[#allocation5 + $0x40] sm:$0xff] %vm1290_vm13, %v1521_v23  ;;  %v1395_v27 = vshrl.u32 %v1394_v21, 7 }
 0x23e   :  { %v1366_v30 = vadd.f32 %v1365_v28, %v1364_v15  ;;  %v1675_v22 = vpop.permute.xlu0 %1674 }
 0x23f   :  { %1723 = vst.msk [vmem:[#allocation5] sm:$0xff] %vm1722_vm1, %v1675_v22  ;;  %v3920_v28 = vsub.s32 0, %v1395_v27 }
 0x242   :  { %v1594_v15 = vpop.permute.xlu0 %1593 }
 0x243   :  { %1634 = vst.msk [vmem:[#allocation5 + $0x40] sm:$0xff] %vm1625_vm0, %v1594_v15 }
 0x258   :  { %v3889_v18 = vpop.f32.mrb[12].mxu0 }
 0x259   :  { %v3891_v31 = vpop.f32.mrb[13].mxu0  ;;  %v1341_v3 = vmul.f32 %v3889_v18, %v3889_v18  ;;  %v1316_v38 = vsel %vm1290_vm13, %v3889_v18, 0.0 }
 0x25a   :  { %v1314_v32 = vsel %vm1290_vm13, %v3891_v31, 0.0  ;;  %v1340_v33 = vmul.f32 %v3891_v31, %v3891_v31 }
 0x25b   :  { %v1315_v37 = vadd.f32 %v1314_v32, %v1313_v47  ;;  %v1369_v43 = vsel %vm1290_vm13, %v1341_v3, 0.0  ;;  %v1386_v47 = vld [vmem:[%s4519_s2] sm:$0x1]  ;;  %s3035_s2 = smov 40  }
 0x25c   :  { %v1367_v40 = vsel %vm1290_vm13, %v1340_v33, 0.0  ;;  %v1390_v33 = vld [vmem:[%s4520_s3] sm:$0x1] }
 0x25d   :  { %v1368_v41 = vadd.f32 %v1367_v40, %v1366_v30  ;;  %v1317_v42 = vadd.f32 %v1316_v38, %v1315_v37  ;;  %v1691_v30 = vpop.permute.xlu1 %1690 }
 0x25e   :  { %1731 = vst.msk [vmem:[#allocation5 + $0x40] sm:$0xff] %vm1722_vm1, %v1691_v30 }
 0x25f   :  { %v1370_v44 = vadd.f32 %v1369_v43, %v1368_v41 }
 0x265   :  { %v3903_v45 = vpop.f32.mrb[14].mxu0 }
 0x266   :  { %v1281_v46 = vpop.f32.mrb[15].mxu0  ;;  %v1343_v29 = vmul.f32 %v3903_v45, %v3903_v45  ;;  %v1320_v52 = vsel %vm1290_vm13, %v3903_v45, 0.0 }
 0x267   :  { %v1318_v5 = vsel %vm1290_vm13, %v1281_v46, 0.0  ;;  %v1342_v50 = vmul.f32 %v1281_v46, %v1281_v46 }
 0x268   :  { %v1319_v51 = vadd.f32 %v1318_v5, %v1317_v42  ;;  %v1373_v55 = vsel %vm1290_vm13, %v1343_v29, 0.0 }
 0x269   :  { %v1371_v53 = vsel %vm1290_vm13, %v1342_v50, 0.0 }
 0x26a   :  { %v1321_v54 = vadd.f32 %v1320_v52, %v1319_v51  ;;  %v1372_v26 = vadd.f32 %v1371_v53, %v1370_v44 }
 0x26c   :  { %v1322_v56 = vrot.slane %v1321_v54, 4  ;;  %v1374_v57 = vadd.f32 %v1373_v55, %v1372_v26 }
 0x26e   :  { %v1323_v58 = vadd.f32 %v1322_v56, %v1321_v54  ;;  %v1375_v59 = vrot.slane %v1374_v57, 4 }
 0x270   :  { %v1324_v60 = vrot.slane %v1323_v58, 2  ;;  %v1376_v62 = vadd.f32 %v1375_v59, %v1374_v57 }
 0x272   :  { %v1325_v63 = vadd.f32 %v1324_v60, %v1323_v58  ;;  %v1377_v2 = vrot.slane %v1376_v62, 2 }
 0x274   :  { %v1326_v4 = vrot.slane %v1325_v63, 1  ;;  %v1378_v34 = vadd.f32 %v1377_v2, %v1376_v62 }
 0x276   :  { %v1327_v6 = vadd.f32 %v1326_v4, %v1325_v63  ;;  %v1379_v7 = vrot.slane %v1378_v34, 1 }
 0x278   :  { %v1380_v8 = vadd.f32 %v1379_v7, %v1378_v34  ;;  %v1381_v9 = vmul.f32 0.0078125, %v1327_v6 }
 0x27a   :  { %v1382_v39 = vmul.f32 0.0078125, %v1380_v8  ;;  %v1383_v10 = vmul.f32 %v1381_v9, %v1381_v9 }
 0x27c   :  { %v1384_v11 = vsub.f32 %v1382_v39, %v1383_v10 }
 0x27e   :  { %v1385_v13 = vmax.f32 %v1384_v11, 0.0 }
 0x280   :  { %v1387_v20 = vadd.f32 1e-05, %v1385_v13 }
 0x282   :  { %3019 = vrsqrt.f32 %v1387_v20 }
 0x28c   :  { %v3020_v3 = vpop.eup %3019 }
 0x28d   :  { %v1389_v32 = vmul.f32 %v3020_v3, %v1386_v47 }
 0x28f   :  { %v1391_v37 = vmul.f32 %v1389_v32, %v1381_v9  ;;  %v1397_v38 = vrot.slane %v1389_v32, %v3920_v28 }
 0x291   :  { %v1392_v40 = vsub.f32 %v1390_v33, %v1391_v37  ;;  %v1413_v41 = vmul.f32 %v1397_v38, %v1281_v46  ;;  %v1399_v42 = vmul.f32 %v1397_v38, %v3736_v16  ;;  %v1401_v43 = vmul.f32 %v1397_v38, %v3746_v25 }
 0x292   :  { %v1400_v44 = vmul.f32 %v3730_v12, %v1397_v38  ;;  %v1402_v29 = vmul.f32 %v3744_v24, %v1397_v38  ;;  %v1403_v5 = vmul.f32 %v1397_v38, %v3760_v36  ;;  %v1404_v50 = vmul.f32 %v3758_v35, %v1397_v38 }
 0x293   :  { %v1419_v51 = vrot.slane %v1392_v40, %v3920_v28  ;;  %v1405_v52 = vmul.f32 %v1397_v38, %v3774_v49  ;;  %v1406_v53 = vmul.f32 %v3772_v48, %v1397_v38  ;;  %v1407_v46 = vmul.f32 %v1397_v38, %v3795_v1 }
 0x294   :  { %v1408_v16 = vmul.f32 %v3793_v61, %v1397_v38  ;;  %v1409_v25 = vmul.f32 %v1397_v38, %v3877_v17  ;;  %v1410_v12 = vmul.f32 %v3875_v14, %v1397_v38  ;;  %v1411_v24 = vmul.f32 %v1397_v38, %v3891_v31 }
 0x295   :  { %v1435_v54 = vadd.f32 %v1419_v51, %v1413_v41  ;;  %v1421_v36 = vadd.f32 %v1419_v51, %v1399_v42  ;;  %v1423_v26 = vadd.f32 %v1419_v51, %v1401_v43  ;;  %v1422_v35 = vadd.f32 %v1419_v51, %v1400_v44 }
 0x296   :  { %v1424_v55 = vadd.f32 %v1419_v51, %v1402_v29  ;;  %v1425_v56 = vadd.f32 %v1419_v51, %v1403_v5  ;;  %v1426_v57 = vadd.f32 %v1419_v51, %v1404_v50  ;;  %v1427_v49 = vadd.f32 %v1419_v51, %v1405_v52  ;;  %v2338_v52 = vld [vmem:[%s4521_s4] sm:$0xff] }
 0x297   :  { %v1451_v58 = vmax.f32 %v1435_v54, 0.0  ;;  %v1437_v48 = vmax.f32 %v1421_v36, 0.0  ;;  %v1439_v59 = vmax.f32 %v1423_v26, 0.0  ;;  %v1438_v1 = vmax.f32 %v1422_v35, 0.0  ;;  %v2342_v54 = vld [vmem:[%s4521_s4 + $0x20] sm:$0xff]  ;;  %v2343_v36 = vld [vmem:[%s4521_s4 + $0x28] sm:$0xff] }
 0x298   :  { %v1440_v60 = vmax.f32 %v1424_v55, 0.0  ;;  %v1441_v61 = vmax.f32 %v1425_v56, 0.0  ;;  %v1442_v62 = vmax.f32 %v1426_v57, 0.0  ;;  %v1443_v17 = vmax.f32 %v1427_v49, 0.0  ;;  %v2344_v35 = vld [vmem:[%s4521_s4 + $0x30] sm:$0xff]  ;;  %v2345_v55 = vld [vmem:[%s4521_s4 + $0x38] sm:$0xff] }
 0x299   :  { %1468 = vst.msk [vmem:[#allocation4 + $0x111] sm:$0xff] %vm1290_vm13, %v1451_v58  ;;  %1454 = vst.msk [vmem:[#allocation4 + $0x11] sm:$0xff] %vm1290_vm13, %v1437_v48  ;;  %v1428_v14 = vadd.f32 %v1419_v51, %v1406_v53  ;;  %v1429_v31 = vadd.f32 %v1419_v51, %v1407_v46  ;;  %v1430_v63 = vadd.f32 %v1419_v51, %v1408_v16  ;;  %v2339_v53 = vld [vmem:[%s4521_s4 + $0x8] sm:$0xff]  ;;  %v2346_v49 = vld [vmem:[%s4521_s4 + $0x40] sm:$0xff] }
 0x29a   :  { %1456 = vst.msk [vmem:[#allocation4 + $0x31] sm:$0xff] %vm1290_vm13, %v1439_v59  ;;  %1455 = vst.msk [vmem:[#allocation4 + $0x21] sm:$0xff] %vm1290_vm13, %v1438_v1  ;;  %v1431_v2 = vadd.f32 %v1419_v51, %v1409_v25  ;;  %v1432_v4 = vadd.f32 %v1419_v51, %v1410_v12  ;;  %v1433_v34 = vadd.f32 %v1419_v51, %v1411_v24  ;;  %v2340_v25 = vld [vmem:[%s4521_s4 + $0x10] sm:$0xff]  ;;  %v2341_v12 = vld [vmem:[%s4521_s4 + $0x18] sm:$0xff] }
 0x29b   :  { %1457 = vst.msk [vmem:[#allocation4 + $0x41] sm:$0xff] %vm1290_vm13, %v1440_v60  ;;  %1458 = vst.msk [vmem:[#allocation4 + $0x51] sm:$0xff] %vm1290_vm13, %v1441_v61  ;;  %v1412_v6 = vmul.f32 %v3889_v18, %v1397_v38  ;;  %v1444_v7 = vmax.f32 %v1428_v14, 0.0  ;;  %v1445_v8 = vmax.f32 %v1429_v31, 0.0  ;;  %v1446_v9 = vmax.f32 %v1430_v63, 0.0  ;;  %v4098_v61 = vpop.permute.xlu0 %2077  ;;  %v4104_v31 = vpop.permute.xlu1 %2271 }
 0x29c   :  { %1459 = vst.msk [vmem:[#allocation4 + $0x61] sm:$0xff] %vm1290_vm13, %v1442_v62  ;;  %1460 = vst.msk [vmem:[#allocation4 + $0x71] sm:$0xff] %vm1290_vm13, %v1443_v17  ;;  %v1414_v39 = vmul.f32 %v3903_v45, %v1397_v38  ;;  %v1447_v10 = vmax.f32 %v1431_v2, 0.0  ;;  %v1448_v11 = vmax.f32 %v1432_v4, 0.0  ;;  %v1449_v0 = vmax.f32 %v1433_v34, 0.0 }
 0x29d   :  { %v1434_v13 = vadd.f32 %v1419_v51, %v1412_v6  ;;  %1461 = vst.msk [vmem:[#allocation4 + $0x81] sm:$0xff] %vm1290_vm13, %v1444_v7  ;;  %1462 = vst.msk [vmem:[#allocation4 + $0xb1] sm:$0xff] %vm1290_vm13, %v1445_v8  ;;  %v2980_v46 = vpack.c.bf16 %v2339_v53, %v2338_v52  ;;  %v2984_v24 = vpack.c.bf16 %v2341_v12, %v2340_v25 }
 0x29e   :  { %1463 = vst.msk [vmem:[#allocation4 + $0xc1] sm:$0xff] %vm1290_vm13, %v1446_v9  ;;  %v1436_v19 = vadd.f32 %v1419_v51, %v1414_v39  ;;  %1464 = vst.msk [vmem:[#allocation4 + $0xd1] sm:$0xff] %vm1290_vm13, %v1447_v10  ;;  %v2988_v26 = vpack.c.bf16 %v2343_v36, %v2342_v54  ;;  %v2992_v56 = vpack.c.bf16 %v2345_v55, %v2344_v35 }
 0x29f   :  { %1465 = vst.msk [vmem:[#allocation4 + $0xe1] sm:$0xff] %vm1290_vm13, %v1448_v11  ;;  %1466 = vst.msk [vmem:[#allocation4 + $0xf1] sm:$0xff] %vm1290_vm13, %v1449_v0  ;;  %v1450_v18 = vmax.f32 %v1434_v13, 0.0  ;;  %2981 = vmatprep.subr.bf16.mxu0 %v2980_v46  ;;  %2996 = vmatprep.subr.bf16.mxu1 %v2980_v46  ;;  %v4106_v63 = vpop.permute.xlu0 %2174 }
 0x2a0   :  { %v1452_v20 = vmax.f32 %v1436_v19, 0.0  ;;  %v1643_v45 = vld [vmem:[#allocation4 + $0x12] sm:$0xff]  ;;  %2983 = vmatpush3.bf16.msra.mxu0 %v2980_v46  ;;  %3001 = vmatpush3.bf16.msra.mxu1 %v2980_v46 }
 0x2a1   :  { %v1546_v21 = vld [vmem:[#allocation4 + $0x11] sm:$0xff]  ;;  %1467 = vst.msk [vmem:[#allocation4 + $0x101] sm:$0xff] %vm1290_vm13, %v1450_v18  ;;  %1676 = vrot.lane.b32.xlu0 %v1643_v45, %s3027_s15  ;;  %v1740_v22 = vld [vmem:[#allocation4 + $0x20] sm:$0xff]  ;;  %2985 = vmatprep.subr.bf16.mxu0 %v2984_v24 }
 0x2a2   :  { %1579 = vrot.lane.b32.xlu1 %v1546_v21, %s3024_s16  ;;  %v1739_v23 = vld [vmem:[#allocation4 + $0x10] sm:$0xff]  ;;  %1469 = vst.msk [vmem:[#allocation4 + $0x121] sm:$0xff] %vm1290_vm13, %v1452_v20  ;;  %v1742_v27 = vld [vmem:[#allocation4 + $0x40] sm:$0xff]  ;;  %1531 = vst.msk [vmem:[#allocation5 + $0x10] sm:$0xff] %vm1290_vm13, %v1740_v22  ;;  %2997 = vmatprep.subr.bf16.mxu1 %v2984_v24 }
 0x2a3   :  { %1530 = vst.msk [vmem:[#allocation5 + $0x8] sm:$0xff] %vm1290_vm13, %v1739_v23  ;;  %v1741_v15 = vld [vmem:[#allocation4 + $0x30] sm:$0xff]  ;;  %1533 = vst.msk [vmem:[#allocation5 + $0x20] sm:$0xff] %vm1290_vm13, %v1742_v27  ;;  %v1547_v30 = vld [vmem:[#allocation4 + $0x21] sm:$0xff] }
 0x2a4   :  { %v3964_v47 = vld [vmem:[#allocation4 + $0x31] sm:$0xff]  ;;  %1532 = vst.msk [vmem:[#allocation5 + $0x18] sm:$0xff] %vm1290_vm13, %v1741_v15  ;;  %v3972_v32 = vld [vmem:[#allocation4 + $0x60] sm:$0xff]  ;;  %2987 = vmatpush3.bf16.msra.mxu0 %v2984_v24  ;;  %3002 = vmatpush3.bf16.msra.mxu1 %v2984_v24 }
 0x2a5   :  { %v3966_v3 = vld [vmem:[#allocation4 + $0x50] sm:$0xff]  ;;  %1583 = vrot.lane.b32.xlu0 %v3964_v47, %s3024_s16  ;;  %1535 = vst.msk [vmem:[#allocation5 + $0x30] sm:$0xff] %vm1290_vm13, %v3972_v32  ;;  %v3982_v37 = vld [vmem:[#allocation4 + $0xc0] sm:$0xff]  ;;  %2989 = vmatprep.subr.bf16.mxu0 %v2988_v26 }
 0x2a6   :  { %1581 = vrot.lane.b32.xlu1 %v1547_v30, %s3024_s16  ;;  %1534 = vst.msk [vmem:[#allocation5 + $0x28] sm:$0xff] %vm1290_vm13, %v3966_v3  ;;  %v3976_v33 = vld [vmem:[#allocation4 + $0x70] sm:$0xff]  ;;  %1539 = vst.msk [vmem:[#allocation5 + $0x50] sm:$0xff] %vm1290_vm13, %v3982_v37  ;;  %v3994_v41 = vld [vmem:[#allocation4 + $0xe0] sm:$0xff]  ;;  %2998 = vmatprep.subr.bf16.mxu1 %v2988_v26 }
 0x2a7   :  { %1536 = vst.msk [vmem:[#allocation5 + $0x38] sm:$0xff] %vm1290_vm13, %v3976_v33  ;;  %v3986_v38 = vld [vmem:[#allocation4 + $0xb0] sm:$0xff]  ;;  %v1644_v43 = vld [vmem:[#allocation4 + $0x22] sm:$0xff]  ;;  %1541 = vst.msk [vmem:[#allocation5 + $0x60] sm:$0xff] %vm1290_vm13, %v3994_v41 }
 0x2a8   :  { %v3990_v40 = vld [vmem:[#allocation4 + $0xd0] sm:$0xff]  ;;  %1538 = vst.msk [vmem:[#allocation5 + $0x48] sm:$0xff] %vm1290_vm13, %v3986_v38  ;;  %v4007_v29 = vld [vmem:[#allocation4 + $0x100] sm:$0xff]  ;;  %2991 = vmatpush3.bf16.msra.mxu0 %v2988_v26  ;;  %3003 = vmatpush3.bf16.msra.mxu1 %v2988_v26 }
 0x2a9   :  { %1773 = vrot.lane.b32.xlu0 %v1740_v22, %s3029_s13  ;;  %1540 = vst.msk [vmem:[#allocation5 + $0x58] sm:$0xff] %vm1290_vm13, %v3990_v40  ;;  %v3998_v42 = vld [vmem:[#allocation4 + $0x32] sm:$0xff]  ;;  %1543 = vst.msk [vmem:[#allocation5 + $0x70] sm:$0xff] %vm1290_vm13, %v4007_v29  ;;  %v1549_v50 = vld [vmem:[#allocation4 + $0x41] sm:$0xff]  ;;  %2993 = vmatprep.subr.bf16.mxu0 %v2992_v56 }
 0x2aa   :  { %1771 = vrot.lane.b32.xlu1 %v1739_v23, %s3029_s13  ;;  %v4000_v44 = vld [vmem:[#allocation4 + $0xf0] sm:$0xff]  ;;  %v1646_v51 = vld [vmem:[#allocation4 + $0x42] sm:$0xff]  ;;  %2999 = vmatprep.subr.bf16.mxu1 %v2992_v56 }
 0x2ab   :  { %1542 = vst.msk [vmem:[#allocation5 + $0x68] sm:$0xff] %vm1290_vm13, %v4000_v44  ;;  %v4011_v5 = vld [vmem:[#allocation4 + $0x110] sm:$0xff]  ;;  %v1551_v58 = vld [vmem:[#allocation4 + $0x61] sm:$0xff] }
 0x2ac   :  { %1544 = vst.msk [vmem:[#allocation5 + $0x78] sm:$0xff] %vm1290_vm13, %v4011_v5  ;;  %v1550_v16 = vld [vmem:[#allocation4 + $0x51] sm:$0xff]  ;;  %2995 = vmatpush3.bf16.msra.mxu0 %v2992_v56  ;;  %3004 = vmatpush3.bf16.msra.mxu1 %v2992_v56  ;;  %v1938_v59 = vld [vmem:[#allocation4 + $0x62] sm:$0xff] }
 0x2ad   :  { %1680 = vrot.lane.b32.xlu0 %v3998_v42, %s3027_s15  ;;  %v1647_v57 = vld [vmem:[#allocation4 + $0x52] sm:$0xff]  ;;  %2946 = vmatprep.subr.mxu0 %v2346_v49  ;;  %v1746_v60 = vld [vmem:[#allocation4 + $0x80] sm:$0xff] }
 0x2ae   :  { %1678 = vrot.lane.b32.xlu1 %v1644_v43, %s3027_s15  ;;  %3000 = vmatprep.subr.mxu1 %v2346_v49  ;;  %v1552_v48 = vld [vmem:[#allocation4 + $0x71] sm:$0xff]  ;;  %v1940_v17 = vld [vmem:[#allocation4 + $0x82] sm:$0xff] }
 0x2af   :  { %v1649_v1 = vld [vmem:[#allocation4 + $0x72] sm:$0xff]  ;;  %v1843_v14 = vld [vmem:[#allocation4 + $0x81] sm:$0xff] }
 0x2b0   :  { %2947 = vmatpush3.msra.mxu0 %v2346_v49  ;;  %3005 = vmatpush3.msra.mxu1 %v2346_v49  ;;  %v1554_v62 = vld [vmem:[#allocation4 + $0xb1] sm:$0xff]  ;;  %v1555_v8 = vld [vmem:[#allocation4 + $0xc1] sm:$0xff] }
 0x2b1   :  { %1870 = vrot.lane.b32.xlu0 %v1547_v30, %s3031_s14  ;;  %v1651_v2 = vld [vmem:[#allocation4 + $0xb2] sm:$0xff]  ;;  %v1942_v18 = vld [vmem:[#allocation4 + $0xc2] sm:$0xff] }
 0x2b2   :  { %1868 = vrot.lane.b32.xlu1 %v1546_v21, %s3031_s14  ;;  %v1556_v0 = vld [vmem:[#allocation4 + $0xd1] sm:$0xff]  ;;  %v1944_v52 = vld [vmem:[#allocation4 + $0xe2] sm:$0xff] }
 0x2b3   :  { %v1653_v21 = vld [vmem:[#allocation4 + $0xd2] sm:$0xff] }
 0x2b5   :  { %1777 = vrot.lane.b32.xlu0 %v1742_v27, %s3029_s13 }
 0x2b6   :  { %1775 = vrot.lane.b32.xlu1 %v1741_v15, %s3029_s13 }
 0x2b9   :  { %1967 = vrot.lane.b32.xlu0 %v1644_v43, %s3035_s2 }
 0x2ba   :  { %1965 = vrot.lane.b32.xlu1 %v1643_v45, %s3035_s2 }
 0x2bd   :  { %1585 = vrot.lane.b32.xlu0 %v1549_v50, %s3024_s16 }
 0x2be   :  { %1872 = vrot.lane.b32.xlu1 %v3964_v47, %s3031_s14 }
 0x2c1   :  { %1969 = vrot.lane.b32.xlu0 %v3998_v42, %s3035_s2 }
 0x2c2   :  { %2063 = vrot.lane.b32.xlu1 %v1740_v22, %s3032_s0 }
 0x2c5   :  { %2160 = vrot.lane.b32.xlu0 %v1547_v30, %s3034_s8 }
 0x2c6   :  { %1874 = vrot.lane.b32.xlu1 %v1549_v50, %s3031_s14 }
 0x2c9   :  { %1682 = vrot.lane.b32.xlu0 %v1646_v51, %s3027_s15 }
 0x2ca   :  { %2065 = vrot.lane.b32.xlu1 %v1741_v15, %s3032_s0 }
 0x2cd   :  { %2067 = vrot.lane.b32.xlu0 %v1742_v27, %s3032_s0 }
 0x2ce   :  { %1587 = vrot.lane.b32.xlu1 %v1550_v16, %s3024_s16 }
 0x2d1   :  { %2257 = vrot.lane.b32.xlu0 %v1644_v43, %s3033_s17  ;;  %v1558_v43 = vld [vmem:[#allocation4 + $0xf1] sm:$0xff] }
 0x2d2   :  { %1971 = vrot.lane.b32.xlu1 %v1646_v51, %s3035_s2 }
 0x2d5   :  { %1779 = vrot.lane.b32.xlu0 %v3966_v3, %s3029_s13 }
 0x2d6   :  { %2162 = vrot.lane.b32.xlu1 %v3964_v47, %s3034_s8 }
 0x2d9   :  { %2164 = vrot.lane.b32.xlu0 %v1549_v50, %s3034_s8 }
 0x2da   :  { %1684 = vrot.lane.b32.xlu1 %v1647_v57, %s3027_s15 }
 0x2dd   :  { %1781 = vrot.lane.b32.xlu0 %v3972_v32, %s3029_s13 }
 0x2de   :  { %2069 = vrot.lane.b32.xlu1 %v3966_v3, %s3032_s0 }
 0x2e1   :  { %2166 = vrot.lane.b32.xlu0 %v1550_v16, %s3034_s8 }
 0x2e2   :  { %2259 = vrot.lane.b32.xlu1 %v3998_v42, %s3033_s17 }
 0x2e5   :  { %1589 = vrot.lane.b32.xlu0 %v1551_v58, %s3024_s16 }
 0x2e6   :  { %1876 = vrot.lane.b32.xlu1 %v1550_v16, %s3031_s14  ;;  %v1655_v16 = vld [vmem:[#allocation4 + $0xf2] sm:$0xff] }
 0x2e9   :  { %1973 = vrot.lane.b32.xlu0 %v1647_v57, %s3035_s2 }
 0x2ea   :  { %2261 = vrot.lane.b32.xlu1 %v1646_v51, %s3033_s17 }
 0x2ed   :  { %1591 = vrot.lane.b32.xlu0 %v1552_v48, %s3024_s16 }
 0x2ee   :  { %1878 = vrot.lane.b32.xlu1 %v1551_v58, %s3031_s14 }
 0x2f1   :  { %1975 = vrot.lane.b32.xlu0 %v1938_v59, %s3035_s2 }
 0x2f2   :  { %2263 = vrot.lane.b32.xlu1 %v1647_v57, %s3033_s17  ;;  %v1559_v57 = vld [vmem:[#allocation4 + $0x101] sm:$0xff] }
 0x2f5   :  { %1688 = vrot.lane.b32.xlu0 %v1649_v1, %s3027_s15 }
 0x2f6   :  { %1686 = vrot.lane.b32.xlu1 %v1938_v59, %s3027_s15 }
 0x2f9   :  { %2073 = vrot.lane.b32.xlu0 %v3976_v33, %s3032_s0 }
 0x2fa   :  { %2071 = vrot.lane.b32.xlu1 %v3972_v32, %s3032_s0 }
 0x2fd   :  { %1785 = vrot.lane.b32.xlu0 %v1746_v60, %s3029_s13 }
 0x2fe   :  { %1783 = vrot.lane.b32.xlu1 %v3976_v33, %s3029_s13  ;;  %v1557_v33 = vld [vmem:[#allocation4 + $0xe1] sm:$0xff] }
 0x301   :  { %2170 = vrot.lane.b32.xlu0 %v1552_v48, %s3034_s8 }
 0x302   :  { %2168 = vrot.lane.b32.xlu1 %v1551_v58, %s3034_s8 }
 0x305   :  { %1977 = vrot.lane.b32.xlu0 %v1649_v1, %s3035_s2 }
 0x306   :  { %1880 = vrot.lane.b32.xlu1 %v1552_v48, %s3031_s14 }
 0x309   :  { %1595 = vrot.lane.b32.xlu0 %v1554_v62, %s3024_s16 }
 0x30a   :  { %2265 = vrot.lane.b32.xlu1 %v1938_v59, %s3033_s17  ;;  %v1560_v59 = vld [vmem:[#allocation4 + $0x111] sm:$0xff] }
 0x30d   :  { %1979 = vrot.lane.b32.xlu0 %v1940_v17, %s3035_s2 }
 0x30e   :  { %1882 = vrot.lane.b32.xlu1 %v1843_v14, %s3031_s14 }
 0x311   :  { %1692 = vrot.lane.b32.xlu0 %v1651_v2, %s3027_s15 }
 0x312   :  { %2267 = vrot.lane.b32.xlu1 %v1649_v1, %s3033_s17 }
 0x313   :  { %v1677_v4 = vpop.permute.xlu0 %1676 }
 0x314   :  { %v1580_v34 = vpop.permute.xlu1 %1579 }
 0x315   :  { %1627 = vst.msk [vmem:[#allocation5 + $0x8] sm:$0xff] %vm1625_vm0, %v1580_v34  ;;  %1789 = vrot.lane.b32.xlu0 %v3982_v37, %s3029_s13 }
 0x316   :  { %1724 = vst.msk [vmem:[#allocation5 + $0x8] sm:$0xff] %vm1722_vm1, %v1677_v4  ;;  %2075 = vrot.lane.b32.xlu1 %v1746_v60, %s3032_s0  ;;  %v1657_v4 = vld [vmem:[#allocation4 + $0x112] sm:$0xff] }
 0x317   :  { %v1584_v6 = vpop.permute.xlu0 %1583 }
 0x318   :  { %v1582_v7 = vpop.permute.xlu1 %1581  ;;  %1629 = vst.msk [vmem:[#allocation5 + $0x18] sm:$0xff] %vm1625_vm0, %v1584_v6 }
 0x319   :  { %1628 = vst.msk [vmem:[#allocation5 + $0x10] sm:$0xff] %vm1625_vm0, %v1582_v7  ;;  %1597 = vrot.lane.b32.xlu0 %v1555_v8, %s3024_s16 }
 0x31a   :  { %1787 = vrot.lane.b32.xlu1 %v3986_v38, %s3029_s13 }
 0x31b   :  { %v1774_v9 = vpop.permute.xlu0 %1773 }
 0x31c   :  { %v1772_v39 = vpop.permute.xlu1 %1771  ;;  %1821 = vst.msk [vmem:[#allocation5 + $0x8] sm:$0xff] %vm1819_vm2, %v1774_v9 }
 0x31d   :  { %1820 = vst.msk [vmem:[#allocation5] sm:$0xff] %vm1819_vm2, %v1772_v39  ;;  %1981 = vrot.lane.b32.xlu0 %v1651_v2, %s3035_s2  ;;  %v1754_v39 = vld [vmem:[#allocation4 + $0x120] sm:$0xff] }
 0x31e   :  { %2172 = vrot.lane.b32.xlu1 %v1843_v14, %s3034_s8 }
 0x31f   :  { %v1681_v10 = vpop.permute.xlu0 %1680 }
 0x320   :  { %v1679_v11 = vpop.permute.xlu1 %1678  ;;  %1726 = vst.msk [vmem:[#allocation5 + $0x18] sm:$0xff] %vm1722_vm1, %v1681_v10 }
 0x321   :  { %1725 = vst.msk [vmem:[#allocation5 + $0x10] sm:$0xff] %vm1722_vm1, %v1679_v11  ;;  %1599 = vrot.lane.b32.xlu0 %v1556_v0, %s3024_s16 }
 0x322   :  { %1884 = vrot.lane.b32.xlu1 %v1554_v62, %s3031_s14 }
 0x323   :  { %v1871_v13 = vpop.permute.xlu0 %1870 }
 0x324   :  { %v1869_v19 = vpop.permute.xlu1 %1868  ;;  %1918 = vst.msk [vmem:[#allocation5 + $0x8] sm:$0xff] %vm1916_vm3, %v1871_v13 }
 0x325   :  { %1917 = vst.msk [vmem:[#allocation5] sm:$0xff] %vm1916_vm3, %v1869_v19  ;;  %1983 = vrot.lane.b32.xlu0 %v1942_v18, %s3035_s2  ;;  %v1851_v19 = vld [vmem:[#allocation4 + $0x121] sm:$0xff] }
 0x326   :  { %2269 = vrot.lane.b32.xlu1 %v1940_v17, %s3033_s17  ;;  %v1946_v17 = vld [vmem:[#allocation4 + $0x102] sm:$0xff] }
 0x327   :  { %v1778_v20 = vpop.permute.xlu0 %1777 }
 0x328   :  { %v1776_v45 = vpop.permute.xlu1 %1775  ;;  %1823 = vst.msk [vmem:[#allocation5 + $0x18] sm:$0xff] %vm1819_vm2, %v1778_v20 }
 0x329   :  { %1822 = vst.msk [vmem:[#allocation5 + $0x10] sm:$0xff] %vm1819_vm2, %v1776_v45  ;;  %1696 = vrot.lane.b32.xlu0 %v1653_v21, %s3027_s15 }
 0x32a   :  { %1886 = vrot.lane.b32.xlu1 %v1555_v8, %s3031_s14 }
 0x32b   :  { %v1968_v22 = vpop.permute.xlu0 %1967 }
 0x32c   :  { %v1966_v23 = vpop.permute.xlu1 %1965  ;;  %2015 = vst.msk [vmem:[#allocation5 + $0x8] sm:$0xff] %vm2013_vm4, %v1968_v22 }
 0x32d   :  { %2014 = vst.msk [vmem:[#allocation5] sm:$0xff] %vm2013_vm4, %v1966_v23  ;;  %2081 = vrot.lane.b32.xlu0 %v3990_v40, %s3032_s0 }
 0x32e   :  { %1694 = vrot.lane.b32.xlu1 %v1942_v18, %s3027_s15 }
 0x32f   :  { %v1586_v27 = vpop.permute.xlu0 %1585 }
 0x330   :  { %v1873_v15 = vpop.permute.xlu1 %1872  ;;  %1630 = vst.msk [vmem:[#allocation5 + $0x20] sm:$0xff] %vm1625_vm0, %v1586_v27 }
 0x331   :  { %1919 = vst.msk [vmem:[#allocation5 + $0x10] sm:$0xff] %vm1916_vm3, %v1873_v15  ;;  %1793 = vrot.lane.b32.xlu0 %v3994_v41, %s3029_s13 }
 0x332   :  { %2079 = vrot.lane.b32.xlu1 %v3982_v37, %s3032_s0 }
 0x333   :  { %v1970_v47 = vpop.permute.xlu0 %1969 }
 0x334   :  { %v2064_v30 = vpop.permute.xlu1 %2063  ;;  %2016 = vst.msk [vmem:[#allocation5 + $0x10] sm:$0xff] %vm2013_vm4, %v1970_v47 }
 0x335   :  { %2112 = vst.msk [vmem:[#allocation5] sm:$0xff] %vm2111_vm5, %v2064_v30  ;;  %2178 = vrot.lane.b32.xlu0 %v1556_v0, %s3034_s8  ;;  %v2143_v30 = vld [vmem:[#allocation4 + $0x131] sm:$0xff] }
 0x336   :  { %1791 = vrot.lane.b32.xlu1 %v3990_v40, %s3029_s13 }
 0x337   :  { %v2161_v3 = vpop.permute.xlu0 %2160 }
 0x338   :  { %v1875_v32 = vpop.permute.xlu1 %1874  ;;  %2209 = vst.msk [vmem:[#allocation5] sm:$0xff] %vm2208_vm6, %v2161_v3 }
 0x339   :  { %1920 = vst.msk [vmem:[#allocation5 + $0x18] sm:$0xff] %vm1916_vm3, %v1875_v32  ;;  %1601 = vrot.lane.b32.xlu0 %v1557_v33, %s3024_s16 }
 0x33a   :  { %2176 = vrot.lane.b32.xlu1 %v1555_v8, %s3034_s8 }
 0x33b   :  { %v1683_v37 = vpop.permute.xlu0 %1682 }
 0x33c   :  { %v2066_v38 = vpop.permute.xlu1 %2065  ;;  %1727 = vst.msk [vmem:[#allocation5 + $0x20] sm:$0xff] %vm1722_vm1, %v1683_v37 }
 0x33d   :  { %2113 = vst.msk [vmem:[#allocation5 + $0x8] sm:$0xff] %vm2111_vm5, %v2066_v38  ;;  %1985 = vrot.lane.b32.xlu0 %v1653_v21, %s3035_s2 }
 0x33e   :  { %1888 = vrot.lane.b32.xlu1 %v1556_v0, %s3031_s14 }
 0x33f   :  { %v2068_v40 = vpop.permute.xlu0 %2067 }
 0x340   :  { %v1588_v42 = vpop.permute.xlu1 %1587  ;;  %2114 = vst.msk [vmem:[#allocation5 + $0x10] sm:$0xff] %vm2111_vm5, %v2068_v40 }
 0x341   :  { %1631 = vst.msk [vmem:[#allocation5 + $0x28] sm:$0xff] %vm1625_vm0, %v1588_v42  ;;  %1603 = vrot.lane.b32.xlu0 %v1558_v43, %s3024_s16 }
 0x342   :  { %2273 = vrot.lane.b32.xlu1 %v1942_v18, %s3033_s17 }
 0x343   :  { %v2258_v50 = vpop.permute.xlu0 %2257 }
 0x344   :  { %v1972_v51 = vpop.permute.xlu1 %1971  ;;  %2306 = vst.msk [vmem:[#allocation5] sm:$0xff] %vm2305_vm7, %v2258_v50 }
 0x345   :  { %2017 = vst.msk [vmem:[#allocation5 + $0x18] sm:$0xff] %vm2013_vm4, %v1972_v51  ;;  %1987 = vrot.lane.b32.xlu0 %v1944_v52, %s3035_s2 }
 0x346   :  { %1890 = vrot.lane.b32.xlu1 %v1557_v33, %s3031_s14 }
 0x347   :  { %v1780_v53 = vpop.permute.xlu0 %1779 }
 0x348   :  { %v2163_v46 = vpop.permute.xlu1 %2162  ;;  %1824 = vst.msk [vmem:[#allocation5 + $0x20] sm:$0xff] %vm1819_vm2, %v1780_v53 }
 0x349   :  { %2210 = vst.msk [vmem:[#allocation5 + $0x8] sm:$0xff] %vm2208_vm6, %v2163_v46  ;;  %1700 = vrot.lane.b32.xlu0 %v1655_v16, %s3027_s15 }
 0x34a   :  { %2275 = vrot.lane.b32.xlu1 %v1653_v21, %s3033_s17 }
 0x34b   :  { %v2165_v25 = vpop.permute.xlu0 %2164  ;;  %v2322_v24 = vld [vmem:[#allocation5] sm:$0xff] }
 0x34c   :  { %v1685_v12 = vpop.permute.xlu1 %1684  ;;  %2211 = vst.msk [vmem:[#allocation5 + $0x10] sm:$0xff] %vm2208_vm6, %v2165_v25  ;;  %2948 = vmatprep.mubr.msk.f32.mxu0 %vm2347_vm8, %v2322_v24 }
 0x34d   :  { %1728 = vst.msk [vmem:[#allocation5 + $0x28] sm:$0xff] %vm1722_vm1, %v1685_v12  ;;  %2085 = vrot.lane.b32.xlu0 %v4000_v44, %s3032_s0 }
 0x34e   :  { %1698 = vrot.lane.b32.xlu1 %v1944_v52, %s3027_s15 }
 0x34f   :  { %v1782_v54 = vpop.permute.xlu0 %1781 }
 0x350   :  { %v2070_v36 = vpop.permute.xlu1 %2069  ;;  %1825 = vst.msk [vmem:[#allocation5 + $0x28] sm:$0xff] %vm1819_vm2, %v1782_v54 }
 0x351   :  { %2115 = vst.msk [vmem:[#allocation5 + $0x18] sm:$0xff] %vm2111_vm5, %v2070_v36  ;;  %1797 = vrot.lane.b32.xlu0 %v4007_v29, %s3029_s13 }
 0x352   :  { %2083 = vrot.lane.b32.xlu1 %v3994_v41, %s3032_s0 }
 0x353   :  { %v2167_v26 = vpop.permute.xlu0 %2166 }
 0x354   :  { %v2260_v35 = vpop.permute.xlu1 %2259  ;;  %2212 = vst.msk [vmem:[#allocation5 + $0x18] sm:$0xff] %vm2208_vm6, %v2167_v26 }
 0x355   :  { %2307 = vst.msk [vmem:[#allocation5 + $0x8] sm:$0xff] %vm2305_vm7, %v2260_v35  ;;  %2182 = vrot.lane.b32.xlu0 %v1558_v43, %s3034_s8 }
 0x356   :  { %1795 = vrot.lane.b32.xlu1 %v4000_v44, %s3029_s13 }
 0x357   :  { %v1590_v55 = vpop.permute.xlu0 %1589 }
 0x358   :  { %v1877_v56 = vpop.permute.xlu1 %1876  ;;  %1632 = vst.msk [vmem:[#allocation5 + $0x30] sm:$0xff] %vm1625_vm0, %v1590_v55 }
 0x359   :  { %1921 = vst.msk [vmem:[#allocation5 + $0x20] sm:$0xff] %vm1916_vm3, %v1877_v56  ;;  %1605 = vrot.lane.b32.xlu0 %v1559_v57, %s3024_s16 }
 0x35a   :  { %2180 = vrot.lane.b32.xlu1 %v1557_v33, %s3034_s8  ;;  %v2240_v33 = vld [vmem:[#allocation4 + $0x132] sm:$0xff] }
 0x35b   :  { %v1974_v41 = vpop.permute.xlu0 %1973 }
 0x35c   :  { %v2262_v49 = vpop.permute.xlu1 %2261  ;;  %v2323_v58 = vld [vmem:[#allocation5 + $0x8] sm:$0xff]  ;;  %2018 = vst.msk [vmem:[#allocation5 + $0x20] sm:$0xff] %vm2013_vm4, %v1974_v41 }
 0x35d   :  { %2308 = vst.msk [vmem:[#allocation5 + $0x10] sm:$0xff] %vm2305_vm7, %v2262_v49  ;;  %2949 = vmatmul.mubr.msk.f32.vlgmr.msra.gmra.mrb[16].mxu0 %vm2347_vm8, %v2323_v58  ;;  %1989 = vrot.lane.b32.xlu0 %v1655_v16, %s3035_s2 }
 0x35e   :  { %1892 = vrot.lane.b32.xlu1 %v1558_v43, %s3031_s14 }
 0x35f   :  { %v1592_v44 = vpop.permute.xlu0 %1591 }
 0x360   :  { %v1879_v48 = vpop.permute.xlu1 %1878  ;;  %1633 = vst.msk [vmem:[#allocation5 + $0x38] sm:$0xff] %vm1625_vm0, %v1592_v44 }
 0x361   :  { %1922 = vst.msk [vmem:[#allocation5 + $0x28] sm:$0xff] %vm1916_vm3, %v1879_v48  ;;  %1607 = vrot.lane.b32.xlu0 %v1560_v59, %s3024_s16 }
 0x362   :  { %2277 = vrot.lane.b32.xlu1 %v1944_v52, %s3033_s17 }
 0x363   :  { %v1976_v1 = vpop.permute.xlu0 %1975 }
 0x364   :  { %v2264_v60 = vpop.permute.xlu1 %2263  ;;  %v2324_v62 = vld [vmem:[#allocation5 + $0x10] sm:$0xff]  ;;  %2019 = vst.msk [vmem:[#allocation5 + $0x28] sm:$0xff] %vm2013_vm4, %v1976_v1 }
 0x365   :  { %2309 = vst.msk [vmem:[#allocation5 + $0x18] sm:$0xff] %vm2305_vm7, %v2264_v60  ;;  %2951 = vmatprep.mubr.msk.f32.mxu1 %vm2347_vm8, %v2324_v62  ;;  %1991 = vrot.lane.b32.xlu0 %v1946_v17, %s3035_s2 }
 0x366   :  { %1894 = vrot.lane.b32.xlu1 %v1559_v57, %s3031_s14 }
 0x367   :  { %v1689_v14 = vpop.permute.xlu0 %1688 }
 0x368   :  { %v1687_v2 = vpop.permute.xlu1 %1686  ;;  %1730 = vst.msk [vmem:[#allocation5 + $0x38] sm:$0xff] %vm1722_vm1, %v1689_v14 }
 0x369   :  { %1729 = vst.msk [vmem:[#allocation5 + $0x30] sm:$0xff] %vm1722_vm1, %v1687_v2  ;;  %1704 = vrot.lane.b32.xlu0 %v1657_v4, %s3027_s15 }
 0x36a   :  { %2279 = vrot.lane.b32.xlu1 %v1655_v16, %s3033_s17 }
 0x36b   :  { %v2074_v34 = vpop.permute.xlu0 %2073 }
 0x36c   :  { %v2072_v6 = vpop.permute.xlu1 %2071  ;;  %v2325_v7 = vld [vmem:[#allocation5 + $0x18] sm:$0xff]  ;;  %2117 = vst.msk [vmem:[#allocation5 + $0x28] sm:$0xff] %vm2111_vm5, %v2074_v34 }
 0x36d   :  { %2116 = vst.msk [vmem:[#allocation5 + $0x20] sm:$0xff] %vm2111_vm5, %v2072_v6  ;;  %2952 = vmatmul.mubr.msk.f32.vlgmr.msra.gmra.mrb[0].mxu1 %vm2347_vm8, %v2325_v7  ;;  %2089 = vrot.lane.b32.xlu0 %v4011_v5, %s3032_s0 }
 0x36e   :  { %1702 = vrot.lane.b32.xlu1 %v1946_v17, %s3027_s15 }
 0x36f   :  { %v1786_v8 = vpop.permute.xlu0 %1785 }
 0x370   :  { %v1784_v9 = vpop.permute.xlu1 %1783  ;;  %1827 = vst.msk [vmem:[#allocation5 + $0x38] sm:$0xff] %vm1819_vm2, %v1786_v8 }
 0x371   :  { %1826 = vst.msk [vmem:[#allocation5 + $0x30] sm:$0xff] %vm1819_vm2, %v1784_v9  ;;  %1801 = vrot.lane.b32.xlu0 %v1754_v39, %s3029_s13 }
 0x372   :  { %2087 = vrot.lane.b32.xlu1 %v4007_v29, %s3032_s0 }
 0x373   :  { %v2171_v10 = vpop.permute.xlu0 %2170 }
 0x374   :  { %v2169_v11 = vpop.permute.xlu1 %2168  ;;  %2214 = vst.msk [vmem:[#allocation5 + $0x28] sm:$0xff] %vm2208_vm6, %v2171_v10 }
 0x375   :  { %2213 = vst.msk [vmem:[#allocation5 + $0x20] sm:$0xff] %vm2208_vm6, %v2169_v11  ;;  %2186 = vrot.lane.b32.xlu0 %v1560_v59, %s3034_s8 }
 0x376   :  { %1799 = vrot.lane.b32.xlu1 %v4011_v5, %s3029_s13 }
 0x377   :  { %v1978_v0 = vpop.permute.xlu0 %1977 }
 0x378   :  { %v1881_v13 = vpop.permute.xlu1 %1880 }
 0x379   :  { %1923 = vst.msk [vmem:[#allocation5 + $0x30] sm:$0xff] %vm1916_vm3, %v1881_v13  ;;  %1898 = vrot.lane.b32.xlu0 %v1851_v19, %s3031_s14 }
 0x37a   :  { %2020 = vst.msk [vmem:[#allocation5 + $0x30] sm:$0xff] %vm2013_vm4, %v1978_v0  ;;  %2184 = vrot.lane.b32.xlu1 %v1559_v57, %s3034_s8 }
 0x37b   :  { %v1596_v29 = vpop.permute.xlu0 %1595 }
 0x37c   :  { %v2266_v18 = vpop.permute.xlu1 %2265  ;;  %1635 = vst.msk [vmem:[#allocation5 + $0x48] sm:$0xff] %vm1625_vm0, %v1596_v29 }
 0x37d   :  { %2310 = vst.msk [vmem:[#allocation5 + $0x20] sm:$0xff] %vm2305_vm7, %v2266_v18  ;;  %2283 = vrot.lane.b32.xlu0 %v1657_v4, %s3033_s17 }
 0x37e   :  { %1896 = vrot.lane.b32.xlu1 %v1560_v59, %s3031_s14 }
 0x37f   :  { %v1980_v5 = vpop.permute.xlu0 %1979 }
 0x380   :  { %v1883_v20 = vpop.permute.xlu1 %1882 }
 0x381   :  { %1924 = vst.msk [vmem:[#allocation5 + $0x38] sm:$0xff] %vm1916_vm3, %v1883_v20  ;;  %2091 = vrot.lane.b32.xlu0 %v1754_v39, %s3032_s0 }
 0x382   :  { %2021 = vst.msk [vmem:[#allocation5 + $0x38] sm:$0xff] %vm2013_vm4, %v1980_v5  ;;  %2281 = vrot.lane.b32.xlu1 %v1946_v17, %s3033_s17 }
 0x383   :  { %2119 = vst.msk [vmem:[#allocation5 + $0x38] sm:$0xff] %vm2111_vm5, %v4098_v61  ;;  %v1693_v45 = vpop.permute.xlu0 %1692 }
 0x384   :  { %2216 = vst.msk [vmem:[#allocation5 + $0x38] sm:$0xff] %vm2208_vm6, %v4106_v63  ;;  %v2268_v21 = vpop.permute.xlu1 %2267  ;;  %v2326_v22 = vld [vmem:[#allocation5 + $0x20] sm:$0xff] }
 0x385   :  { %2313 = vst.msk [vmem:[#allocation5 + $0x38] sm:$0xff] %vm2305_vm7, %v4104_v31  ;;  %2311 = vst.msk [vmem:[#allocation5 + $0x28] sm:$0xff] %vm2305_vm7, %v2268_v21  ;;  %2954 = vmatprep.mubr.msk.f32.mxu1 %vm2347_vm8, %v2326_v22  ;;  %2188 = vrot.lane.b32.xlu0 %v1851_v19, %s3034_s8  ;;  %v2239_v63 = vld [vmem:[#allocation4 + $0x122] sm:$0xff]  ;;  %v2046_v31 = vld [vmem:[#allocation4 + $0x130] sm:$0xff] }
 0x386   :  { %1732 = vst.msk [vmem:[#allocation5 + $0x48] sm:$0xff] %vm1722_vm1, %v1693_v45  ;;  %1993 = vrot.lane.b32.xlu1 %v1657_v4, %s3035_s2 }
 0x387   :  { %v1790_v61 = vpop.permute.xlu0 %1789 }
 0x388   :  { %v2076_v23 = vpop.permute.xlu1 %2075  ;;  %1829 = vst.msk [vmem:[#allocation5 + $0x48] sm:$0xff] %vm1819_vm2, %v1790_v61 }
 0x389   :  { %2118 = vst.msk [vmem:[#allocation5 + $0x30] sm:$0xff] %vm2111_vm5, %v2076_v23  ;;  %2285 = vrot.lane.b32.xlu0 %v2239_v63, %s3033_s17 }
 0x38a   :  { %1995 = vrot.lane.b32.xlu1 %v2239_v63, %s3035_s2 }
 0x38b   :  { %v1598_v27 = vpop.permute.xlu0 %1597 }
 0x38c   :  { %v1788_v15 = vpop.permute.xlu1 %1787  ;;  %v2327_v47 = vld [vmem:[#allocation5 + $0x28] sm:$0xff]  ;;  %1636 = vst.msk [vmem:[#allocation5 + $0x50] sm:$0xff] %vm1625_vm0, %v1598_v27  ;;  %v2329_v46 = vld [vmem:[#allocation5 + $0x38] sm:$0xff] }
 0x38d   :  { %1828 = vst.msk [vmem:[#allocation5 + $0x40] sm:$0xff] %vm1819_vm2, %v1788_v15  ;;  %2955 = vmatmul.mubr.msk.f32.gmra.mrb[2].mxu1 %vm2347_vm8, %v2327_v47 }
 0x38e   :  { %2093 = vrot.lane.b32.xlu1 %v2046_v31, %s3032_s0 }
 0x38f   :  { %v1982_v3 = vpop.permute.xlu0 %1981 }
 0x390   :  { %v2173_v32 = vpop.permute.xlu1 %2172 }
 0x391   :  { %2215 = vst.msk [vmem:[#allocation5 + $0x30] sm:$0xff] %vm2208_vm6, %v2173_v32 }
 0x392   :  { %2190 = vrot.lane.b32.xlu1 %v2143_v30, %s3034_s8 }
 0x393   :  { %v1600_v37 = vpop.permute.xlu0 %1599 }
 0x394   :  { %v1885_v38 = vpop.permute.xlu1 %1884  ;;  %1637 = vst.msk [vmem:[#allocation5 + $0x58] sm:$0xff] %vm1625_vm0, %v1600_v37 }
 0x395   :  { %1925 = vst.msk [vmem:[#allocation5 + $0x40] sm:$0xff] %vm1916_vm3, %v1885_v38 }
 0x396   :  { %2022 = vst.msk [vmem:[#allocation5 + $0x40] sm:$0xff] %vm2013_vm4, %v1982_v3  ;;  %2287 = vrot.lane.b32.xlu1 %v2240_v33, %s3033_s17 }
 0x397   :  { %v1984_v40 = vpop.permute.xlu0 %1983 }
 0x398   :  { %v2270_v42 = vpop.permute.xlu1 %2269 }
 0x399   :  { %2312 = vst.msk [vmem:[#allocation5 + $0x30] sm:$0xff] %vm2305_vm7, %v2270_v42 }
 0x39b   :  { %v1697_v43 = vpop.permute.xlu0 %1696 }
 0x39c   :  { %v1887_v50 = vpop.permute.xlu1 %1886  ;;  %1734 = vst.msk [vmem:[#allocation5 + $0x58] sm:$0xff] %vm1722_vm1, %v1697_v43 }
 0x39d   :  { %1926 = vst.msk [vmem:[#allocation5 + $0x48] sm:$0xff] %vm1916_vm3, %v1887_v50 }
 0x39e   :  { %2023 = vst.msk [vmem:[#allocation5 + $0x48] sm:$0xff] %vm2013_vm4, %v1984_v40 }
 0x39f   :  { %v2082_v51 = vpop.permute.xlu0 %2081 }
 0x3a0   :  { %v1695_v52 = vpop.permute.xlu1 %1694  ;;  %v2328_v53 = vld [vmem:[#allocation5 + $0x30] sm:$0xff]  ;;  %2121 = vst.msk [vmem:[#allocation5 + $0x48] sm:$0xff] %vm2111_vm5, %v2082_v51 }
 0x3a1   :  { %1733 = vst.msk [vmem:[#allocation5 + $0x50] sm:$0xff] %vm1722_vm1, %v1695_v52  ;;  %2957 = vmatprep.mubr.msk.f32.mxu1 %vm2347_vm8, %v2328_v53 }
 0x3a2   :  { %2958 = vmatmul.mubr.msk.f32.gmra.mrb[4].mxu1 %vm2347_vm8, %v2329_v46 }
 0x3a3   :  { %v1794_v16 = vpop.permute.xlu0 %1793 }
 0x3a4   :  { %v2080_v25 = vpop.permute.xlu1 %2079  ;;  %1831 = vst.msk [vmem:[#allocation5 + $0x58] sm:$0xff] %vm1819_vm2, %v1794_v16 }
 0x3a5   :  { %2120 = vst.msk [vmem:[#allocation5 + $0x40] sm:$0xff] %vm2111_vm5, %v2080_v25 }
 0x3a7   :  { %v2179_v12 = vpop.permute.xlu0 %2178 }
 0x3a8   :  { %v1792_v24 = vpop.permute.xlu1 %1791  ;;  %2218 = vst.msk [vmem:[#allocation5 + $0x48] sm:$0xff] %vm2208_vm6, %v2179_v12 }
 0x3a9   :  { %1830 = vst.msk [vmem:[#allocation5 + $0x50] sm:$0xff] %vm1819_vm2, %v1792_v24 }
 0x3ab   :  { %v1602_v54 = vpop.permute.xlu0 %1601 }
 0x3ac   :  { %v2177_v36 = vpop.permute.xlu1 %2176  ;;  %1638 = vst.msk [vmem:[#allocation5 + $0x60] sm:$0xff] %vm1625_vm0, %v1602_v54 }
 0x3ad   :  { %2217 = vst.msk [vmem:[#allocation5 + $0x40] sm:$0xff] %vm2208_vm6, %v2177_v36 }
 0x3af   :  { %v1986_v26 = vpop.permute.xlu0 %1985 }
 0x3b0   :  { %v1889_v35 = vpop.permute.xlu1 %1888 }
 0x3b1   :  { %1927 = vst.msk [vmem:[#allocation5 + $0x50] sm:$0xff] %vm1916_vm3, %v1889_v35 }
 0x3b2   :  { %2024 = vst.msk [vmem:[#allocation5 + $0x50] sm:$0xff] %vm2013_vm4, %v1986_v26 }
 0x3b3   :  { %v1604_v55 = vpop.permute.xlu0 %1603 }
 0x3b4   :  { %v2274_v56 = vpop.permute.xlu1 %2273  ;;  %1639 = vst.msk [vmem:[#allocation5 + $0x68] sm:$0xff] %vm1625_vm0, %v1604_v55 }
 0x3b5   :  { %2314 = vst.msk [vmem:[#allocation5 + $0x40] sm:$0xff] %vm2305_vm7, %v2274_v56 }
 0x3b7   :  { %v1988_v57 = vpop.permute.xlu0 %1987 }
 0x3b8   :  { %v1891_v41 = vpop.permute.xlu1 %1890 }
 0x3b9   :  { %1928 = vst.msk [vmem:[#allocation5 + $0x58] sm:$0xff] %vm1916_vm3, %v1891_v41 }
 0x3ba   :  { %2025 = vst.msk [vmem:[#allocation5 + $0x58] sm:$0xff] %vm2013_vm4, %v1988_v57 }
 0x3bb   :  { %v1701_v49 = vpop.permute.xlu0 %1700 }
 0x3bc   :  { %v2276_v58 = vpop.permute.xlu1 %2275  ;;  %v2330_v44 = vld [vmem:[#allocation5 + $0x40] sm:$0xff]  ;;  %1736 = vst.msk [vmem:[#allocation5 + $0x68] sm:$0xff] %vm1722_vm1, %v1701_v49 }
 0x3bd   :  { %2315 = vst.msk [vmem:[#allocation5 + $0x48] sm:$0xff] %vm2305_vm7, %v2276_v58  ;;  %2960 = vmatprep.mubr.msk.f32.mxu1 %vm2347_vm8, %v2330_v44 }
 0x3bf   :  { %v2086_v48 = vpop.permute.xlu0 %2085 }
 0x3c0   :  { %v1699_v59 = vpop.permute.xlu1 %1698  ;;  %2123 = vst.msk [vmem:[#allocation5 + $0x58] sm:$0xff] %vm2111_vm5, %v2086_v48 }
 0x3c1   :  { %1735 = vst.msk [vmem:[#allocation5 + $0x60] sm:$0xff] %vm1722_vm1, %v1699_v59 }
 0x3c3   :  { %v1798_v1 = vpop.permute.xlu0 %1797 }
 0x3c4   :  { %v2084_v60 = vpop.permute.xlu1 %2083  ;;  %v2331_v62 = vld [vmem:[#allocation5 + $0x48] sm:$0xff]  ;;  %1833 = vst.msk [vmem:[#allocation5 + $0x68] sm:$0xff] %vm1819_vm2, %v1798_v1 }
 0x3c5   :  { %2122 = vst.msk [vmem:[#allocation5 + $0x50] sm:$0xff] %vm2111_vm5, %v2084_v60  ;;  %2961 = vmatmul.mubr.msk.f32.gmra.mrb[6].mxu1 %vm2347_vm8, %v2331_v62 }
 0x3c7   :  { %v2183_v17 = vpop.permute.xlu0 %2182 }
 0x3c8   :  { %v1796_v14 = vpop.permute.xlu1 %1795  ;;  %2220 = vst.msk [vmem:[#allocation5 + $0x58] sm:$0xff] %vm2208_vm6, %v2183_v17 }
 0x3c9   :  { %1832 = vst.msk [vmem:[#allocation5 + $0x60] sm:$0xff] %vm1819_vm2, %v1796_v14 }
 0x3cb   :  { %v1606_v2 = vpop.permute.xlu0 %1605 }
 0x3cc   :  { %v2181_v4 = vpop.permute.xlu1 %2180  ;;  %1640 = vst.msk [vmem:[#allocation5 + $0x70] sm:$0xff] %vm1625_vm0, %v1606_v2 }
 0x3cd   :  { %2219 = vst.msk [vmem:[#allocation5 + $0x50] sm:$0xff] %vm2208_vm6, %v2181_v4 }
 0x3cf   :  { %v1990_v34 = vpop.permute.xlu0 %1989 }
 0x3d0   :  { %v1893_v6 = vpop.permute.xlu1 %1892 }
 0x3d1   :  { %1929 = vst.msk [vmem:[#allocation5 + $0x60] sm:$0xff] %vm1916_vm3, %v1893_v6 }
 0x3d2   :  { %2026 = vst.msk [vmem:[#allocation5 + $0x60] sm:$0xff] %vm2013_vm4, %v1990_v34 }
 0x3d3   :  { %v1608_v7 = vpop.permute.xlu0 %1607 }
 0x3d4   :  { %v2278_v8 = vpop.permute.xlu1 %2277  ;;  %1641 = vst.msk [vmem:[#allocation5 + $0x78] sm:$0xff] %vm1625_vm0, %v1608_v7 }
 0x3d5   :  { %2316 = vst.msk [vmem:[#allocation5 + $0x50] sm:$0xff] %vm2305_vm7, %v2278_v8 }
 0x3d7   :  { %v1992_v9 = vpop.permute.xlu0 %1991 }
 0x3d8   :  { %v1895_v39 = vpop.permute.xlu1 %1894 }
 0x3d9   :  { %1930 = vst.msk [vmem:[#allocation5 + $0x68] sm:$0xff] %vm1916_vm3, %v1895_v39 }
 0x3da   :  { %2027 = vst.msk [vmem:[#allocation5 + $0x68] sm:$0xff] %vm2013_vm4, %v1992_v9 }
 0x3db   :  { %v1705_v10 = vpop.permute.xlu0 %1704 }
 0x3dc   :  { %v2280_v11 = vpop.permute.xlu1 %2279  ;;  %v2332_v0 = vld [vmem:[#allocation5 + $0x50] sm:$0xff]  ;;  %1738 = vst.msk [vmem:[#allocation5 + $0x78] sm:$0xff] %vm1722_vm1, %v1705_v10 }
 0x3dd   :  { %2317 = vst.msk [vmem:[#allocation5 + $0x58] sm:$0xff] %vm2305_vm7, %v2280_v11  ;;  %2963 = vmatprep.mubr.msk.f32.mxu1 %vm2347_vm8, %v2332_v0 }
 0x3df   :  { %v2090_v13 = vpop.permute.xlu0 %2089 }
 0x3e0   :  { %v1703_v19 = vpop.permute.xlu1 %1702  ;;  %2125 = vst.msk [vmem:[#allocation5 + $0x68] sm:$0xff] %vm2111_vm5, %v2090_v13 }
 0x3e1   :  { %1737 = vst.msk [vmem:[#allocation5 + $0x70] sm:$0xff] %vm1722_vm1, %v1703_v19 }
 0x3e3   :  { %v1802_v29 = vpop.permute.xlu0 %1801 }
 0x3e4   :  { %v2088_v18 = vpop.permute.xlu1 %2087  ;;  %v2333_v5 = vld [vmem:[#allocation5 + $0x58] sm:$0xff]  ;;  %1835 = vst.msk [vmem:[#allocation5 + $0x78] sm:$0xff] %vm1819_vm2, %v1802_v29 }
 0x3e5   :  { %2124 = vst.msk [vmem:[#allocation5 + $0x60] sm:$0xff] %vm2111_vm5, %v2088_v18  ;;  %2964 = vmatmul.mubr.msk.f32.gmra.mrb[8].mxu1 %vm2347_vm8, %v2333_v5 }
 0x3e7   :  { %v2187_v20 = vpop.permute.xlu0 %2186 }
 0x3e8   :  { %v1800_v45 = vpop.permute.xlu1 %1799  ;;  %2222 = vst.msk [vmem:[#allocation5 + $0x68] sm:$0xff] %vm2208_vm6, %v2187_v20 }
 0x3e9   :  { %1834 = vst.msk [vmem:[#allocation5 + $0x70] sm:$0xff] %vm1819_vm2, %v1800_v45 }
 0x3eb   :  { %v1899_v21 = vpop.permute.xlu0 %1898 }
 0x3ec   :  { %v2185_v22 = vpop.permute.xlu1 %2184  ;;  %1932 = vst.msk [vmem:[#allocation5 + $0x78] sm:$0xff] %vm1916_vm3, %v1899_v21 }
 0x3ed   :  { %2221 = vst.msk [vmem:[#allocation5 + $0x60] sm:$0xff] %vm2208_vm6, %v2185_v22 }
 0x3ef   :  { %v2284_v61 = vpop.permute.xlu0 %2283 }
 0x3f0   :  { %v1897_v23 = vpop.permute.xlu1 %1896  ;;  %2319 = vst.msk [vmem:[#allocation5 + $0x68] sm:$0xff] %vm2305_vm7, %v2284_v61 }
 0x3f1   :  { %1931 = vst.msk [vmem:[#allocation5 + $0x70] sm:$0xff] %vm1916_vm3, %v1897_v23 }
 0x3f3   :  { %v2092_v63 = vpop.permute.xlu0 %2091 }
 0x3f4   :  { %v2282_v31 = vpop.permute.xlu1 %2281 }
 0x3f5   :  { %2318 = vst.msk [vmem:[#allocation5 + $0x60] sm:$0xff] %vm2305_vm7, %v2282_v31 }
 0x3f7   :  { %v2189_v27 = vpop.permute.xlu0 %2188  ;;  %v2335_v32 = vld [vmem:[#allocation5 + $0x68] sm:$0xff] }
 0x3f8   :  { %v1994_v15 = vpop.permute.xlu1 %1993 }
 0x3f9   :  { %2028 = vst.msk [vmem:[#allocation5 + $0x70] sm:$0xff] %vm2013_vm4, %v1994_v15 }
 0x3fa   :  { %2126 = vst.msk [vmem:[#allocation5 + $0x70] sm:$0xff] %vm2111_vm5, %v2092_v63 }
 0x3fb   :  { %2223 = vst.msk [vmem:[#allocation5 + $0x70] sm:$0xff] %vm2208_vm6, %v2189_v27  ;;  %v2286_v47 = vpop.permute.xlu0 %2285 }
 0x3fc   :  { %v1996_v30 = vpop.permute.xlu1 %1995  ;;  %v2334_v3 = vld [vmem:[#allocation5 + $0x60] sm:$0xff]  ;;  %2320 = vst.msk [vmem:[#allocation5 + $0x70] sm:$0xff] %vm2305_vm7, %v2286_v47 }
 0x3fd   :  { %2029 = vst.msk [vmem:[#allocation5 + $0x78] sm:$0xff] %vm2013_vm4, %v1996_v30  ;;  %2966 = vmatprep.mubr.msk.f32.mxu1 %vm2347_vm8, %v2334_v3 }
 0x3fe   :  { %2967 = vmatmul.mubr.msk.f32.gmra.mrb[10].mxu1 %vm2347_vm8, %v2335_v32 }
 0x400   :  { %v2094_v33 = vpop.permute.xlu1 %2093 }
 0x401   :  { %2127 = vst.msk [vmem:[#allocation5 + $0x78] sm:$0xff] %vm2111_vm5, %v2094_v33 }
 0x403   :  { %v2336_v38 = vld [vmem:[#allocation5 + $0x70] sm:$0xff] }
 0x404   :  { %v2191_v37 = vpop.permute.xlu1 %2190  ;;  %2969 = vmatprep.mubr.msk.f32.mxu1 %vm2347_vm8, %v2336_v38 }
 0x405   :  { %2224 = vst.msk [vmem:[#allocation5 + $0x78] sm:$0xff] %vm2208_vm6, %v2191_v37 }
 0x408   :  { %v2288_v40 = vpop.permute.xlu1 %2287 }
 0x409   :  { %2321 = vst.msk [vmem:[#allocation5 + $0x78] sm:$0xff] %vm2305_vm7, %v2288_v40 }
 0x410   :  { %v2337_v42 = vld [vmem:[#allocation5 + $0x78] sm:$0xff] }
 0x411   :  { %2970 = vmatmul.mubr.msk.f32.gmra.mrb[12].mxu1 %vm2347_vm8, %v2337_v42 }
 0x430   :  { %v4329_v43 = vpop.f32.mrb[16].mxu0 }
 0x431   :  { %v2542_v50 = vsel %vm1290_vm13, %v4329_v43, 0.0  ;;  %v2579_v51 = vmul.f32 %v4329_v43, %v4329_v43  ;;  %v4335_v52 = vpop.f32.mrb[17].mxu0 }
 0x432   :  { %v2541_v53 = vsel %vm1290_vm13, %v4335_v52, 0.0  ;;  %v2578_v46 = vmul.f32 %v4335_v52, %v4335_v52 }
 0x433   :  { %v2595_v16 = vsel %vm1290_vm13, %v2579_v51, 0.0  ;;  %v2543_v25 = vadd.f32 %v2542_v50, %v2541_v53 }
 0x434   :  { %v2594_v12 = vsel %vm1290_vm13, %v2578_v46, 0.0 }
 0x435   :  { %v2596_v24 = vadd.f32 %v2595_v16, %v2594_v12 }
 0x440   :  { %v4343_v54 = vpop.f32.mrb[0].mxu1 }
 0x441   :  { %v4345_v36 = vpop.f32.mrb[1].mxu1  ;;  %v2581_v26 = vmul.f32 %v4343_v54, %v4343_v54  ;;  %v2546_v57 = vsel %vm1290_vm13, %v4343_v54, 0.0 }
 0x442   :  { %v2544_v35 = vsel %vm1290_vm13, %v4345_v36, 0.0  ;;  %v2580_v55 = vmul.f32 %v4345_v36, %v4345_v36 }
 0x443   :  { %v2545_v56 = vadd.f32 %v2544_v35, %v2543_v25  ;;  %v2599_v44 = vsel %vm1290_vm13, %v2581_v26, 0.0 }
 0x444   :  { %v2597_v41 = vsel %vm1290_vm13, %v2580_v55, 0.0 }
 0x445   :  { %v2598_v49 = vadd.f32 %v2597_v41, %v2596_v24  ;;  %v2547_v58 = vadd.f32 %v2546_v57, %v2545_v56 }
 0x447   :  { %v2600_v48 = vadd.f32 %v2599_v44, %v2598_v49 }
 0x460   :  { %v4357_v59 = vpop.f32.mrb[2].mxu1 }
 0x461   :  { %v4359_v1 = vpop.f32.mrb[3].mxu1  ;;  %v2583_v60 = vmul.f32 %v4357_v59, %v4357_v59  ;;  %v2550_v2 = vsel %vm1290_vm13, %v4357_v59, 0.0 }
 0x462   :  { %v2548_v62 = vsel %vm1290_vm13, %v4359_v1, 0.0  ;;  %v2582_v17 = vmul.f32 %v4359_v1, %v4359_v1 }
 0x463   :  { %v2549_v14 = vadd.f32 %v2548_v62, %v2547_v58  ;;  %v2603_v7 = vsel %vm1290_vm13, %v2583_v60, 0.0 }
 0x464   :  { %v2601_v4 = vsel %vm1290_vm13, %v2582_v17, 0.0 }
 0x465   :  { %v2602_v34 = vadd.f32 %v2601_v4, %v2600_v48  ;;  %v2551_v6 = vadd.f32 %v2550_v2, %v2549_v14 }
 0x467   :  { %v2604_v8 = vadd.f32 %v2603_v7, %v2602_v34 }
 0x475   :  { %v4371_v9 = vpop.f32.mrb[4].mxu1 }
 0x476   :  { %v4373_v39 = vpop.f32.mrb[5].mxu1  ;;  %v2585_v10 = vmul.f32 %v4371_v9, %v4371_v9  ;;  %v2554_v19 = vsel %vm1290_vm13, %v4371_v9, 0.0 }
 0x477   :  { %v2552_v11 = vsel %vm1290_vm13, %v4373_v39, 0.0  ;;  %v2584_v0 = vmul.f32 %v4373_v39, %v4373_v39 }
 0x478   :  { %v2553_v13 = vadd.f32 %v2552_v11, %v2551_v6  ;;  %v2607_v20 = vsel %vm1290_vm13, %v2585_v10, 0.0 }
 0x479   :  { %v2605_v29 = vsel %vm1290_vm13, %v2584_v0, 0.0 }
 0x47a   :  { %v2606_v18 = vadd.f32 %v2605_v29, %v2604_v8  ;;  %v2555_v5 = vadd.f32 %v2554_v19, %v2553_v13 }
 0x47c   :  { %v2608_v45 = vadd.f32 %v2607_v20, %v2606_v18 }
 0x498   :  { %v4385_v21 = vpop.f32.mrb[6].mxu1 }
 0x499   :  { %v4387_v22 = vpop.f32.mrb[7].mxu1  ;;  %v2587_v61 = vmul.f32 %v4385_v21, %v4385_v21  ;;  %v2558_v27 = vsel %vm1290_vm13, %v4385_v21, 0.0 }
 0x49a   :  { %v2556_v23 = vsel %vm1290_vm13, %v4387_v22, 0.0  ;;  %v2586_v63 = vmul.f32 %v4387_v22, %v4387_v22 }
 0x49b   :  { %v2557_v31 = vadd.f32 %v2556_v23, %v2555_v5  ;;  %v2611_v3 = vsel %vm1290_vm13, %v2587_v61, 0.0 }
 0x49c   :  { %v2609_v15 = vsel %vm1290_vm13, %v2586_v63, 0.0 }
 0x49d   :  { %v2610_v47 = vadd.f32 %v2609_v15, %v2608_v45  ;;  %v2559_v30 = vadd.f32 %v2558_v27, %v2557_v31 }
 0x49f   :  { %v2612_v32 = vadd.f32 %v2611_v3, %v2610_v47 }
 0x4b8   :  { %v4399_v33 = vpop.f32.mrb[8].mxu1 }
 0x4b9   :  { %v4401_v37 = vpop.f32.mrb[9].mxu1  ;;  %v2589_v38 = vmul.f32 %v4399_v33, %v4399_v33  ;;  %v2562_v51 = vsel %vm1290_vm13, %v4399_v33, 0.0 }
 0x4ba   :  { %v2560_v40 = vsel %vm1290_vm13, %v4401_v37, 0.0  ;;  %v2588_v42 = vmul.f32 %v4401_v37, %v4401_v37 }
 0x4bb   :  { %v2561_v50 = vadd.f32 %v2560_v40, %v2559_v30  ;;  %v2615_v25 = vsel %vm1290_vm13, %v2589_v38, 0.0  ;;  %v2636_v40 = vld [vmem:[%s4522_s5] sm:$0x1] }
 0x4bc   :  { %v2613_v53 = vsel %vm1290_vm13, %v2588_v42, 0.0 }
 0x4bd   :  { %v2614_v46 = vadd.f32 %v2613_v53, %v2612_v32  ;;  %v2563_v16 = vadd.f32 %v2562_v51, %v2561_v50  ;;  %v2640_v51 = vld [vmem:[%s4523_s6] sm:$0x1] }
 0x4bf   :  { %v2616_v12 = vadd.f32 %v2615_v25, %v2614_v46 }
 0x4d1   :  { %v4413_v24 = vpop.f32.mrb[10].mxu1 }
 0x4d2   :  { %v4415_v26 = vpop.f32.mrb[11].mxu1  ;;  %v2591_v35 = vmul.f32 %v4413_v24, %v4413_v24  ;;  %v2566_v41 = vsel %vm1290_vm13, %v4413_v24, 0.0 }
 0x4d3   :  { %v2564_v55 = vsel %vm1290_vm13, %v4415_v26, 0.0  ;;  %v2590_v56 = vmul.f32 %v4415_v26, %v4415_v26 }
 0x4d4   :  { %v2565_v57 = vadd.f32 %v2564_v55, %v2563_v16  ;;  %v2619_v48 = vsel %vm1290_vm13, %v2591_v35, 0.0 }
 0x4d5   :  { %v2617_v49 = vsel %vm1290_vm13, %v2590_v56, 0.0 }
 0x4d6   :  { %v2618_v58 = vadd.f32 %v2617_v49, %v2616_v12  ;;  %v2567_v44 = vadd.f32 %v2566_v41, %v2565_v57 }
 0x4d8   :  { %v2620_v60 = vadd.f32 %v2619_v48, %v2618_v58 }
 0x4e4   :  { %v2971_v62 = vpop.f32.mrb[12].mxu1 }
 0x4e5   :  { %v2532_v17 = vpop.f32.mrb[13].mxu1  ;;  %v2593_v14 = vmul.f32 %v2971_v62, %v2971_v62  ;;  %v2570_v6 = vsel %vm1290_vm13, %v2971_v62, 0.0 }
 0x4e6   :  { %v2568_v2 = vsel %vm1290_vm13, %v2532_v17, 0.0  ;;  %v2592_v4 = vmul.f32 %v2532_v17, %v2532_v17 }
 0x4e7   :  { %v2569_v34 = vadd.f32 %v2568_v2, %v2567_v44  ;;  %v2623_v11 = vsel %vm1290_vm13, %v2593_v14, 0.0 }
 0x4e8   :  { %v2621_v7 = vsel %vm1290_vm13, %v2592_v4, 0.0 }
 0x4e9   :  { %v2571_v8 = vadd.f32 %v2570_v6, %v2569_v34  ;;  %v2622_v10 = vadd.f32 %v2621_v7, %v2620_v60 }
 0x4eb   :  { %v2572_v0 = vrot.slane %v2571_v8, 4  ;;  %v2624_v13 = vadd.f32 %v2623_v11, %v2622_v10 }
 0x4ed   :  { %v2573_v19 = vadd.f32 %v2572_v0, %v2571_v8  ;;  %v2625_v29 = vrot.slane %v2624_v13, 4 }
 0x4ef   :  { %v2574_v18 = vrot.slane %v2573_v19, 2  ;;  %v2626_v5 = vadd.f32 %v2625_v29, %v2624_v13 }
 0x4f1   :  { %v2575_v20 = vadd.f32 %v2574_v18, %v2573_v19  ;;  %v2627_v45 = vrot.slane %v2626_v5, 2 }
 0x4f3   :  { %v2576_v61 = vrot.slane %v2575_v20, 1  ;;  %v2628_v23 = vadd.f32 %v2627_v45, %v2626_v5 }
 0x4f5   :  { %v2577_v63 = vadd.f32 %v2576_v61, %v2575_v20  ;;  %v2629_v31 = vrot.slane %v2628_v23, 1 }
 0x4f7   :  { %v2630_v27 = vadd.f32 %v2629_v31, %v2628_v23  ;;  %v2631_v15 = vmul.f32 0.0078125, %v2577_v63 }
 0x4f9   :  { %v2632_v47 = vmul.f32 0.0078125, %v2630_v27  ;;  %v2633_v30 = vmul.f32 %v2631_v15, %v2631_v15 }
 0x4fb   :  { %v2634_v3 = vsub.f32 %v2632_v47, %v2633_v30 }
 0x4fd   :  { %v2635_v32 = vmax.f32 %v2634_v3, 0.0 }
 0x4ff   :  { %v2637_v38 = vadd.f32 1e-05, %v2635_v32 }
 0x501   :  { %3021 = vrsqrt.f32 %v2637_v38 }
 0x50b   :  { %v3022_v42 = vpop.eup %3021 }
 0x50c   :  { %v2639_v50 = vmul.f32 %v3022_v42, %v2636_v40 }
 0x50e   :  { %v2641_v53 = vmul.f32 %v2639_v50, %v2631_v15  ;;  %v2647_v46 = vrot.slane %v2639_v50, %v3920_v28 }
 0x510   :  { %v2642_v16 = vsub.f32 %v2640_v51, %v2641_v53  ;;  %v2649_v25 = vmul.f32 %v2647_v46, %v4335_v52  ;;  %v2650_v12 = vmul.f32 %v4329_v43, %v2647_v46  ;;  %v2651_v35 = vmul.f32 %v2647_v46, %v4345_v36 }
 0x511   :  { %v2652_v55 = vmul.f32 %v4343_v54, %v2647_v46  ;;  %v2653_v56 = vmul.f32 %v2647_v46, %v4359_v1  ;;  %v2654_v57 = vmul.f32 %v4357_v59, %v2647_v46  ;;  %v2655_v41 = vmul.f32 %v2647_v46, %v4373_v39 }
 0x512   :  { %v2656_v49 = vmul.f32 %v4371_v9, %v2647_v46  ;;  %v2657_v58 = vmul.f32 %v2647_v46, %v4387_v22  ;;  %v2658_v44 = vmul.f32 %v4385_v21, %v2647_v46  ;;  %v2659_v52 = vmul.f32 %v2647_v46, %v4401_v37 }
 0x513   :  { %v2660_v43 = vmul.f32 %v4399_v33, %v2647_v46  ;;  %v2661_v36 = vmul.f32 %v2647_v46, %v4415_v26  ;;  %v2662_v54 = vmul.f32 %v4413_v24, %v2647_v46  ;;  %v2663_v48 = vmul.f32 %v2647_v46, %v2532_v17 }
 0x514   :  { %v2664_v1 = vmul.f32 %v2971_v62, %v2647_v46  ;;  %v2669_v59 = vrot.slane %v2642_v16, %v3920_v28 }
 0x516   :  { %v2671_v60 = vadd.f32 %v2669_v59, %v2649_v25  ;;  %v2672_v39 = vadd.f32 %v2669_v59, %v2650_v12  ;;  %v2673_v14 = vadd.f32 %v2669_v59, %v2651_v35  ;;  %v2674_v9 = vadd.f32 %v2669_v59, %v2652_v55 }
 0x517   :  { %v2675_v2 = vadd.f32 %v2669_v59, %v2653_v56  ;;  %v2676_v22 = vadd.f32 %v2669_v59, %v2654_v57  ;;  %v2677_v4 = vadd.f32 %v2669_v59, %v2655_v41  ;;  %v2678_v21 = vadd.f32 %v2669_v59, %v2656_v49 }
 0x518   :  { %v2679_v34 = vadd.f32 %v2669_v59, %v2657_v58  ;;  %v2680_v37 = vadd.f32 %v2669_v59, %v2658_v44  ;;  %v2681_v6 = vadd.f32 %v2669_v59, %v2659_v52  ;;  %v2682_v33 = vadd.f32 %v2669_v59, %v2660_v43 }
 0x519   :  { %v2683_v7 = vadd.f32 %v2669_v59, %v2661_v36  ;;  %v2684_v26 = vadd.f32 %v2669_v59, %v2662_v54  ;;  %v2685_v8 = vadd.f32 %v2669_v59, %v2663_v48  ;;  %v2686_v24 = vadd.f32 %v2669_v59, %v2664_v1 }
 0x51a   :  { %v2687_v17 = vmax.f32 %v2671_v60, 0.0  ;;  %v2688_v62 = vmax.f32 %v2672_v39, 0.0  ;;  %v2689_v10 = vmax.f32 %v2673_v14, 0.0  ;;  %v2690_v28 = vmax.f32 %v2674_v9, 0.0 }
 0x51b   :  { %v2691_v11 = vmax.f32 %v2675_v2, 0.0  ;;  %v2692_v0 = vmax.f32 %v2676_v22, 0.0  ;;  %v2693_v13 = vmax.f32 %v2677_v4, 0.0  ;;  %v2694_v19 = vmax.f32 %v2678_v21, 0.0 }
 0x51c   :  { %v2695_v29 = vmax.f32 %v2679_v34, 0.0  ;;  %v2696_v18 = vmax.f32 %v2680_v37, 0.0  ;;  %v2697_v5 = vmax.f32 %v2681_v6, 0.0  ;;  %v2698_v20 = vmax.f32 %v2682_v33, 0.0  ;;  %2703 = vst.msk [vmem:[%s4524_s7] sm:$0xff] %vm1290_vm13, %v2687_v17  ;;  %2704 = vst.msk [vmem:[%s4524_s7 + $0x8] sm:$0xff] %vm1290_vm13, %v2688_v62 }
 0x51d   :  { %2705 = vst.msk [vmem:[%s4524_s7 + $0x10] sm:$0xff] %vm1290_vm13, %v2689_v10  ;;  %2706 = vst.msk [vmem:[%s4524_s7 + $0x18] sm:$0xff] %vm1290_vm13, %v2690_v28  ;;  %v2699_v45 = vmax.f32 %v2683_v7, 0.0  ;;  %v2700_v61 = vmax.f32 %v2684_v26, 0.0  ;;  %v2701_v23 = vmax.f32 %v2685_v8, 0.0  ;;  %v2702_v63 = vmax.f32 %v2686_v24, 0.0 }
 0x51e   :  { %2707 = vst.msk [vmem:[%s4524_s7 + $0x20] sm:$0xff] %vm1290_vm13, %v2691_v11  ;;  %2708 = vst.msk [vmem:[%s4524_s7 + $0x28] sm:$0xff] %vm1290_vm13, %v2692_v0 }
 0x51f   :  { %2709 = vst.msk [vmem:[%s4524_s7 + $0x30] sm:$0xff] %vm1290_vm13, %v2693_v13  ;;  %2710 = vst.msk [vmem:[%s4524_s7 + $0x38] sm:$0xff] %vm1290_vm13, %v2694_v19 }
 0x520   :  { %2711 = vst.msk [vmem:[%s4524_s7 + $0x40] sm:$0xff] %vm1290_vm13, %v2695_v29  ;;  %2712 = vst.msk [vmem:[%s4524_s7 + $0x48] sm:$0xff] %vm1290_vm13, %v2696_v18 }
 0x521   :  { %2713 = vst.msk [vmem:[%s4524_s7 + $0x50] sm:$0xff] %vm1290_vm13, %v2697_v5  ;;  %2714 = vst.msk [vmem:[%s4524_s7 + $0x58] sm:$0xff] %vm1290_vm13, %v2698_v20 }
 0x522   :  { %2715 = vst.msk [vmem:[%s4524_s7 + $0x60] sm:$0xff] %vm1290_vm13, %v2699_v45  ;;  %2716 = vst.msk [vmem:[%s4524_s7 + $0x68] sm:$0xff] %vm1290_vm13, %v2700_v61 }
 0x523   :  { %2717 = vst.msk [vmem:[%s4524_s7 + $0x70] sm:$0xff] %vm1290_vm13, %v2701_v23  ;;  %2718 = vst.msk [vmem:[%s4524_s7 + $0x78] sm:$0xff] %vm1290_vm13, %v2702_v63 }

</bundles_post_ra>
